<compile_context>
chip_gen: v5e
topology: v5e:2x2
jax: 0.10.0
libtpu: 0.0.40
codegen_flags: <defaults>
</compile_context>

<pallas_src>
import math
import functools

import jax
import jax.numpy as jnp
from jax import lax
from jax.experimental import pallas as pl
from jax.experimental.pallas import tpu as pltpu


_VMEM_LIMIT = 32 * 1024 * 1024  # explicit scoped-VMEM cap, safe on v5e/v6e/v7x


def _round_up(x, m):
    return ((x + m - 1) // m) * m


def _row_tiling(m, max_rows):
    """Pick a row-tile size and padded row count (sublane-friendly, divides evenly)."""
    m16 = _round_up(m, 16)
    if m16 <= max_rows:
        return m16, m16
    return max_rows, _round_up(m16, max_rows)


# ---------------------------------------------------------------------------
# Pallas kernel 1: fused BN affine (+residual)(+ReLU) epilogue
# ---------------------------------------------------------------------------

def _bn_act_kernel(*refs, relu, has_residual):
    if has_residual:
        x_ref, scale_ref, bias_ref, res_ref, o_ref = refs
    else:
        x_ref, scale_ref, bias_ref, o_ref = refs
        res_ref = None
    y = x_ref[...] * scale_ref[...] + bias_ref[...]
    if has_residual:
        y = y + res_ref[...].astype(jnp.float32)
    if relu:
        y = jnp.maximum(y, 0.0)
    o_ref[...] = y.astype(o_ref.dtype)


def bn_act(x2d, scale, bias, residual=None, relu=False, out_dtype=jnp.bfloat16):
    """y = act(x2d * scale + bias [+ residual]) with per-column scale/bias (Pallas)."""
    Mo, Co = x2d.shape
    M, C = Mo, Co
    # Lane-dense fold: make the last dim a multiple of 128 (e.g. C=64 -> view as [M/2, 128])
    # so the output stores are unmasked full-lane writes.
    if C % 128 != 0 and 128 % C == 0 and M % (128 // C) == 0:
        f = 128 // C
        M, C = M // f, C * f
        x2d = x2d.reshape(M, C)
        scale = jnp.tile(scale, f)
        bias = jnp.tile(bias, f)
        if residual is not None:
            residual = residual.reshape(M, C)

    tm, Mp = _row_tiling(M, max_rows=1024)
    if Mp != M:
        x2d = jnp.pad(x2d, ((0, Mp - M), (0, 0)))
        if residual is not None:
            residual = jnp.pad(residual, ((0, Mp - M), (0, 0)))

    has_residual = residual is not None
    in_specs = [
        pl.BlockSpec((tm, C), lambda i: (i, 0)),
        pl.BlockSpec((1, C), lambda i: (0, 0)),
        pl.BlockSpec((1, C), lambda i: (0, 0)),
    ]
    args = [x2d.astype(jnp.float32),
            scale.reshape(1, C).astype(jnp.float32),
            bias.reshape(1, C).astype(jnp.float32)]
    if has_residual:
        in_specs.append(pl.BlockSpec((tm, C), lambda i: (i, 0)))
        args.append(residual)

    out = pl.pallas_call(
        functools.partial(_bn_act_kernel, relu=relu, has_residual=has_residual),
        out_shape=jax.ShapeDtypeStruct((Mp, C), out_dtype),
        grid_spec=pltpu.PrefetchScalarGridSpec(
            num_scalar_prefetch=0,
            grid=(Mp // tm,),
            in_specs=in_specs,
            out_specs=pl.BlockSpec((tm, C), lambda i: (i, 0)),
        ),
        compiler_params=pltpu.CompilerParams(
            dimension_semantics=("parallel",),
            vmem_limit_bytes=_VMEM_LIMIT),
    )(*args)

    out = out[:M]
    if (M, C) != (Mo, Co):
        out = out.reshape(Mo, Co)
    return out


# ---------------------------------------------------------------------------
# Pallas kernel 2: small-K GEMM + fused BN (used for 1x1x1 downsample convs)
# ---------------------------------------------------------------------------

def _matmul_bn_kernel(x_ref, w_ref, scale_ref, bias_ref, o_ref, *, relu):
    y = jnp.dot(x_ref[...], w_ref[...], preferred_element_type=jnp.float32)
    y = y * scale_ref[...] + bias_ref[...]
    if relu:
        y = jnp.maximum(y, 0.0)
    o_ref[...] = y.astype(o_ref.dtype)


def matmul_bn(x, w, scale, bias, relu=False, out_dtype=jnp.bfloat16):
    """out = act((x @ w) * scale + bias).  bf16 inputs, f32 MXU accumulation.

    K is small (<=512 here: 1x1x1 conv channels), so a single K step keeps the whole
    weight tile resident in VMEM and the output is written exactly once (no scratch)."""
    M, K = x.shape
    Kw, N = w.shape
    assert K == Kw
    tm, Mp = _row_tiling(M, max_rows=256)
    if Mp != M:
        x = jnp.pad(x, ((0, Mp - M), (0, 0)))
    tn = 128 if N % 128 == 0 else N           # N axis keeps both v7x cores busy
    grid = (Mp // tm, N // tn)

    out = pl.pallas_call(
        functools.partial(_matmul_bn_kernel, relu=relu),
        out_shape=jax.ShapeDtypeStruct((Mp, N), out_dtype),
        grid_spec=pltpu.PrefetchScalarGridSpec(
            num_scalar_prefetch=0,
            grid=grid,
            in_specs=[
                pl.BlockSpec((tm, K), lambda i, j: (i, 0)),
                pl.BlockSpec((K, tn), lambda i, j: (0, j)),
                pl.BlockSpec((1, tn), lambda i, j: (0, j)),
                pl.BlockSpec((1, tn), lambda i, j: (0, j)),
            ],
            out_specs=pl.BlockSpec((tm, tn), lambda i, j: (i, j)),
        ),
        compiler_params=pltpu.CompilerParams(
            dimension_semantics=("parallel", "parallel"),
            vmem_limit_bytes=_VMEM_LIMIT),
    )(x.astype(jnp.bfloat16), w.astype(jnp.bfloat16),
      scale.reshape(1, N).astype(jnp.float32),
      bias.reshape(1, N).astype(jnp.float32))
    return out[:M]


# ---------------------------------------------------------------------------
# Conv / pooling glue
# ---------------------------------------------------------------------------

def conv3d_bn_act(x, w_dhwio, scale, bias, stride, padding, relu, residual=None):
    """Conv3d (XLA, bf16 in / f32 out, no im2col) + Pallas-fused BN (+residual)(+ReLU)."""
    y = lax.conv_general_dilated(
        x, w_dhwio,
        window_strides=(stride, stride, stride),
        padding=[(padding, padding)] * 3,
        dimension_numbers=('NDHWC', 'DHWIO', 'NDHWC'),
        preferred_element_type=jnp.float32)
    n, do, ho, wo, cout = y.shape
    m = n * do * ho * wo
    res2d = residual.reshape(m, cout) if residual is not None else None
    out2d = bn_act(y.reshape(m, cout), scale, bias, residual=res2d, relu=relu)
    return out2d.reshape(n, do, ho, wo, cout)


def downsample_1x1(x, w_kn, scale, bias, stride):
    """1x1x1 stride-s conv + folded BN as one fused Pallas GEMM (exact, no blow-up)."""
    xs = x[:, ::stride, ::stride, ::stride, :]
    n, do, ho, wo, cin = xs.shape
    cout = w_kn.shape[1]
    y2d = matmul_bn(xs.reshape(n * do * ho * wo, cin), w_kn, scale, bias, relu=False)
    return y2d.reshape(n, do, ho, wo, cout)


def maxpool3d(x, kernel=3, stride=2, padding=1):
    """MaxPool3d(kernel=3, stride=2, padding=1) on NDHWC — XLA reduce_window
    (-inf padding, no 27x tap materialization)."""
    neg_inf = jnp.array(-jnp.inf, dtype=x.dtype)
    return lax.reduce_window(
        x, neg_inf, lax.max,
        window_dimensions=(1, kernel, kernel, kernel, 1),
        window_strides=(1, stride, stride, stride, 1),
        padding=((0, 0), (padding, padding), (padding, padding),
                 (padding, padding), (0, 0)))


def basic_block(x, bp, stride):
    identity = x
    out = conv3d_bn_act(x, bp['conv1_w'], *bp['bn1'],
                        stride=stride, padding=1, relu=True)
    # Dropout3d(p=0.5): identity in eval mode.
    if 'down_w' in bp:
        identity = downsample_1x1(x, bp['down_w'], *bp['down_bn'], stride=stride)
    # conv2 + bn2 (+dropout2=identity) + residual add + ReLU; epilogue fused in Pallas.
    out = conv3d_bn_act(out, bp['conv2_w'], *bp['bn2'],
                        stride=1, padding=1, relu=True, residual=identity)
    return out


# ---------------------------------------------------------------------------
# Deterministic parameter init (mirrors PyTorch __init__, pre-transformed layouts)
# ---------------------------------------------------------------------------

def _kaiming_conv(key, cout, cin, k):
    fan_out = cout * k * k * k                 # kaiming_normal_, mode='fan_out'
    std = math.sqrt(2.0 / fan_out)
    return std * jax.random.normal(key, (cout, cin, k, k, k), jnp.float32)


def _to_dhwio(w):
    # PyTorch [Cout, Cin, kD, kH, kW] -> lax.conv DHWIO [kD, kH, kW, Cin, Cout], bf16.
    return jnp.transpose(w, (2, 3, 4, 1, 0)).astype(jnp.bfloat16)


def _bn_affine(c, eps=1e-5):
    # PyTorch init: weight=1, bias=0, running_mean=0, running_var=1 (eval-mode fold).
    gamma = jnp.ones((c,), jnp.float32)
    beta = jnp.zeros((c,), jnp.float32)
    mean = jnp.zeros((c,), jnp.float32)
    var = jnp.ones((c,), jnp.float32)
    scale = gamma / jnp.sqrt(var + eps)
    bias = beta - mean * scale
    return scale, bias


def init_params(key, layers=(1, 1, 1, 1), num_classes=2):
    keys = iter(jax.random.split(key, 256))
    params = {
        'conv1_w': _to_dhwio(_kaiming_conv(next(keys), 64, 1, 7)),
        'bn1': _bn_affine(64),
        'layers': [],
    }
    inplanes = 64
    for planes, nblocks, stride in zip((64, 128, 256, 512), layers, (1, 2, 2, 2)):
        blocks = []
        for bi in range(nblocks):
            s = stride if bi == 0 else 1
            bp = {
                'conv1_w': _to_dhwio(_kaiming_conv(next(keys), planes, inplanes, 3)),
                'bn1': _bn_affine(planes),
                'conv2_w': _to_dhwio(_kaiming_conv(next(keys), planes, planes, 3)),
                'bn2': _bn_affine(planes),
            }
            if s != 1 or inplanes != planes:
                dw = _kaiming_conv(next(keys), planes, inplanes, 1)
                bp['down_w'] = dw.reshape(planes, inplanes).T.astype(jnp.bfloat16)
                bp['down_bn'] = _bn_affine(planes)
            inplanes = planes
            blocks.append(bp)
        params['layers'].append(blocks)
    bound = 1.0 / math.sqrt(512)
    fc_w = jax.random.uniform(next(keys), (num_classes, 512), jnp.float32, -bound, bound)
    params['fc_w'] = fc_w.T                       # [512, num_classes], pre-transposed
    params['fc_b'] = jax.random.uniform(next(keys), (num_classes,),
                                        jnp.float32, -bound, bound)
    return params


# ---------------------------------------------------------------------------
# Full forward (matches ResNet3D.forward, eval semantics)
# ---------------------------------------------------------------------------

def resnet3d_forward(params, x_ncdhw):
    # PyTorch NCDHW -> NDHWC, bf16 activations (MXU-native).
    x = jnp.transpose(x_ncdhw, (0, 2, 3, 4, 1)).astype(jnp.bfloat16)
    x = conv3d_bn_act(x, params['conv1_w'], *params['bn1'],
                      stride=2, padding=3, relu=True)          # conv1 + bn1 + relu
    x = maxpool3d(x)                                           # maxpool
    for li, layer_blocks in enumerate(params['layers']):       # layer1..layer4
        for bi, bp in enumerate(layer_blocks):
            stride = 2 if (li > 0 and bi == 0) else 1
            x = basic_block(x, bp, stride)
    feat = jnp.mean(x.astype(jnp.float32), axis=(1, 2, 3))     # AdaptiveAvgPool3d + flatten
    # Dropout(p=0.5): identity in eval mode.
    # TODO(synk): training-mode Dropout / batch-stat BatchNorm not implemented (eval only).
    logits = feat @ params['fc_w'] + params['fc_b']            # fc (tiny -> plain XLA)
    return logits                                              # (self.sig unused in forward)


# ---------------------------------------------------------------------------

if __name__ == "__main__":
    key = jax.random.PRNGKey(0)
    pkey, xkey = jax.random.split(key)
    params = init_params(pkey, layers=(1, 1, 1, 1), num_classes=2)
    # Small input consistent with Conv3d(1, 64, ...): [N=2, C=1, D=H=W=16]
    x = jax.random.normal(xkey, (2, 1, 16, 16, 16), jnp.float32)
    fwd = jax.jit(resnet3d_forward)
    out = jax.block_until_ready(fwd(params, x))
    assert out.shape == (2, 2), out.shape
    assert bool(jnp.all(jnp.isfinite(out)))
    print("KERNEL_OK")
</pallas_src>

<mosaic_0001>
module attributes {stable_mosaic.version = 11 : i64} {
  func.func @_bn_act_kernel(%arg0: i32, %arg1: memref<512x128xf32, #tpu.memory_space<vmem>>, %arg2: memref<1x128xf32, #tpu.memory_space<vmem>>, %arg3: memref<1x128xf32, #tpu.memory_space<vmem>>, %arg4: memref<512x128xbf16, #tpu.memory_space<vmem>>) attributes {dimension_semantics = [#tpu.dimension_semantics<parallel>], iteration_bounds = array<i64: 1>, scalar_prefetch = 0 : i64, scratch_operands = 0 : i64, tpu.core_type = #tpu.core_type<tc>, window_params = [{transform_indices = @transform_0, window_bounds = array<i64: 512, 128>}, {pipeline_mode = #tpu.pipeline_mode<synchronous>, transform_indices = @transform_1, window_bounds = array<i64: 1, 128>}, {pipeline_mode = #tpu.pipeline_mode<synchronous>, transform_indices = @transform_2, window_bounds = array<i64: 1, 128>}, {transform_indices = @transform_3, window_bounds = array<i64: 512, 128>}]} {
    %c0 = arith.constant 0 : index
    %c0_0 = arith.constant 0 : index
    %0 = vector.load %arg1[%c0, %c0_0] : memref<512x128xf32, #tpu.memory_space<vmem>>, vector<512x128xf32>
    %c0_1 = arith.constant 0 : index
    %c0_2 = arith.constant 0 : index
    %1 = vector.load %arg2[%c0_1, %c0_2] : memref<1x128xf32, #tpu.memory_space<vmem>>, vector<1x128xf32>
    %2 = vector.broadcast %1 : vector<1x128xf32> to vector<512x128xf32>
    %3 = arith.mulf %0, %2 : vector<512x128xf32>
    %c0_3 = arith.constant 0 : index
    %c0_4 = arith.constant 0 : index
    %4 = vector.load %arg3[%c0_3, %c0_4] : memref<1x128xf32, #tpu.memory_space<vmem>>, vector<1x128xf32>
    %5 = vector.broadcast %4 : vector<1x128xf32> to vector<512x128xf32>
    %6 = arith.addf %3, %5 : vector<512x128xf32>
    %cst = arith.constant 0.000000e+00 : f32
    %7 = vector.broadcast %cst : f32 to vector<512x128xf32>
    %8 = arith.maximumf %6, %7 : vector<512x128xf32>
    %9 = arith.truncf %8 : vector<512x128xf32> to vector<512x128xbf16>
    %c0_5 = arith.constant 0 : index
    %c0_6 = arith.constant 0 : index
    %10 = vector.load %arg4[%c0_5, %c0_6] : memref<512x128xbf16, #tpu.memory_space<vmem>>, vector<512x128xbf16>
    tpu.vector_store %arg4[%c0_5, %c0_6], %9 {strides = array<i32>} : memref<512x128xbf16, #tpu.memory_space<vmem>>, vector<512x128xbf16>,
    return
  }
  func.func @transform_0(%arg0: i32) -> (i32, i32) {
    %c0_i32 = arith.constant 0 : i32
    %c0_i32_0 = arith.constant 0 : i32
    return %arg0, %c0_i32 : i32, i32
  }
  func.func @transform_1(%arg0: i32) -> (i32, i32) {
    %c0_i32 = arith.constant 0 : i32
    %c0_i32_0 = arith.constant 0 : i32
    %c0_i32_1 = arith.constant 0 : i32
    return %c0_i32, %c0_i32_0 : i32, i32
  }
  func.func @transform_2(%arg0: i32) -> (i32, i32) {
    %c0_i32 = arith.constant 0 : i32
    %c0_i32_0 = arith.constant 0 : i32
    %c0_i32_1 = arith.constant 0 : i32
    return %c0_i32, %c0_i32_0 : i32, i32
  }
  func.func @transform_3(%arg0: i32) -> (i32, i32) {
    %c0_i32 = arith.constant 0 : i32
    %c0_i32_0 = arith.constant 0 : i32
    return %arg0, %c0_i32 : i32, i32
  }
}

module attributes {stable_mosaic.version = 11 : i64} {
  func.func @_bn_act_kernel(%arg0: i32, %arg1: memref<64x128xf32, #tpu.memory_space<vmem>>, %arg2: memref<1x128xf32, #tpu.memory_space<vmem>>, %arg3: memref<1x128xf32, #tpu.memory_space<vmem>>, %arg4: memref<64x128xbf16, #tpu.memory_space<vmem>>) attributes {dimension_semantics = [#tpu.dimension_semantics<parallel>], iteration_bounds = array<i64: 1>, scalar_prefetch = 0 : i64, scratch_operands = 0 : i64, tpu.core_type = #tpu.core_type<tc>, window_params = [{transform_indices = @transform_0, window_bounds = array<i64: 64, 128>}, {pipeline_mode = #tpu.pipeline_mode<synchronous>, transform_indices = @transform_1, window_bounds = array<i64: 1, 128>}, {pipeline_mode = #tpu.pipeline_mode<synchronous>, transform_indices = @transform_2, window_bounds = array<i64: 1, 128>}, {transform_indices = @transform_3, window_bounds = array<i64: 64, 128>}]} {
    %c0 = arith.constant 0 : index
    %c0_0 = arith.constant 0 : index
    %0 = vector.load %arg1[%c0, %c0_0] : memref<64x128xf32, #tpu.memory_space<vmem>>, vector<64x128xf32>
    %c0_1 = arith.constant 0 : index
    %c0_2 = arith.constant 0 : index
    %1 = vector.load %arg2[%c0_1, %c0_2] : memref<1x128xf32, #tpu.memory_space<vmem>>, vector<1x128xf32>
    %2 = vector.broadcast %1 : vector<1x128xf32> to vector<64x128xf32>
    %3 = arith.mulf %0, %2 : vector<64x128xf32>
    %c0_3 = arith.constant 0 : index
    %c0_4 = arith.constant 0 : index
    %4 = vector.load %arg3[%c0_3, %c0_4] : memref<1x128xf32, #tpu.memory_space<vmem>>, vector<1x128xf32>
    %5 = vector.broadcast %4 : vector<1x128xf32> to vector<64x128xf32>
    %6 = arith.addf %3, %5 : vector<64x128xf32>
    %cst = arith.constant 0.000000e+00 : f32
    %7 = vector.broadcast %cst : f32 to vector<64x128xf32>
    %8 = arith.maximumf %6, %7 : vector<64x128xf32>
    %9 = arith.truncf %8 : vector<64x128xf32> to vector<64x128xbf16>
    %c0_5 = arith.constant 0 : index
    %c0_6 = arith.constant 0 : index
    %10 = vector.load %arg4[%c0_5, %c0_6] : memref<64x128xbf16, #tpu.memory_space<vmem>>, vector<64x128xbf16>
    tpu.vector_store %arg4[%c0_5, %c0_6], %9 {strides = array<i32>} : memref<64x128xbf16, #tpu.memory_space<vmem>>, vector<64x128xbf16>,
    return
  }
  func.func @transform_0(%arg0: i32) -> (i32, i32) {
    %c0_i32 = arith.constant 0 : i32
    %c0_i32_0 = arith.constant 0 : i32
    return %arg0, %c0_i32 : i32, i32
  }
  func.func @transform_1(%arg0: i32) -> (i32, i32) {
    %c0_i32 = arith.constant 0 : i32
    %c0_i32_0 = arith.constant 0 : i32
    %c0_i32_1 = arith.constant 0 : i32
    return %c0_i32, %c0_i32_0 : i32, i32
  }
  func.func @transform_2(%arg0: i32) -> (i32, i32) {
    %c0_i32 = arith.constant 0 : i32
    %c0_i32_0 = arith.constant 0 : i32
    %c0_i32_1 = arith.constant 0 : i32
    return %c0_i32, %c0_i32_0 : i32, i32
  }
  func.func @transform_3(%arg0: i32) -> (i32, i32) {
    %c0_i32 = arith.constant 0 : i32
    %c0_i32_0 = arith.constant 0 : i32
    return %arg0, %c0_i32 : i32, i32
  }
}

module attributes {stable_mosaic.version = 11 : i64} {
  func.func @_bn_act_kernel(%arg0: i32, %arg1: memref<64x128xf32, #tpu.memory_space<vmem>>, %arg2: memref<1x128xf32, #tpu.memory_space<vmem>>, %arg3: memref<1x128xf32, #tpu.memory_space<vmem>>, %arg4: memref<64x128xbf16, #tpu.memory_space<vmem>>, %arg5: memref<64x128xbf16, #tpu.memory_space<vmem>>) attributes {dimension_semantics = [#tpu.dimension_semantics<parallel>], iteration_bounds = array<i64: 1>, scalar_prefetch = 0 : i64, scratch_operands = 0 : i64, tpu.core_type = #tpu.core_type<tc>, window_params = [{transform_indices = @transform_0, window_bounds = array<i64: 64, 128>}, {pipeline_mode = #tpu.pipeline_mode<synchronous>, transform_indices = @transform_1, window_bounds = array<i64: 1, 128>}, {pipeline_mode = #tpu.pipeline_mode<synchronous>, transform_indices = @transform_2, window_bounds = array<i64: 1, 128>}, {transform_indices = @transform_3, window_bounds = array<i64: 64, 128>}, {transform_indices = @transform_4, window_bounds = array<i64: 64, 128>}]} {
    %c0 = arith.constant 0 : index
    %c0_0 = arith.constant 0 : index
    %0 = vector.load %arg1[%c0, %c0_0] : memref<64x128xf32, #tpu.memory_space<vmem>>, vector<64x128xf32>
    %c0_1 = arith.constant 0 : index
    %c0_2 = arith.constant 0 : index
    %1 = vector.load %arg2[%c0_1, %c0_2] : memref<1x128xf32, #tpu.memory_space<vmem>>, vector<1x128xf32>
    %2 = vector.broadcast %1 : vector<1x128xf32> to vector<64x128xf32>
    %3 = arith.mulf %0, %2 : vector<64x128xf32>
    %c0_3 = arith.constant 0 : index
    %c0_4 = arith.constant 0 : index
    %4 = vector.load %arg3[%c0_3, %c0_4] : memref<1x128xf32, #tpu.memory_space<vmem>>, vector<1x128xf32>
    %5 = vector.broadcast %4 : vector<1x128xf32> to vector<64x128xf32>
    %6 = arith.addf %3, %5 : vector<64x128xf32>
    %c0_5 = arith.constant 0 : index
    %c0_6 = arith.constant 0 : index
    %7 = vector.load %arg4[%c0_5, %c0_6] : memref<64x128xbf16, #tpu.memory_space<vmem>>, vector<64x128xbf16>
    %8 = arith.extf %7 : vector<64x128xbf16> to vector<64x128xf32>
    %9 = arith.addf %6, %8 : vector<64x128xf32>
    %cst = arith.constant 0.000000e+00 : f32
    %10 = vector.broadcast %cst : f32 to vector<64x128xf32>
    %11 = arith.maximumf %9, %10 : vector<64x128xf32>
    %12 = arith.truncf %11 : vector<64x128xf32> to vector<64x128xbf16>
    %c0_7 = arith.constant 0 : index
    %c0_8 = arith.constant 0 : index
    %13 = vector.load %arg5[%c0_7, %c0_8] : memref<64x128xbf16, #tpu.memory_space<vmem>>, vector<64x128xbf16>
    tpu.vector_store %arg5[%c0_7, %c0_8], %12 {strides = array<i32>} : memref<64x128xbf16, #tpu.memory_space<vmem>>, vector<64x128xbf16>,
    return
  }
  func.func @transform_0(%arg0: i32) -> (i32, i32) {
    %c0_i32 = arith.constant 0 : i32
    %c0_i32_0 = arith.constant 0 : i32
    return %arg0, %c0_i32 : i32, i32
  }
  func.func @transform_1(%arg0: i32) -> (i32, i32) {
    %c0_i32 = arith.constant 0 : i32
    %c0_i32_0 = arith.constant 0 : i32
    %c0_i32_1 = arith.constant 0 : i32
    return %c0_i32, %c0_i32_0 : i32, i32
  }
  func.func @transform_2(%arg0: i32) -> (i32, i32) {
    %c0_i32 = arith.constant 0 : i32
    %c0_i32_0 = arith.constant 0 : i32
    %c0_i32_1 = arith.constant 0 : i32
    return %c0_i32, %c0_i32_0 : i32, i32
  }
  func.func @transform_3(%arg0: i32) -> (i32, i32) {
    %c0_i32 = arith.constant 0 : i32
    %c0_i32_0 = arith.constant 0 : i32
    return %arg0, %c0_i32 : i32, i32
  }
  func.func @transform_4(%arg0: i32) -> (i32, i32) {
    %c0_i32 = arith.constant 0 : i32
    %c0_i32_0 = arith.constant 0 : i32
    return %arg0, %c0_i32 : i32, i32
  }
}

module attributes {stable_mosaic.version = 11 : i64} {
  func.func @_bn_act_kernel(%arg0: i32, %arg1: memref<16x128xf32, #tpu.memory_space<vmem>>, %arg2: memref<1x128xf32, #tpu.memory_space<vmem>>, %arg3: memref<1x128xf32, #tpu.memory_space<vmem>>, %arg4: memref<16x128xbf16, #tpu.memory_space<vmem>>) attributes {dimension_semantics = [#tpu.dimension_semantics<parallel>], iteration_bounds = array<i64: 1>, scalar_prefetch = 0 : i64, scratch_operands = 0 : i64, tpu.core_type = #tpu.core_type<tc>, window_params = [{transform_indices = @transform_0, window_bounds = array<i64: 16, 128>}, {pipeline_mode = #tpu.pipeline_mode<synchronous>, transform_indices = @transform_1, window_bounds = array<i64: 1, 128>}, {pipeline_mode = #tpu.pipeline_mode<synchronous>, transform_indices = @transform_2, window_bounds = array<i64: 1, 128>}, {transform_indices = @transform_3, window_bounds = array<i64: 16, 128>}]} {
    %c0 = arith.constant 0 : index
    %c0_0 = arith.constant 0 : index
    %0 = vector.load %arg1[%c0, %c0_0] : memref<16x128xf32, #tpu.memory_space<vmem>>, vector<16x128xf32>
    %c0_1 = arith.constant 0 : index
    %c0_2 = arith.constant 0 : index
    %1 = vector.load %arg2[%c0_1, %c0_2] : memref<1x128xf32, #tpu.memory_space<vmem>>, vector<1x128xf32>
    %2 = vector.broadcast %1 : vector<1x128xf32> to vector<16x128xf32>
    %3 = arith.mulf %0, %2 : vector<16x128xf32>
    %c0_3 = arith.constant 0 : index
    %c0_4 = arith.constant 0 : index
    %4 = vector.load %arg3[%c0_3, %c0_4] : memref<1x128xf32, #tpu.memory_space<vmem>>, vector<1x128xf32>
    %5 = vector.broadcast %4 : vector<1x128xf32> to vector<16x128xf32>
    %6 = arith.addf %3, %5 : vector<16x128xf32>
    %cst = arith.constant 0.000000e+00 : f32
    %7 = vector.broadcast %cst : f32 to vector<16x128xf32>
    %8 = arith.maximumf %6, %7 : vector<16x128xf32>
    %9 = arith.truncf %8 : vector<16x128xf32> to vector<16x128xbf16>
    %c0_5 = arith.constant 0 : index
    %c0_6 = arith.constant 0 : index
    %10 = vector.load %arg4[%c0_5, %c0_6] : memref<16x128xbf16, #tpu.memory_space<vmem>>, vector<16x128xbf16>
    tpu.vector_store %arg4[%c0_5, %c0_6], %9 {strides = array<i32>} : memref<16x128xbf16, #tpu.memory_space<vmem>>, vector<16x128xbf16>,
    return
  }
  func.func @transform_0(%arg0: i32) -> (i32, i32) {
    %c0_i32 = arith.constant 0 : i32
    %c0_i32_0 = arith.constant 0 : i32
    return %arg0, %c0_i32 : i32, i32
  }
  func.func @transform_1(%arg0: i32) -> (i32, i32) {
    %c0_i32 = arith.constant 0 : i32
    %c0_i32_0 = arith.constant 0 : i32
    %c0_i32_1 = arith.constant 0 : i32
    return %c0_i32, %c0_i32_0 : i32, i32
  }
  func.func @transform_2(%arg0: i32) -> (i32, i32) {
    %c0_i32 = arith.constant 0 : i32
    %c0_i32_0 = arith.constant 0 : i32
    %c0_i32_1 = arith.constant 0 : i32
    return %c0_i32, %c0_i32_0 : i32, i32
  }
  func.func @transform_3(%arg0: i32) -> (i32, i32) {
    %c0_i32 = arith.constant 0 : i32
    %c0_i32_0 = arith.constant 0 : i32
    return %arg0, %c0_i32 : i32, i32
  }
}

module attributes {stable_mosaic.version = 11 : i64} {
  func.func @_matmul_bn_kernel(%arg0: i32, %arg1: i32, %arg2: memref<16x64xbf16, #tpu.memory_space<vmem>>, %arg3: memref<64x128xbf16, #tpu.memory_space<vmem>>, %arg4: memref<1x128xf32, #tpu.memory_space<vmem>>, %arg5: memref<1x128xf32, #tpu.memory_space<vmem>>, %arg6: memref<16x128xbf16, #tpu.memory_space<vmem>>) attributes {dimension_semantics = [#tpu.dimension_semantics<parallel>, #tpu.dimension_semantics<parallel>], iteration_bounds = array<i64: 1, 1>, scalar_prefetch = 0 : i64, scratch_operands = 0 : i64, tpu.core_type = #tpu.core_type<tc>, window_params = [{transform_indices = @transform_0, window_bounds = array<i64: 16, 64>}, {transform_indices = @transform_1, window_bounds = array<i64: 64, 128>}, {transform_indices = @transform_2, window_bounds = array<i64: 1, 128>}, {transform_indices = @transform_3, window_bounds = array<i64: 1, 128>}, {transform_indices = @transform_4, window_bounds = array<i64: 16, 128>}]} {
    %c0 = arith.constant 0 : index
    %c0_0 = arith.constant 0 : index
    %0 = vector.load %arg2[%c0, %c0_0] : memref<16x64xbf16, #tpu.memory_space<vmem>>, vector<16x64xbf16>
    %c0_1 = arith.constant 0 : index
    %c0_2 = arith.constant 0 : index
    %1 = vector.load %arg3[%c0_1, %c0_2] : memref<64x128xbf16, #tpu.memory_space<vmem>>, vector<64x128xbf16>
    %cst = arith.constant dense<0.000000e+00> : vector<16x128xf32>
    %2 = tpu.matmul %0, %1, %cst {dimension_numbers = #tpu.dot_dimension_numbers<[1], [0], [0], [1], [0, 0, 1, 1], [], []>} : vector<16x64xbf16>, vector<64x128xbf16>, vector<16x128xf32> -> vector<16x128xf32>
    %c0_3 = arith.constant 0 : index
    %c0_4 = arith.constant 0 : index
    %3 = vector.load %arg4[%c0_3, %c0_4] : memref<1x128xf32, #tpu.memory_space<vmem>>, vector<1x128xf32>
    %4 = vector.broadcast %3 : vector<1x128xf32> to vector<16x128xf32>
    %5 = arith.mulf %2, %4 : vector<16x128xf32>
    %c0_5 = arith.constant 0 : index
    %c0_6 = arith.constant 0 : index
    %6 = vector.load %arg5[%c0_5, %c0_6] : memref<1x128xf32, #tpu.memory_space<vmem>>, vector<1x128xf32>
    %7 = vector.broadcast %6 : vector<1x128xf32> to vector<16x128xf32>
    %8 = arith.addf %5, %7 : vector<16x128xf32>
    %9 = arith.truncf %8 : vector<16x128xf32> to vector<16x128xbf16>
    %c0_7 = arith.constant 0 : index
    %c0_8 = arith.constant 0 : index
    %10 = vector.load %arg6[%c0_7, %c0_8] : memref<16x128xbf16, #tpu.memory_space<vmem>>, vector<16x128xbf16>
    tpu.vector_store %arg6[%c0_7, %c0_8], %9 {strides = array<i32>} : memref<16x128xbf16, #tpu.memory_space<vmem>>, vector<16x128xbf16>,
    return
  }
  func.func @transform_0(%arg0: i32, %arg1: i32) -> (i32, i32) {
    %c0_i32 = arith.constant 0 : i32
    %c0_i32_0 = arith.constant 0 : i32
    return %arg0, %c0_i32 : i32, i32
  }
  func.func @transform_1(%arg0: i32, %arg1: i32) -> (i32, i32) {
    %c0_i32 = arith.constant 0 : i32
    %c0_i32_0 = arith.constant 0 : i32
    return %c0_i32, %arg1 : i32, i32
  }
  func.func @transform_2(%arg0: i32, %arg1: i32) -> (i32, i32) {
    %c0_i32 = arith.constant 0 : i32
    %c0_i32_0 = arith.constant 0 : i32
    return %c0_i32, %arg1 : i32, i32
  }
  func.func @transform_3(%arg0: i32, %arg1: i32) -> (i32, i32) {
    %c0_i32 = arith.constant 0 : i32
    %c0_i32_0 = arith.constant 0 : i32
    return %c0_i32, %arg1 : i32, i32
  }
  func.func @transform_4(%arg0: i32, %arg1: i32) -> (i32, i32) {
    %c0_i32 = arith.constant 0 : i32
    return %arg0, %arg1 : i32, i32
  }
}

module attributes {stable_mosaic.version = 11 : i64} {
  func.func @_bn_act_kernel(%arg0: i32, %arg1: memref<16x128xf32, #tpu.memory_space<vmem>>, %arg2: memref<1x128xf32, #tpu.memory_space<vmem>>, %arg3: memref<1x128xf32, #tpu.memory_space<vmem>>, %arg4: memref<16x128xbf16, #tpu.memory_space<vmem>>, %arg5: memref<16x128xbf16, #tpu.memory_space<vmem>>) attributes {dimension_semantics = [#tpu.dimension_semantics<parallel>], iteration_bounds = array<i64: 1>, scalar_prefetch = 0 : i64, scratch_operands = 0 : i64, tpu.core_type = #tpu.core_type<tc>, window_params = [{transform_indices = @transform_0, window_bounds = array<i64: 16, 128>}, {pipeline_mode = #tpu.pipeline_mode<synchronous>, transform_indices = @transform_1, window_bounds = array<i64: 1, 128>}, {pipeline_mode = #tpu.pipeline_mode<synchronous>, transform_indices = @transform_2, window_bounds = array<i64: 1, 128>}, {transform_indices = @transform_3, window_bounds = array<i64: 16, 128>}, {transform_indices = @transform_4, window_bounds = array<i64: 16, 128>}]} {
    %c0 = arith.constant 0 : index
    %c0_0 = arith.constant 0 : index
    %0 = vector.load %arg1[%c0, %c0_0] : memref<16x128xf32, #tpu.memory_space<vmem>>, vector<16x128xf32>
    %c0_1 = arith.constant 0 : index
    %c0_2 = arith.constant 0 : index
    %1 = vector.load %arg2[%c0_1, %c0_2] : memref<1x128xf32, #tpu.memory_space<vmem>>, vector<1x128xf32>
    %2 = vector.broadcast %1 : vector<1x128xf32> to vector<16x128xf32>
    %3 = arith.mulf %0, %2 : vector<16x128xf32>
    %c0_3 = arith.constant 0 : index
    %c0_4 = arith.constant 0 : index
    %4 = vector.load %arg3[%c0_3, %c0_4] : memref<1x128xf32, #tpu.memory_space<vmem>>, vector<1x128xf32>
    %5 = vector.broadcast %4 : vector<1x128xf32> to vector<16x128xf32>
    %6 = arith.addf %3, %5 : vector<16x128xf32>
    %c0_5 = arith.constant 0 : index
    %c0_6 = arith.constant 0 : index
    %7 = vector.load %arg4[%c0_5, %c0_6] : memref<16x128xbf16, #tpu.memory_space<vmem>>, vector<16x128xbf16>
    %8 = arith.extf %7 : vector<16x128xbf16> to vector<16x128xf32>
    %9 = arith.addf %6, %8 : vector<16x128xf32>
    %cst = arith.constant 0.000000e+00 : f32
    %10 = vector.broadcast %cst : f32 to vector<16x128xf32>
    %11 = arith.maximumf %9, %10 : vector<16x128xf32>
    %12 = arith.truncf %11 : vector<16x128xf32> to vector<16x128xbf16>
    %c0_7 = arith.constant 0 : index
    %c0_8 = arith.constant 0 : index
    %13 = vector.load %arg5[%c0_7, %c0_8] : memref<16x128xbf16, #tpu.memory_space<vmem>>, vector<16x128xbf16>
    tpu.vector_store %arg5[%c0_7, %c0_8], %12 {strides = array<i32>} : memref<16x128xbf16, #tpu.memory_space<vmem>>, vector<16x128xbf16>,
    return
  }
  func.func @transform_0(%arg0: i32) -> (i32, i32) {
    %c0_i32 = arith.constant 0 : i32
    %c0_i32_0 = arith.constant 0 : i32
    return %arg0, %c0_i32 : i32, i32
  }
  func.func @transform_1(%arg0: i32) -> (i32, i32) {
    %c0_i32 = arith.constant 0 : i32
    %c0_i32_0 = arith.constant 0 : i32
    %c0_i32_1 = arith.constant 0 : i32
    return %c0_i32, %c0_i32_0 : i32, i32
  }
  func.func @transform_2(%arg0: i32) -> (i32, i32) {
    %c0_i32 = arith.constant 0 : i32
    %c0_i32_0 = arith.constant 0 : i32
    %c0_i32_1 = arith.constant 0 : i32
    return %c0_i32, %c0_i32_0 : i32, i32
  }
  func.func @transform_3(%arg0: i32) -> (i32, i32) {
    %c0_i32 = arith.constant 0 : i32
    %c0_i32_0 = arith.constant 0 : i32
    return %arg0, %c0_i32 : i32, i32
  }
  func.func @transform_4(%arg0: i32) -> (i32, i32) {
    %c0_i32 = arith.constant 0 : i32
    %c0_i32_0 = arith.constant 0 : i32
    return %arg0, %c0_i32 : i32, i32
  }
}

module attributes {stable_mosaic.version = 11 : i64} {
  func.func @_bn_act_kernel(%arg0: i32, %arg1: memref<16x256xf32, #tpu.memory_space<vmem>>, %arg2: memref<1x256xf32, #tpu.memory_space<vmem>>, %arg3: memref<1x256xf32, #tpu.memory_space<vmem>>, %arg4: memref<16x256xbf16, #tpu.memory_space<vmem>>) attributes {dimension_semantics = [#tpu.dimension_semantics<parallel>], iteration_bounds = array<i64: 1>, scalar_prefetch = 0 : i64, scratch_operands = 0 : i64, tpu.core_type = #tpu.core_type<tc>, window_params = [{transform_indices = @transform_0, window_bounds = array<i64: 16, 256>}, {pipeline_mode = #tpu.pipeline_mode<synchronous>, transform_indices = @transform_1, window_bounds = array<i64: 1, 256>}, {pipeline_mode = #tpu.pipeline_mode<synchronous>, transform_indices = @transform_2, window_bounds = array<i64: 1, 256>}, {transform_indices = @transform_3, window_bounds = array<i64: 16, 256>}]} {
    %c0 = arith.constant 0 : index
    %c0_0 = arith.constant 0 : index
    %0 = vector.load %arg1[%c0, %c0_0] : memref<16x256xf32, #tpu.memory_space<vmem>>, vector<16x256xf32>
    %c0_1 = arith.constant 0 : index
    %c0_2 = arith.constant 0 : index
    %1 = vector.load %arg2[%c0_1, %c0_2] : memref<1x256xf32, #tpu.memory_space<vmem>>, vector<1x256xf32>
    %2 = vector.broadcast %1 : vector<1x256xf32> to vector<16x256xf32>
    %3 = arith.mulf %0, %2 : vector<16x256xf32>
    %c0_3 = arith.constant 0 : index
    %c0_4 = arith.constant 0 : index
    %4 = vector.load %arg3[%c0_3, %c0_4] : memref<1x256xf32, #tpu.memory_space<vmem>>, vector<1x256xf32>
    %5 = vector.broadcast %4 : vector<1x256xf32> to vector<16x256xf32>
    %6 = arith.addf %3, %5 : vector<16x256xf32>
    %cst = arith.constant 0.000000e+00 : f32
    %7 = vector.broadcast %cst : f32 to vector<16x256xf32>
    %8 = arith.maximumf %6, %7 : vector<16x256xf32>
    %9 = arith.truncf %8 : vector<16x256xf32> to vector<16x256xbf16>
    %c0_5 = arith.constant 0 : index
    %c0_6 = arith.constant 0 : index
    %10 = vector.load %arg4[%c0_5, %c0_6] : memref<16x256xbf16, #tpu.memory_space<vmem>>, vector<16x256xbf16>
    tpu.vector_store %arg4[%c0_5, %c0_6], %9 {strides = array<i32>} : memref<16x256xbf16, #tpu.memory_space<vmem>>, vector<16x256xbf16>,
    return
  }
  func.func @transform_0(%arg0: i32) -> (i32, i32) {
    %c0_i32 = arith.constant 0 : i32
    %c0_i32_0 = arith.constant 0 : i32
    return %arg0, %c0_i32 : i32, i32
  }
  func.func @transform_1(%arg0: i32) -> (i32, i32) {
    %c0_i32 = arith.constant 0 : i32
    %c0_i32_0 = arith.constant 0 : i32
    %c0_i32_1 = arith.constant 0 : i32
    return %c0_i32, %c0_i32_0 : i32, i32
  }
  func.func @transform_2(%arg0: i32) -> (i32, i32) {
    %c0_i32 = arith.constant 0 : i32
    %c0_i32_0 = arith.constant 0 : i32
    %c0_i32_1 = arith.constant 0 : i32
    return %c0_i32, %c0_i32_0 : i32, i32
  }
  func.func @transform_3(%arg0: i32) -> (i32, i32) {
    %c0_i32 = arith.constant 0 : i32
    %c0_i32_0 = arith.constant 0 : i32
    return %arg0, %c0_i32 : i32, i32
  }
}

module attributes {stable_mosaic.version = 11 : i64} {
  func.func @_matmul_bn_kernel(%arg0: i32, %arg1: i32, %arg2: memref<16x128xbf16, #tpu.memory_space<vmem>>, %arg3: memref<128x128xbf16, #tpu.memory_space<vmem>>, %arg4: memref<1x128xf32, #tpu.memory_space<vmem>>, %arg5: memref<1x128xf32, #tpu.memory_space<vmem>>, %arg6: memref<16x128xbf16, #tpu.memory_space<vmem>>) attributes {dimension_semantics = [#tpu.dimension_semantics<parallel>, #tpu.dimension_semantics<parallel>], iteration_bounds = array<i64: 1, 2>, scalar_prefetch = 0 : i64, scratch_operands = 0 : i64, tpu.core_type = #tpu.core_type<tc>, window_params = [{transform_indices = @transform_0, window_bounds = array<i64: 16, 128>}, {transform_indices = @transform_1, window_bounds = array<i64: 128, 128>}, {transform_indices = @transform_2, window_bounds = array<i64: 1, 128>}, {transform_indices = @transform_3, window_bounds = array<i64: 1, 128>}, {transform_indices = @transform_4, window_bounds = array<i64: 16, 128>}]} {
    %c0 = arith.constant 0 : index
    %c0_0 = arith.constant 0 : index
    %0 = vector.load %arg2[%c0, %c0_0] : memref<16x128xbf16, #tpu.memory_space<vmem>>, vector<16x128xbf16>
    %c0_1 = arith.constant 0 : index
    %c0_2 = arith.constant 0 : index
    %1 = vector.load %arg3[%c0_1, %c0_2] : memref<128x128xbf16, #tpu.memory_space<vmem>>, vector<128x128xbf16>
    %cst = arith.constant dense<0.000000e+00> : vector<16x128xf32>
    %2 = tpu.matmul %0, %1, %cst {dimension_numbers = #tpu.dot_dimension_numbers<[1], [0], [0], [1], [0, 0, 1, 1], [], []>} : vector<16x128xbf16>, vector<128x128xbf16>, vector<16x128xf32> -> vector<16x128xf32>
    %c0_3 = arith.constant 0 : index
    %c0_4 = arith.constant 0 : index
    %3 = vector.load %arg4[%c0_3, %c0_4] : memref<1x128xf32, #tpu.memory_space<vmem>>, vector<1x128xf32>
    %4 = vector.broadcast %3 : vector<1x128xf32> to vector<16x128xf32>
    %5 = arith.mulf %2, %4 : vector<16x128xf32>
    %c0_5 = arith.constant 0 : index
    %c0_6 = arith.constant 0 : index
    %6 = vector.load %arg5[%c0_5, %c0_6] : memref<1x128xf32, #tpu.memory_space<vmem>>, vector<1x128xf32>
    %7 = vector.broadcast %6 : vector<1x128xf32> to vector<16x128xf32>
    %8 = arith.addf %5, %7 : vector<16x128xf32>
    %9 = arith.truncf %8 : vector<16x128xf32> to vector<16x128xbf16>
    %c0_7 = arith.constant 0 : index
    %c0_8 = arith.constant 0 : index
    %10 = vector.load %arg6[%c0_7, %c0_8] : memref<16x128xbf16, #tpu.memory_space<vmem>>, vector<16x128xbf16>
    tpu.vector_store %arg6[%c0_7, %c0_8], %9 {strides = array<i32>} : memref<16x128xbf16, #tpu.memory_space<vmem>>, vector<16x128xbf16>,
    return
  }
  func.func @transform_0(%arg0: i32, %arg1: i32) -> (i32, i32) {
    %c0_i32 = arith.constant 0 : i32
    %c0_i32_0 = arith.constant 0 : i32
    return %arg0, %c0_i32 : i32, i32
  }
  func.func @transform_1(%arg0: i32, %arg1: i32) -> (i32, i32) {
    %c0_i32 = arith.constant 0 : i32
    %c0_i32_0 = arith.constant 0 : i32
    return %c0_i32, %arg1 : i32, i32
  }
  func.func @transform_2(%arg0: i32, %arg1: i32) -> (i32, i32) {
    %c0_i32 = arith.constant 0 : i32
    %c0_i32_0 = arith.constant 0 : i32
    return %c0_i32, %arg1 : i32, i32
  }
  func.func @transform_3(%arg0: i32, %arg1: i32) -> (i32, i32) {
    %c0_i32 = arith.constant 0 : i32
    %c0_i32_0 = arith.constant 0 : i32
    return %c0_i32, %arg1 : i32, i32
  }
  func.func @transform_4(%arg0: i32, %arg1: i32) -> (i32, i32) {
    %c0_i32 = arith.constant 0 : i32
    return %arg0, %arg1 : i32, i32
  }
}

module attributes {stable_mosaic.version = 11 : i64} {
  func.func @_bn_act_kernel(%arg0: i32, %arg1: memref<16x256xf32, #tpu.memory_space<vmem>>, %arg2: memref<1x256xf32, #tpu.memory_space<vmem>>, %arg3: memref<1x256xf32, #tpu.memory_space<vmem>>, %arg4: memref<16x256xbf16, #tpu.memory_space<vmem>>, %arg5: memref<16x256xbf16, #tpu.memory_space<vmem>>) attributes {dimension_semantics = [#tpu.dimension_semantics<parallel>], iteration_bounds = array<i64: 1>, scalar_prefetch = 0 : i64, scratch_operands = 0 : i64, tpu.core_type = #tpu.core_type<tc>, window_params = [{transform_indices = @transform_0, window_bounds = array<i64: 16, 256>}, {pipeline_mode = #tpu.pipeline_mode<synchronous>, transform_indices = @transform_1, window_bounds = array<i64: 1, 256>}, {pipeline_mode = #tpu.pipeline_mode<synchronous>, transform_indices = @transform_2, window_bounds = array<i64: 1, 256>}, {transform_indices = @transform_3, window_bounds = array<i64: 16, 256>}, {transform_indices = @transform_4, window_bounds = array<i64: 16, 256>}]} {
    %c0 = arith.constant 0 : index
    %c0_0 = arith.constant 0 : index
    %0 = vector.load %arg1[%c0, %c0_0] : memref<16x256xf32, #tpu.memory_space<vmem>>, vector<16x256xf32>
    %c0_1 = arith.constant 0 : index
    %c0_2 = arith.constant 0 : index
    %1 = vector.load %arg2[%c0_1, %c0_2] : memref<1x256xf32, #tpu.memory_space<vmem>>, vector<1x256xf32>
    %2 = vector.broadcast %1 : vector<1x256xf32> to vector<16x256xf32>
    %3 = arith.mulf %0, %2 : vector<16x256xf32>
    %c0_3 = arith.constant 0 : index
    %c0_4 = arith.constant 0 : index
    %4 = vector.load %arg3[%c0_3, %c0_4] : memref<1x256xf32, #tpu.memory_space<vmem>>, vector<1x256xf32>
    %5 = vector.broadcast %4 : vector<1x256xf32> to vector<16x256xf32>
    %6 = arith.addf %3, %5 : vector<16x256xf32>
    %c0_5 = arith.constant 0 : index
    %c0_6 = arith.constant 0 : index
    %7 = vector.load %arg4[%c0_5, %c0_6] : memref<16x256xbf16, #tpu.memory_space<vmem>>, vector<16x256xbf16>
    %8 = arith.extf %7 : vector<16x256xbf16> to vector<16x256xf32>
    %9 = arith.addf %6, %8 : vector<16x256xf32>
    %cst = arith.constant 0.000000e+00 : f32
    %10 = vector.broadcast %cst : f32 to vector<16x256xf32>
    %11 = arith.maximumf %9, %10 : vector<16x256xf32>
    %12 = arith.truncf %11 : vector<16x256xf32> to vector<16x256xbf16>
    %c0_7 = arith.constant 0 : index
    %c0_8 = arith.constant 0 : index
    %13 = vector.load %arg5[%c0_7, %c0_8] : memref<16x256xbf16, #tpu.memory_space<vmem>>, vector<16x256xbf16>
    tpu.vector_store %arg5[%c0_7, %c0_8], %12 {strides = array<i32>} : memref<16x256xbf16, #tpu.memory_space<vmem>>, vector<16x256xbf16>,
    return
  }
  func.func @transform_0(%arg0: i32) -> (i32, i32) {
    %c0_i32 = arith.constant 0 : i32
    %c0_i32_0 = arith.constant 0 : i32
    return %arg0, %c0_i32 : i32, i32
  }
  func.func @transform_1(%arg0: i32) -> (i32, i32) {
    %c0_i32 = arith.constant 0 : i32
    %c0_i32_0 = arith.constant 0 : i32
    %c0_i32_1 = arith.constant 0 : i32
    return %c0_i32, %c0_i32_0 : i32, i32
  }
  func.func @transform_2(%arg0: i32) -> (i32, i32) {
    %c0_i32 = arith.constant 0 : i32
    %c0_i32_0 = arith.constant 0 : i32
    %c0_i32_1 = arith.constant 0 : i32
    return %c0_i32, %c0_i32_0 : i32, i32
  }
  func.func @transform_3(%arg0: i32) -> (i32, i32) {
    %c0_i32 = arith.constant 0 : i32
    %c0_i32_0 = arith.constant 0 : i32
    return %arg0, %c0_i32 : i32, i32
  }
  func.func @transform_4(%arg0: i32) -> (i32, i32) {
    %c0_i32 = arith.constant 0 : i32
    %c0_i32_0 = arith.constant 0 : i32
    return %arg0, %c0_i32 : i32, i32
  }
}

module attributes {stable_mosaic.version = 11 : i64} {
  func.func @_bn_act_kernel(%arg0: i32, %arg1: memref<16x512xf32, #tpu.memory_space<vmem>>, %arg2: memref<1x512xf32, #tpu.memory_space<vmem>>, %arg3: memref<1x512xf32, #tpu.memory_space<vmem>>, %arg4: memref<16x512xbf16, #tpu.memory_space<vmem>>) attributes {dimension_semantics = [#tpu.dimension_semantics<parallel>], iteration_bounds = array<i64: 1>, scalar_prefetch = 0 : i64, scratch_operands = 0 : i64, tpu.core_type = #tpu.core_type<tc>, window_params = [{transform_indices = @transform_0, window_bounds = array<i64: 16, 512>}, {pipeline_mode = #tpu.pipeline_mode<synchronous>, transform_indices = @transform_1, window_bounds = array<i64: 1, 512>}, {pipeline_mode = #tpu.pipeline_mode<synchronous>, transform_indices = @transform_2, window_bounds = array<i64: 1, 512>}, {transform_indices = @transform_3, window_bounds = array<i64: 16, 512>}]} {
    %c0 = arith.constant 0 : index
    %c0_0 = arith.constant 0 : index
    %0 = vector.load %arg1[%c0, %c0_0] : memref<16x512xf32, #tpu.memory_space<vmem>>, vector<16x512xf32>
    %c0_1 = arith.constant 0 : index
    %c0_2 = arith.constant 0 : index
    %1 = vector.load %arg2[%c0_1, %c0_2] : memref<1x512xf32, #tpu.memory_space<vmem>>, vector<1x512xf32>
    %2 = vector.broadcast %1 : vector<1x512xf32> to vector<16x512xf32>
    %3 = arith.mulf %0, %2 : vector<16x512xf32>
    %c0_3 = arith.constant 0 : index
    %c0_4 = arith.constant 0 : index
    %4 = vector.load %arg3[%c0_3, %c0_4] : memref<1x512xf32, #tpu.memory_space<vmem>>, vector<1x512xf32>
    %5 = vector.broadcast %4 : vector<1x512xf32> to vector<16x512xf32>
    %6 = arith.addf %3, %5 : vector<16x512xf32>
    %cst = arith.constant 0.000000e+00 : f32
    %7 = vector.broadcast %cst : f32 to vector<16x512xf32>
    %8 = arith.maximumf %6, %7 : vector<16x512xf32>
    %9 = arith.truncf %8 : vector<16x512xf32> to vector<16x512xbf16>
    %c0_5 = arith.constant 0 : index
    %c0_6 = arith.constant 0 : index
    %10 = vector.load %arg4[%c0_5, %c0_6] : memref<16x512xbf16, #tpu.memory_space<vmem>>, vector<16x512xbf16>
    tpu.vector_store %arg4[%c0_5, %c0_6], %9 {strides = array<i32>} : memref<16x512xbf16, #tpu.memory_space<vmem>>, vector<16x512xbf16>,
    return
  }
  func.func @transform_0(%arg0: i32) -> (i32, i32) {
    %c0_i32 = arith.constant 0 : i32
    %c0_i32_0 = arith.constant 0 : i32
    return %arg0, %c0_i32 : i32, i32
  }
  func.func @transform_1(%arg0: i32) -> (i32, i32) {
    %c0_i32 = arith.constant 0 : i32
    %c0_i32_0 = arith.constant 0 : i32
    %c0_i32_1 = arith.constant 0 : i32
    return %c0_i32, %c0_i32_0 : i32, i32
  }
  func.func @transform_2(%arg0: i32) -> (i32, i32) {
    %c0_i32 = arith.constant 0 : i32
    %c0_i32_0 = arith.constant 0 : i32
    %c0_i32_1 = arith.constant 0 : i32
    return %c0_i32, %c0_i32_0 : i32, i32
  }
  func.func @transform_3(%arg0: i32) -> (i32, i32) {
    %c0_i32 = arith.constant 0 : i32
    %c0_i32_0 = arith.constant 0 : i32
    return %arg0, %c0_i32 : i32, i32
  }
}

module attributes {stable_mosaic.version = 11 : i64} {
  func.func @_matmul_bn_kernel(%arg0: i32, %arg1: i32, %arg2: memref<16x256xbf16, #tpu.memory_space<vmem>>, %arg3: memref<256x128xbf16, #tpu.memory_space<vmem>>, %arg4: memref<1x128xf32, #tpu.memory_space<vmem>>, %arg5: memref<1x128xf32, #tpu.memory_space<vmem>>, %arg6: memref<16x128xbf16, #tpu.memory_space<vmem>>) attributes {dimension_semantics = [#tpu.dimension_semantics<parallel>, #tpu.dimension_semantics<parallel>], iteration_bounds = array<i64: 1, 4>, scalar_prefetch = 0 : i64, scratch_operands = 0 : i64, tpu.core_type = #tpu.core_type<tc>, window_params = [{transform_indices = @transform_0, window_bounds = array<i64: 16, 256>}, {transform_indices = @transform_1, window_bounds = array<i64: 256, 128>}, {transform_indices = @transform_2, window_bounds = array<i64: 1, 128>}, {transform_indices = @transform_3, window_bounds = array<i64: 1, 128>}, {transform_indices = @transform_4, window_bounds = array<i64: 16, 128>}]} {
    %c0 = arith.constant 0 : index
    %c0_0 = arith.constant 0 : index
    %0 = vector.load %arg2[%c0, %c0_0] : memref<16x256xbf16, #tpu.memory_space<vmem>>, vector<16x256xbf16>
    %c0_1 = arith.constant 0 : index
    %c0_2 = arith.constant 0 : index
    %1 = vector.load %arg3[%c0_1, %c0_2] : memref<256x128xbf16, #tpu.memory_space<vmem>>, vector<256x128xbf16>
    %cst = arith.constant dense<0.000000e+00> : vector<16x128xf32>
    %2 = tpu.matmul %0, %1, %cst {dimension_numbers = #tpu.dot_dimension_numbers<[1], [0], [0], [1], [0, 0, 1, 1], [], []>} : vector<16x256xbf16>, vector<256x128xbf16>, vector<16x128xf32> -> vector<16x128xf32>
    %c0_3 = arith.constant 0 : index
    %c0_4 = arith.constant 0 : index
    %3 = vector.load %arg4[%c0_3, %c0_4] : memref<1x128xf32, #tpu.memory_space<vmem>>, vector<1x128xf32>
    %4 = vector.broadcast %3 : vector<1x128xf32> to vector<16x128xf32>
    %5 = arith.mulf %2, %4 : vector<16x128xf32>
    %c0_5 = arith.constant 0 : index
    %c0_6 = arith.constant 0 : index
    %6 = vector.load %arg5[%c0_5, %c0_6] : memref<1x128xf32, #tpu.memory_space<vmem>>, vector<1x128xf32>
    %7 = vector.broadcast %6 : vector<1x128xf32> to vector<16x128xf32>
    %8 = arith.addf %5, %7 : vector<16x128xf32>
    %9 = arith.truncf %8 : vector<16x128xf32> to vector<16x128xbf16>
    %c0_7 = arith.constant 0 : index
    %c0_8 = arith.constant 0 : index
    %10 = vector.load %arg6[%c0_7, %c0_8] : memref<16x128xbf16, #tpu.memory_space<vmem>>, vector<16x128xbf16>
    tpu.vector_store %arg6[%c0_7, %c0_8], %9 {strides = array<i32>} : memref<16x128xbf16, #tpu.memory_space<vmem>>, vector<16x128xbf16>,
    return
  }
  func.func @transform_0(%arg0: i32, %arg1: i32) -> (i32, i32) {
    %c0_i32 = arith.constant 0 : i32
    %c0_i32_0 = arith.constant 0 : i32
    return %arg0, %c0_i32 : i32, i32
  }
  func.func @transform_1(%arg0: i32, %arg1: i32) -> (i32, i32) {
    %c0_i32 = arith.constant 0 : i32
    %c0_i32_0 = arith.constant 0 : i32
    return %c0_i32, %arg1 : i32, i32
  }
  func.func @transform_2(%arg0: i32, %arg1: i32) -> (i32, i32) {
    %c0_i32 = arith.constant 0 : i32
    %c0_i32_0 = arith.constant 0 : i32
    return %c0_i32, %arg1 : i32, i32
  }
  func.func @transform_3(%arg0: i32, %arg1: i32) -> (i32, i32) {
    %c0_i32 = arith.constant 0 : i32
    %c0_i32_0 = arith.constant 0 : i32
    return %c0_i32, %arg1 : i32, i32
  }
  func.func @transform_4(%arg0: i32, %arg1: i32) -> (i32, i32) {
    %c0_i32 = arith.constant 0 : i32
    return %arg0, %arg1 : i32, i32
  }
}

module attributes {stable_mosaic.version = 11 : i64} {
  func.func @_bn_act_kernel(%arg0: i32, %arg1: memref<16x512xf32, #tpu.memory_space<vmem>>, %arg2: memref<1x512xf32, #tpu.memory_space<vmem>>, %arg3: memref<1x512xf32, #tpu.memory_space<vmem>>, %arg4: memref<16x512xbf16, #tpu.memory_space<vmem>>, %arg5: memref<16x512xbf16, #tpu.memory_space<vmem>>) attributes {dimension_semantics = [#tpu.dimension_semantics<parallel>], iteration_bounds = array<i64: 1>, scalar_prefetch = 0 : i64, scratch_operands = 0 : i64, tpu.core_type = #tpu.core_type<tc>, window_params = [{transform_indices = @transform_0, window_bounds = array<i64: 16, 512>}, {pipeline_mode = #tpu.pipeline_mode<synchronous>, transform_indices = @transform_1, window_bounds = array<i64: 1, 512>}, {pipeline_mode = #tpu.pipeline_mode<synchronous>, transform_indices = @transform_2, window_bounds = array<i64: 1, 512>}, {transform_indices = @transform_3, window_bounds = array<i64: 16, 512>}, {transform_indices = @transform_4, window_bounds = array<i64: 16, 512>}]} {
    %c0 = arith.constant 0 : index
    %c0_0 = arith.constant 0 : index
    %0 = vector.load %arg1[%c0, %c0_0] : memref<16x512xf32, #tpu.memory_space<vmem>>, vector<16x512xf32>
    %c0_1 = arith.constant 0 : index
    %c0_2 = arith.constant 0 : index
    %1 = vector.load %arg2[%c0_1, %c0_2] : memref<1x512xf32, #tpu.memory_space<vmem>>, vector<1x512xf32>
    %2 = vector.broadcast %1 : vector<1x512xf32> to vector<16x512xf32>
    %3 = arith.mulf %0, %2 : vector<16x512xf32>
    %c0_3 = arith.constant 0 : index
    %c0_4 = arith.constant 0 : index
    %4 = vector.load %arg3[%c0_3, %c0_4] : memref<1x512xf32, #tpu.memory_space<vmem>>, vector<1x512xf32>
    %5 = vector.broadcast %4 : vector<1x512xf32> to vector<16x512xf32>
    %6 = arith.addf %3, %5 : vector<16x512xf32>
    %c0_5 = arith.constant 0 : index
    %c0_6 = arith.constant 0 : index
    %7 = vector.load %arg4[%c0_5, %c0_6] : memref<16x512xbf16, #tpu.memory_space<vmem>>, vector<16x512xbf16>
    %8 = arith.extf %7 : vector<16x512xbf16> to vector<16x512xf32>
    %9 = arith.addf %6, %8 : vector<16x512xf32>
    %cst = arith.constant 0.000000e+00 : f32
    %10 = vector.broadcast %cst : f32 to vector<16x512xf32>
    %11 = arith.maximumf %9, %10 : vector<16x512xf32>
    %12 = arith.truncf %11 : vector<16x512xf32> to vector<16x512xbf16>
    %c0_7 = arith.constant 0 : index
    %c0_8 = arith.constant 0 : index
    %13 = vector.load %arg5[%c0_7, %c0_8] : memref<16x512xbf16, #tpu.memory_space<vmem>>, vector<16x512xbf16>
    tpu.vector_store %arg5[%c0_7, %c0_8], %12 {strides = array<i32>} : memref<16x512xbf16, #tpu.memory_space<vmem>>, vector<16x512xbf16>,
    return
  }
  func.func @transform_0(%arg0: i32) -> (i32, i32) {
    %c0_i32 = arith.constant 0 : i32
    %c0_i32_0 = arith.constant 0 : i32
    return %arg0, %c0_i32 : i32, i32
  }
  func.func @transform_1(%arg0: i32) -> (i32, i32) {
    %c0_i32 = arith.constant 0 : i32
    %c0_i32_0 = arith.constant 0 : i32
    %c0_i32_1 = arith.constant 0 : i32
    return %c0_i32, %c0_i32_0 : i32, i32
  }
  func.func @transform_2(%arg0: i32) -> (i32, i32) {
    %c0_i32 = arith.constant 0 : i32
    %c0_i32_0 = arith.constant 0 : i32
    %c0_i32_1 = arith.constant 0 : i32
    return %c0_i32, %c0_i32_0 : i32, i32
  }
  func.func @transform_3(%arg0: i32) -> (i32, i32) {
    %c0_i32 = arith.constant 0 : i32
    %c0_i32_0 = arith.constant 0 : i32
    return %arg0, %c0_i32 : i32, i32
  }
  func.func @transform_4(%arg0: i32) -> (i32, i32) {
    %c0_i32 = arith.constant 0 : i32
    %c0_i32_0 = arith.constant 0 : i32
    return %arg0, %c0_i32 : i32, i32
  }
}

</mosaic_0001>

<bundles_post_ra>
// kernel: tile.33
= control target key start
LH: loop header
LB: loop body
LE: loop exit
PB: predicated region body
PF: predicated region fallthrough
CT: control target
= control target key end

     0   :  { %s22_s0 = inlined_call_operand.vmem [shape: f32[64], index: 0, kind: input, shape index: {}]   ;;  %s23_s1 = inlined_call_operand.vmem [shape: f32[2,64], index: 1, kind: output, shape index: {}]  }
   0x1   :  { %v4_v0 = vld [vmem:[%s22_s0] ss:$0 sm:$0xff] }
   0x2   :  { %5 = vst [vmem:[%s23_s1] sm:$0x3] %v4_v0 }

// kernel: tile.38
= control target key start
LH: loop header
LB: loop body
LE: loop exit
PB: predicated region body
PF: predicated region fallthrough
CT: control target
= control target key end

     0   :  { %vm7_vm0 = vcmask 523264   ;;  %vm13_vm1 = vcmask 1048064   ;;  %s39_s0 = inlined_call_operand.vmem [shape: f32[2,64], index: 0, kind: input, shape index: {}]   ;;  %s40_s1 = inlined_call_operand.vmem [shape: f32[1,128], index: 1, kind: output, shape index: {}]  }
   0x1   :  { %v4_v0 = vld [vmem:[%s39_s0] sm:$0x3]  ;;  %s22_s0 = smov 64  }
   0x2   :  { %5 = vst [vmem:[#allocation1] sm:$0x3] %v4_v0 }
   0x9   :  { %v10_v1 = vld [vmem:[#allocation1 + $0x1] sm:$0x1]   ;;  %v6_v2 = vld [vmem:[#allocation1] sm:$0x1]  }
   0xa   :  { %11 = vrot.lane.b32.xlu0 %v10_v1, %s22_s0  ;;  %8 = vst.msk [vmem:[#allocation0] sm:$0x1] %vm7_vm0, %v6_v2  }
  0x7c   :  { %v12_v3 = vpop.permute.xlu0 %11  }
  0x7d   :  { %14 = vst.msk [vmem:[#allocation0] sm:$0x1] %vm13_vm1, %v12_v3  }
  0x84   :  { %v17_v4 = vld [vmem:[#allocation0] sm:$0x1] }
  0x85   :  { %20 = vst [vmem:[%s40_s1] sm:$0x1] %v17_v4 }

// kernel: resnet3d_forward.12
= control target key start
LH: loop header
LB: loop body
LE: loop exit
PB: predicated region body
PF: predicated region fallthrough
CT: control target
= control target key end

     0   :  { %s1049_s0 = inlined_call_operand.vmem [shape: f32[512,128], index: 0, kind: input, shape index: {}]   ;;  %s1050_s1 = inlined_call_operand.vmem [shape: f32[1,128], index: 1, kind: input, shape index: {}]   ;;  %s1051_s2 = inlined_call_operand.vmem [shape: f32[1,128], index: 2, kind: input, shape index: {}]   ;;  %s1052_s3 = inlined_call_operand.vmem [shape: bf16[512,128], index: 3, kind: output, shape index: {}]  }
   0x1   :  { %v14_v0 = vld [vmem:[%s1049_s0] sm:$0xff]  ;;  %v15_v1 = vld [vmem:[%s1049_s0 + $0x8] sm:$0xff]  ;;  %v16_v4 = vld [vmem:[%s1049_s0 + $0x10] sm:$0xff] }
   0x2   :  { %v632_v2 = vld [vmem:[%s1050_s1] ss:$0 sm:$0xff]  ;;  %v17_v5 = vld [vmem:[%s1049_s0 + $0x18] sm:$0xff]  ;;  %v19_v11 = vld [vmem:[%s1049_s0 + $0x28] sm:$0xff] }
   0x3   :  { %v637_v3 = vld [vmem:[%s1051_s2] ss:$0 sm:$0xff]  ;;  %v82_v7 = vmul.f32 %v632_v2, %v14_v0  ;;  %v83_v8 = vmul.f32 %v632_v2, %v15_v1  ;;  %v84_v9 = vmul.f32 %v632_v2, %v16_v4  ;;  %v85_v10 = vmul.f32 %v632_v2, %v17_v5  ;;  %v20_v12 = vld [vmem:[%s1049_s0 + $0x30] sm:$0xff]  ;;  %v21_v13 = vld [vmem:[%s1049_s0 + $0x38] sm:$0xff] }
   0x4   :  { %v18_v6 = vld [vmem:[%s1049_s0 + $0x20] sm:$0xff]  ;;  %v87_v15 = vmul.f32 %v632_v2, %v19_v11  ;;  %v88_v16 = vmul.f32 %v632_v2, %v20_v12  ;;  %v89_v17 = vmul.f32 %v632_v2, %v21_v13  ;;  %v23_v27 = vld [vmem:[%s1049_s0 + $0x48] sm:$0xff]  ;;  %v24_v32 = vld [vmem:[%s1049_s0 + $0x50] sm:$0xff] }
   0x5   :  { %v86_v14 = vmul.f32 %v632_v2, %v18_v6  ;;  %v150_v18 = vadd.f32 %v637_v3, %v82_v7  ;;  %v151_v19 = vadd.f32 %v637_v3, %v83_v8  ;;  %v152_v20 = vadd.f32 %v637_v3, %v84_v9  ;;  %v22_v26 = vld [vmem:[%s1049_s0 + $0x40] sm:$0xff]  ;;  %v25_v33 = vld [vmem:[%s1049_s0 + $0x58] sm:$0xff]  ;;  %v27_v39 = vld [vmem:[%s1049_s0 + $0x68] sm:$0xff] }
   0x6   :  { %v153_v21 = vadd.f32 %v637_v3, %v85_v10  ;;  %v155_v23 = vadd.f32 %v637_v3, %v87_v15  ;;  %v156_v24 = vadd.f32 %v637_v3, %v88_v16  ;;  %v157_v25 = vadd.f32 %v637_v3, %v89_v17  ;;  %v26_v38 = vld [vmem:[%s1049_s0 + $0x60] sm:$0xff]  ;;  %v28_v44 = vld [vmem:[%s1049_s0 + $0x70] sm:$0xff]  ;;  %v29_v45 = vld [vmem:[%s1049_s0 + $0x78] sm:$0xff] }
   0x7   :  { %v154_v22 = vadd.f32 %v637_v3, %v86_v14  ;;  %v214_v28 = vmax.f32 %v150_v18, 0.0  ;;  %v215_v29 = vmax.f32 %v151_v19, 0.0  ;;  %v216_v30 = vmax.f32 %v152_v20, 0.0  ;;  %v30_v58 = vld [vmem:[%s1049_s0 + $0x80] sm:$0xff]  ;;  %v31_v63 = vld [vmem:[%s1049_s0 + $0x88] sm:$0xff]  ;;  %v32_v6 = vld [vmem:[%s1049_s0 + $0x90] sm:$0xff] }
   0x8   :  { %v217_v31 = vmax.f32 %v153_v21, 0.0  ;;  %v219_v35 = vmax.f32 %v155_v23, 0.0  ;;  %v220_v36 = vmax.f32 %v156_v24, 0.0  ;;  %v221_v37 = vmax.f32 %v157_v25, 0.0  ;;  %v33_v7 = vld [vmem:[%s1049_s0 + $0x98] sm:$0xff]  ;;  %v34_v12 = vld [vmem:[%s1049_s0 + $0xa0] sm:$0xff] }
   0x9   :  { %v218_v34 = vmax.f32 %v154_v22, 0.0  ;;  %v413_v40 = vpack.c.bf16 %v215_v29, %v214_v28  ;;  %v90_v42 = vmul.f32 %v632_v2, %v22_v26  ;;  %v91_v43 = vmul.f32 %v632_v2, %v23_v27  ;;  %v35_v13 = vld [vmem:[%s1049_s0 + $0xa8] sm:$0xff]  ;;  %v36_v18 = vld [vmem:[%s1049_s0 + $0xb0] sm:$0xff]  ;;  %v37_v23 = vld [vmem:[%s1049_s0 + $0xb8] sm:$0xff] }
   0xa   :  { %v418_v41 = vpack.c.bf16 %v217_v31, %v216_v30  ;;  %v428_v47 = vpack.c.bf16 %v221_v37, %v220_v36  ;;  %v92_v48 = vmul.f32 %v632_v2, %v24_v32  ;;  %v93_v49 = vmul.f32 %v632_v2, %v25_v33  ;;  %v38_v28 = vld [vmem:[%s1049_s0 + $0xc0] sm:$0xff]  ;;  %v39_v37 = vld [vmem:[%s1049_s0 + $0xc8] sm:$0xff] }
   0xb   :  { %v423_v46 = vpack.c.bf16 %v219_v35, %v218_v34  ;;  %414 = vst [vmem:[%s1052_s3] sm:$0xff] %v413_v40   ;;  %v158_v50 = vadd.f32 %v637_v3, %v90_v42  ;;  %v159_v51 = vadd.f32 %v637_v3, %v91_v43  ;;  %v94_v52 = vmul.f32 %v632_v2, %v26_v38  ;;  %v40_v42 = vld [vmem:[%s1049_s0 + $0xd0] sm:$0xff]  ;;  %v41_v43 = vld [vmem:[%s1049_s0 + $0xd8] sm:$0xff] }
   0xc   :  { %v95_v53 = vmul.f32 %v632_v2, %v27_v39  ;;  %570 = vst [vmem:[%s1052_s3 + $0x8] sm:$0xff] %v418_v41   ;;  %v160_v54 = vadd.f32 %v637_v3, %v92_v48  ;;  %v161_v55 = vadd.f32 %v637_v3, %v93_v49  ;;  %v96_v56 = vmul.f32 %v632_v2, %v28_v44  ;;  %v42_v48 = vld [vmem:[%s1049_s0 + $0xe0] sm:$0xff]  ;;  %v43_v49 = vld [vmem:[%s1049_s0 + $0xe8] sm:$0xff] }
   0xd   :  { %v97_v57 = vmul.f32 %v632_v2, %v29_v45  ;;  %571 = vst [vmem:[%s1052_s3 + $0x10] sm:$0xff] %v423_v46   ;;  %v222_v59 = vmax.f32 %v158_v50, 0.0  ;;  %v223_v60 = vmax.f32 %v159_v51, 0.0  ;;  %v162_v61 = vadd.f32 %v637_v3, %v94_v52 }
   0xe   :  { %v163_v62 = vadd.f32 %v637_v3, %v95_v53  ;;  %572 = vst [vmem:[%s1052_s3 + $0x18] sm:$0xff] %v428_v47   ;;  %v224_v0 = vmax.f32 %v160_v54, 0.0  ;;  %v225_v1 = vmax.f32 %v161_v55, 0.0  ;;  %v164_v4 = vadd.f32 %v637_v3, %v96_v56  ;;  %v44_v54 = vld [vmem:[%s1049_s0 + $0xf0] sm:$0xff] }
   0xf   :  { %v165_v5 = vadd.f32 %v637_v3, %v97_v57  ;;  %v433_v8 = vpack.c.bf16 %v223_v60, %v222_v59  ;;  %v226_v9 = vmax.f32 %v162_v61, 0.0  ;;  %v98_v11 = vmul.f32 %v632_v2, %v30_v58  ;;  %v45_v59 = vld [vmem:[%s1049_s0 + $0xf8] sm:$0xff] }
  0x10   :  { %v227_v10 = vmax.f32 %v163_v62, 0.0  ;;  %v438_v14 = vpack.c.bf16 %v225_v1, %v224_v0  ;;  %v228_v15 = vmax.f32 %v164_v4, 0.0  ;;  %v99_v17 = vmul.f32 %v632_v2, %v31_v63  ;;  %v46_v0 = vld [vmem:[%s1049_s0 + $0x100] sm:$0xff] }
  0x11   :  { %v229_v16 = vmax.f32 %v165_v5, 0.0  ;;  %573 = vst [vmem:[%s1052_s3 + $0x20] sm:$0xff] %v433_v8   ;;  %v166_v20 = vadd.f32 %v637_v3, %v98_v11  ;;  %v100_v21 = vmul.f32 %v632_v2, %v32_v6  ;;  %v101_v22 = vmul.f32 %v632_v2, %v33_v7  ;;  %v47_v11 = vld [vmem:[%s1049_s0 + $0x108] sm:$0xff] }
  0x12   :  { %v443_v19 = vpack.c.bf16 %v227_v10, %v226_v9  ;;  %574 = vst [vmem:[%s1052_s3 + $0x28] sm:$0xff] %v438_v14   ;;  %v167_v25 = vadd.f32 %v637_v3, %v99_v17  ;;  %v102_v26 = vmul.f32 %v632_v2, %v34_v12  ;;  %v103_v27 = vmul.f32 %v632_v2, %v35_v13  ;;  %v49_v17 = vld [vmem:[%s1049_s0 + $0x118] sm:$0xff] }
  0x13   :  { %v448_v24 = vpack.c.bf16 %v229_v16, %v228_v15  ;;  %v230_v29 = vmax.f32 %v166_v20, 0.0  ;;  %v168_v30 = vadd.f32 %v637_v3, %v100_v21  ;;  %v169_v31 = vadd.f32 %v637_v3, %v101_v22  ;;  %v48_v16 = vld [vmem:[%s1049_s0 + $0x110] sm:$0xff]  ;;  %v50_v22 = vld [vmem:[%s1049_s0 + $0x120] sm:$0xff] }
  0x14   :  { %575 = vst [vmem:[%s1052_s3 + $0x30] sm:$0xff] %v443_v19   ;;  %v104_v32 = vmul.f32 %v632_v2, %v36_v18  ;;  %v231_v33 = vmax.f32 %v167_v25, 0.0  ;;  %v170_v34 = vadd.f32 %v637_v3, %v102_v26  ;;  %v171_v35 = vadd.f32 %v637_v3, %v103_v27 }
  0x15   :  { %576 = vst [vmem:[%s1052_s3 + $0x38] sm:$0xff] %v448_v24   ;;  %v105_v36 = vmul.f32 %v632_v2, %v37_v23  ;;  %v232_v38 = vmax.f32 %v168_v30, 0.0  ;;  %v233_v39 = vmax.f32 %v169_v31, 0.0  ;;  %v106_v41 = vmul.f32 %v632_v2, %v38_v28  ;;  %v51_v23 = vld [vmem:[%s1049_s0 + $0x128] sm:$0xff]  ;;  %v52_v28 = vld [vmem:[%s1049_s0 + $0x130] sm:$0xff] }
  0x16   :  { %v172_v40 = vadd.f32 %v637_v3, %v104_v32  ;;  %v453_v44 = vpack.c.bf16 %v231_v33, %v230_v29  ;;  %v234_v45 = vmax.f32 %v170_v34, 0.0  ;;  %v235_v46 = vmax.f32 %v171_v35, 0.0  ;;  %v53_v33 = vld [vmem:[%s1049_s0 + $0x138] sm:$0xff] }
  0x17   :  { %v173_v47 = vadd.f32 %v637_v3, %v105_v36  ;;  %v458_v50 = vpack.c.bf16 %v233_v39, %v232_v38  ;;  %v107_v52 = vmul.f32 %v632_v2, %v39_v37  ;;  %v174_v53 = vadd.f32 %v637_v3, %v106_v41  ;;  %v54_v38 = vld [vmem:[%s1049_s0 + $0x140] sm:$0xff] }
  0x18   :  { %v236_v51 = vmax.f32 %v172_v40, 0.0  ;;  %577 = vst [vmem:[%s1052_s3 + $0x40] sm:$0xff] %v453_v44   ;;  %v463_v55 = vpack.c.bf16 %v235_v46, %v234_v45  ;;  %v108_v57 = vmul.f32 %v632_v2, %v40_v42  ;;  %v109_v58 = vmul.f32 %v632_v2, %v41_v43 }
  0x19   :  { %v237_v56 = vmax.f32 %v173_v47, 0.0  ;;  %578 = vst [vmem:[%s1052_s3 + $0x48] sm:$0xff] %v458_v50   ;;  %v175_v60 = vadd.f32 %v637_v3, %v107_v52  ;;  %v238_v61 = vmax.f32 %v174_v53, 0.0  ;;  %v110_v62 = vmul.f32 %v632_v2, %v42_v48  ;;  %v55_v47 = vld [vmem:[%s1049_s0 + $0x148] sm:$0xff]  ;;  %v56_v52 = vld [vmem:[%s1049_s0 + $0x150] sm:$0xff]  ;;  %v57_v53 = vld [vmem:[%s1049_s0 + $0x158] sm:$0xff] }
  0x1a   :  { %v111_v63 = vmul.f32 %v632_v2, %v43_v49  ;;  %579 = vst [vmem:[%s1052_s3 + $0x50] sm:$0xff] %v463_v55   ;;  %v176_v4 = vadd.f32 %v637_v3, %v108_v57  ;;  %v177_v5 = vadd.f32 %v637_v3, %v109_v58  ;;  %v112_v6 = vmul.f32 %v632_v2, %v44_v54  ;;  %v58_v58 = vld [vmem:[%s1049_s0 + $0x160] sm:$0xff] }
  0x1b   :  { %v468_v1 = vpack.c.bf16 %v237_v56, %v236_v51  ;;  %v239_v7 = vmax.f32 %v175_v60, 0.0  ;;  %v178_v8 = vadd.f32 %v637_v3, %v110_v62  ;;  %v113_v10 = vmul.f32 %v632_v2, %v45_v59  ;;  %v59_v59 = vld [vmem:[%s1049_s0 + $0x168] sm:$0xff] }
  0x1c   :  { %v179_v9 = vadd.f32 %v637_v3, %v111_v63  ;;  %v240_v12 = vmax.f32 %v176_v4, 0.0  ;;  %v241_v13 = vmax.f32 %v177_v5, 0.0  ;;  %v180_v14 = vadd.f32 %v637_v3, %v112_v6 }
  0x1d   :  { %580 = vst [vmem:[%s1052_s3 + $0x58] sm:$0xff] %v468_v1   ;;  %v114_v15 = vmul.f32 %v632_v2, %v46_v0  ;;  %v473_v18 = vpack.c.bf16 %v239_v7, %v238_v61  ;;  %v242_v19 = vmax.f32 %v178_v8, 0.0  ;;  %v181_v21 = vadd.f32 %v637_v3, %v113_v10  ;;  %v60_v0 = vld [vmem:[%s1049_s0 + $0x170] sm:$0xff]  ;;  %v61_v7 = vld [vmem:[%s1049_s0 + $0x178] sm:$0xff] }
  0x1e   :  { %v243_v20 = vmax.f32 %v179_v9, 0.0  ;;  %v478_v24 = vpack.c.bf16 %v241_v13, %v240_v12  ;;  %v244_v25 = vmax.f32 %v180_v14, 0.0  ;;  %v115_v26 = vmul.f32 %v632_v2, %v47_v11  ;;  %v62_v12 = vld [vmem:[%s1049_s0 + $0x180] sm:$0xff] }
  0x1f   :  { %v182_v27 = vadd.f32 %v637_v3, %v114_v15  ;;  %581 = vst [vmem:[%s1052_s3 + $0x60] sm:$0xff] %v473_v18   ;;  %v245_v30 = vmax.f32 %v181_v21, 0.0  ;;  %v116_v31 = vmul.f32 %v632_v2, %v48_v16  ;;  %v117_v32 = vmul.f32 %v632_v2, %v49_v17  ;;  %v63_v21 = vld [vmem:[%s1049_s0 + $0x188] sm:$0xff] }
  0x20   :  { %v483_v29 = vpack.c.bf16 %v243_v20, %v242_v19  ;;  %582 = vst [vmem:[%s1052_s3 + $0x68] sm:$0xff] %v478_v24   ;;  %v183_v34 = vadd.f32 %v637_v3, %v115_v26  ;;  %v118_v36 = vmul.f32 %v632_v2, %v50_v22  ;;  %v119_v37 = vmul.f32 %v632_v2, %v51_v23  ;;  %v64_v26 = vld [vmem:[%s1049_s0 + $0x190] sm:$0xff] }
  0x21   :  { %v246_v35 = vmax.f32 %v182_v27, 0.0  ;;  %v488_v39 = vpack.c.bf16 %v245_v30, %v244_v25  ;;  %v184_v40 = vadd.f32 %v637_v3, %v116_v31  ;;  %v185_v41 = vadd.f32 %v637_v3, %v117_v32  ;;  %v65_v27 = vld [vmem:[%s1049_s0 + $0x198] sm:$0xff]  ;;  %v66_v32 = vld [vmem:[%s1049_s0 + $0x1a0] sm:$0xff] }
  0x22   :  { %583 = vst [vmem:[%s1052_s3 + $0x70] sm:$0xff] %v483_v29   ;;  %v120_v42 = vmul.f32 %v632_v2, %v52_v28  ;;  %v247_v43 = vmax.f32 %v183_v34, 0.0  ;;  %v186_v44 = vadd.f32 %v637_v3, %v118_v36  ;;  %v187_v45 = vadd.f32 %v637_v3, %v119_v37 }
  0x23   :  { %v121_v46 = vmul.f32 %v632_v2, %v53_v33  ;;  %584 = vst [vmem:[%s1052_s3 + $0x78] sm:$0xff] %v488_v39   ;;  %v248_v48 = vmax.f32 %v184_v40, 0.0  ;;  %v249_v49 = vmax.f32 %v185_v41, 0.0  ;;  %v122_v51 = vmul.f32 %v632_v2, %v54_v38  ;;  %v67_v33 = vld [vmem:[%s1049_s0 + $0x1a8] sm:$0xff]  ;;  %v68_v38 = vld [vmem:[%s1049_s0 + $0x1b0] sm:$0xff] }
  0x24   :  { %v188_v50 = vadd.f32 %v637_v3, %v120_v42  ;;  %v493_v54 = vpack.c.bf16 %v247_v43, %v246_v35  ;;  %v250_v55 = vmax.f32 %v186_v44, 0.0  ;;  %v251_v56 = vmax.f32 %v187_v45, 0.0  ;;  %v69_v43 = vld [vmem:[%s1049_s0 + $0x1b8] sm:$0xff] }
  0x25   :  { %v189_v57 = vadd.f32 %v637_v3, %v121_v46  ;;  %v498_v60 = vpack.c.bf16 %v249_v49, %v248_v48  ;;  %v123_v62 = vmul.f32 %v632_v2, %v55_v47  ;;  %v190_v63 = vadd.f32 %v637_v3, %v122_v51  ;;  %v70_v48 = vld [vmem:[%s1049_s0 + $0x1c0] sm:$0xff] }
  0x26   :  { %v252_v61 = vmax.f32 %v188_v50, 0.0  ;;  %585 = vst [vmem:[%s1052_s3 + $0x80] sm:$0xff] %v493_v54   ;;  %v503_v1 = vpack.c.bf16 %v251_v56, %v250_v55  ;;  %v124_v5 = vmul.f32 %v632_v2, %v56_v52  ;;  %v125_v6 = vmul.f32 %v632_v2, %v57_v53 }
  0x27   :  { %v253_v4 = vmax.f32 %v189_v57, 0.0  ;;  %586 = vst [vmem:[%s1052_s3 + $0x88] sm:$0xff] %v498_v60   ;;  %v191_v8 = vadd.f32 %v637_v3, %v123_v62  ;;  %v254_v9 = vmax.f32 %v190_v63, 0.0  ;;  %v126_v10 = vmul.f32 %v632_v2, %v58_v58  ;;  %v71_v57 = vld [vmem:[%s1049_s0 + $0x1c8] sm:$0xff]  ;;  %v72_v62 = vld [vmem:[%s1049_s0 + $0x1d0] sm:$0xff]  ;;  %v73_v63 = vld [vmem:[%s1049_s0 + $0x1d8] sm:$0xff] }
  0x28   :  { %v127_v11 = vmul.f32 %v632_v2, %v59_v59  ;;  %587 = vst [vmem:[%s1052_s3 + $0x90] sm:$0xff] %v503_v1   ;;  %v192_v14 = vadd.f32 %v637_v3, %v124_v5  ;;  %v193_v15 = vadd.f32 %v637_v3, %v125_v6  ;;  %v128_v16 = vmul.f32 %v632_v2, %v60_v0  ;;  %v74_v6 = vld [vmem:[%s1049_s0 + $0x1e0] sm:$0xff] }
  0x29   :  { %v508_v13 = vpack.c.bf16 %v253_v4, %v252_v61  ;;  %v255_v17 = vmax.f32 %v191_v8, 0.0  ;;  %v194_v18 = vadd.f32 %v637_v3, %v126_v10  ;;  %v129_v20 = vmul.f32 %v632_v2, %v61_v7  ;;  %v75_v7 = vld [vmem:[%s1049_s0 + $0x1e8] sm:$0xff] }
  0x2a   :  { %v195_v19 = vadd.f32 %v637_v3, %v127_v11  ;;  %v256_v22 = vmax.f32 %v192_v14, 0.0  ;;  %v257_v23 = vmax.f32 %v193_v15, 0.0  ;;  %v196_v24 = vadd.f32 %v637_v3, %v128_v16 }
  0x2b   :  { %588 = vst [vmem:[%s1052_s3 + $0x98] sm:$0xff] %v508_v13   ;;  %v130_v25 = vmul.f32 %v632_v2, %v62_v12  ;;  %v513_v28 = vpack.c.bf16 %v255_v17, %v254_v9  ;;  %v258_v29 = vmax.f32 %v194_v18, 0.0  ;;  %v197_v31 = vadd.f32 %v637_v3, %v129_v20  ;;  %v76_v12 = vld [vmem:[%s1049_s0 + $0x1f0] sm:$0xff]  ;;  %v77_v17 = vld [vmem:[%s1049_s0 + $0x1f8] sm:$0xff] }
  0x2c   :  { %v259_v30 = vmax.f32 %v195_v19, 0.0  ;;  %v518_v34 = vpack.c.bf16 %v257_v23, %v256_v22  ;;  %v260_v35 = vmax.f32 %v196_v24, 0.0  ;;  %v131_v36 = vmul.f32 %v632_v2, %v63_v21 }
  0x2d   :  { %v198_v37 = vadd.f32 %v637_v3, %v130_v25  ;;  %589 = vst [vmem:[%s1052_s3 + $0xa0] sm:$0xff] %v513_v28   ;;  %v261_v40 = vmax.f32 %v197_v31, 0.0  ;;  %v132_v41 = vmul.f32 %v632_v2, %v64_v26  ;;  %v133_v42 = vmul.f32 %v632_v2, %v65_v27 }
  0x2e   :  { %v523_v39 = vpack.c.bf16 %v259_v30, %v258_v29  ;;  %590 = vst [vmem:[%s1052_s3 + $0xa8] sm:$0xff] %v518_v34   ;;  %v199_v44 = vadd.f32 %v637_v3, %v131_v36  ;;  %v134_v46 = vmul.f32 %v632_v2, %v66_v32  ;;  %v135_v47 = vmul.f32 %v632_v2, %v67_v33 }
  0x2f   :  { %v262_v45 = vmax.f32 %v198_v37, 0.0  ;;  %v528_v49 = vpack.c.bf16 %v261_v40, %v260_v35  ;;  %v200_v50 = vadd.f32 %v637_v3, %v132_v41  ;;  %v201_v51 = vadd.f32 %v637_v3, %v133_v42 }
  0x30   :  { %591 = vst [vmem:[%s1052_s3 + $0xb0] sm:$0xff] %v523_v39   ;;  %v136_v52 = vmul.f32 %v632_v2, %v68_v38  ;;  %v263_v53 = vmax.f32 %v199_v44, 0.0  ;;  %v202_v54 = vadd.f32 %v637_v3, %v134_v46  ;;  %v203_v55 = vadd.f32 %v637_v3, %v135_v47 }
  0x31   :  { %v137_v56 = vmul.f32 %v632_v2, %v69_v43  ;;  %592 = vst [vmem:[%s1052_s3 + $0xb8] sm:$0xff] %v528_v49   ;;  %v264_v58 = vmax.f32 %v200_v50, 0.0  ;;  %v265_v59 = vmax.f32 %v201_v51, 0.0  ;;  %v138_v61 = vmul.f32 %v632_v2, %v70_v48 }
  0x32   :  { %v204_v60 = vadd.f32 %v637_v3, %v136_v52  ;;  %v533_v0 = vpack.c.bf16 %v263_v53, %v262_v45  ;;  %v266_v1 = vmax.f32 %v202_v54, 0.0  ;;  %v267_v4 = vmax.f32 %v203_v55, 0.0 }
  0x33   :  { %v205_v5 = vadd.f32 %v637_v3, %v137_v56  ;;  %v538_v8 = vpack.c.bf16 %v265_v59, %v264_v58  ;;  %v139_v10 = vmul.f32 %v632_v2, %v71_v57  ;;  %v206_v11 = vadd.f32 %v637_v3, %v138_v61 }
  0x34   :  { %v268_v9 = vmax.f32 %v204_v60, 0.0  ;;  %593 = vst [vmem:[%s1052_s3 + $0xc0] sm:$0xff] %v533_v0   ;;  %v543_v13 = vpack.c.bf16 %v267_v4, %v266_v1  ;;  %v140_v15 = vmul.f32 %v632_v2, %v72_v62  ;;  %v141_v16 = vmul.f32 %v632_v2, %v73_v63 }
  0x35   :  { %v269_v14 = vmax.f32 %v205_v5, 0.0  ;;  %594 = vst [vmem:[%s1052_s3 + $0xc8] sm:$0xff] %v538_v8   ;;  %v207_v18 = vadd.f32 %v637_v3, %v139_v10  ;;  %v270_v19 = vmax.f32 %v206_v11, 0.0  ;;  %v142_v20 = vmul.f32 %v632_v2, %v74_v6 }
  0x36   :  { %v143_v21 = vmul.f32 %v632_v2, %v75_v7  ;;  %595 = vst [vmem:[%s1052_s3 + $0xd0] sm:$0xff] %v543_v13   ;;  %v208_v23 = vadd.f32 %v637_v3, %v140_v15  ;;  %v209_v24 = vadd.f32 %v637_v3, %v141_v16  ;;  %v144_v25 = vmul.f32 %v632_v2, %v76_v12 }
  0x37   :  { %v548_v22 = vpack.c.bf16 %v269_v14, %v268_v9  ;;  %v271_v26 = vmax.f32 %v207_v18, 0.0  ;;  %v210_v27 = vadd.f32 %v637_v3, %v142_v20  ;;  %v145_v29 = vmul.f32 %v632_v2, %v77_v17 }
  0x38   :  { %v211_v28 = vadd.f32 %v637_v3, %v143_v21  ;;  %v272_v30 = vmax.f32 %v208_v23, 0.0  ;;  %v273_v31 = vmax.f32 %v209_v24, 0.0  ;;  %v212_v32 = vadd.f32 %v637_v3, %v144_v25 }
  0x39   :  { %596 = vst [vmem:[%s1052_s3 + $0xd8] sm:$0xff] %v548_v22   ;;  %v553_v33 = vpack.c.bf16 %v271_v26, %v270_v19  ;;  %v274_v34 = vmax.f32 %v210_v27, 0.0  ;;  %v213_v36 = vadd.f32 %v637_v3, %v145_v29 }
  0x3a   :  { %v275_v35 = vmax.f32 %v211_v28, 0.0  ;;  %v558_v37 = vpack.c.bf16 %v273_v31, %v272_v30  ;;  %v276_v38 = vmax.f32 %v212_v32, 0.0 }
  0x3b   :  { %597 = vst [vmem:[%s1052_s3 + $0xe0] sm:$0xff] %v553_v33   ;;  %v277_v39 = vmax.f32 %v213_v36, 0.0 }
  0x3c   :  { %v563_v2 = vpack.c.bf16 %v275_v35, %v274_v34  ;;  %598 = vst [vmem:[%s1052_s3 + $0xe8] sm:$0xff] %v558_v37  }
  0x3d   :  { %v568_v40 = vpack.c.bf16 %v277_v39, %v276_v38 }
  0x3e   :  { %599 = vst [vmem:[%s1052_s3 + $0xf0] sm:$0xff] %v563_v2  }
  0x3f   :  { %600 = vst [vmem:[%s1052_s3 + $0xf8] sm:$0xff] %v568_v40  }

// kernel: resnet3d_forward.13
= control target key start
LH: loop header
LB: loop body
LE: loop exit
PB: predicated region body
PF: predicated region fallthrough
CT: control target
= control target key end

     0   :  { %s161_s0 = inlined_call_operand.vmem [shape: f32[64,128], index: 0, kind: input, shape index: {}]   ;;  %s162_s1 = inlined_call_operand.vmem [shape: f32[1,128], index: 1, kind: input, shape index: {}]   ;;  %s163_s2 = inlined_call_operand.vmem [shape: f32[1,128], index: 2, kind: input, shape index: {}]   ;;  %s164_s3 = inlined_call_operand.vmem [shape: bf16[64,128], index: 3, kind: output, shape index: {}]  }
   0x1   :  { %v14_v0 = vld [vmem:[%s161_s0] sm:$0xff]  ;;  %v15_v1 = vld [vmem:[%s161_s0 + $0x8] sm:$0xff]  ;;  %v16_v4 = vld [vmem:[%s161_s0 + $0x10] sm:$0xff] }
   0x2   :  { %v97_v2 = vld [vmem:[%s162_s1] ss:$0 sm:$0xff]  ;;  %v17_v5 = vld [vmem:[%s161_s0 + $0x18] sm:$0xff]  ;;  %v19_v11 = vld [vmem:[%s161_s0 + $0x28] sm:$0xff] }
   0x3   :  { %v98_v3 = vld [vmem:[%s163_s2] ss:$0 sm:$0xff]  ;;  %v26_v7 = vmul.f32 %v97_v2, %v14_v0  ;;  %v27_v8 = vmul.f32 %v97_v2, %v15_v1  ;;  %v28_v9 = vmul.f32 %v97_v2, %v16_v4  ;;  %v29_v10 = vmul.f32 %v97_v2, %v17_v5  ;;  %v20_v12 = vld [vmem:[%s161_s0 + $0x30] sm:$0xff]  ;;  %v21_v13 = vld [vmem:[%s161_s0 + $0x38] sm:$0xff] }
   0x4   :  { %v18_v6 = vld [vmem:[%s161_s0 + $0x20] sm:$0xff]  ;;  %v31_v15 = vmul.f32 %v97_v2, %v19_v11  ;;  %v32_v16 = vmul.f32 %v97_v2, %v20_v12  ;;  %v33_v17 = vmul.f32 %v97_v2, %v21_v13 }
   0x5   :  { %v30_v14 = vmul.f32 %v97_v2, %v18_v6  ;;  %v38_v18 = vadd.f32 %v98_v3, %v26_v7  ;;  %v39_v19 = vadd.f32 %v98_v3, %v27_v8  ;;  %v40_v20 = vadd.f32 %v98_v3, %v28_v9 }
   0x6   :  { %v41_v21 = vadd.f32 %v98_v3, %v29_v10  ;;  %v43_v23 = vadd.f32 %v98_v3, %v31_v15  ;;  %v44_v24 = vadd.f32 %v98_v3, %v32_v16  ;;  %v45_v25 = vadd.f32 %v98_v3, %v33_v17 }
   0x7   :  { %v42_v22 = vadd.f32 %v98_v3, %v30_v14  ;;  %v46_v26 = vmax.f32 %v38_v18, 0.0  ;;  %v47_v27 = vmax.f32 %v39_v19, 0.0  ;;  %v48_v28 = vmax.f32 %v40_v20, 0.0 }
   0x8   :  { %v49_v29 = vmax.f32 %v41_v21, 0.0  ;;  %v51_v31 = vmax.f32 %v43_v23, 0.0  ;;  %v52_v32 = vmax.f32 %v44_v24, 0.0  ;;  %v53_v33 = vmax.f32 %v45_v25, 0.0 }
   0x9   :  { %v50_v30 = vmax.f32 %v42_v22, 0.0  ;;  %v77_v34 = vpack.c.bf16 %v47_v27, %v46_v26 }
   0xa   :  { %v82_v35 = vpack.c.bf16 %v49_v29, %v48_v28  ;;  %v92_v37 = vpack.c.bf16 %v53_v33, %v52_v32 }
   0xb   :  { %v87_v36 = vpack.c.bf16 %v51_v31, %v50_v30  ;;  %78 = vst [vmem:[%s164_s3] sm:$0xff] %v77_v34  }
   0xc   :  { %94 = vst [vmem:[%s164_s3 + $0x8] sm:$0xff] %v82_v35  }
   0xd   :  { %95 = vst [vmem:[%s164_s3 + $0x10] sm:$0xff] %v87_v36  }
   0xe   :  { %96 = vst [vmem:[%s164_s3 + $0x18] sm:$0xff] %v92_v37  }

// kernel: resnet3d_forward.14
= control target key start
LH: loop header
LB: loop body
LE: loop exit
PB: predicated region body
PF: predicated region fallthrough
CT: control target
= control target key end

     0   :  { %s224_s0 = inlined_call_operand.vmem [shape: f32[64,128], index: 0, kind: input, shape index: {}]   ;;  %s225_s1 = inlined_call_operand.vmem [shape: f32[1,128], index: 1, kind: input, shape index: {}]   ;;  %s226_s2 = inlined_call_operand.vmem [shape: f32[1,128], index: 2, kind: input, shape index: {}]   ;;  %s227_s3 = inlined_call_operand.vmem [shape: bf16[64,128], index: 3, kind: input, shape index: {}]   ;;  %s228_s4 = inlined_call_operand.vmem [shape: bf16[64,128], index: 4, kind: output, shape index: {}]  }
   0x1   :  { %v17_v0 = vld [vmem:[%s224_s0] sm:$0xff]  ;;  %v18_v1 = vld [vmem:[%s224_s0 + $0x8] sm:$0xff]  ;;  %v19_v5 = vld [vmem:[%s224_s0 + $0x10] sm:$0xff] }
   0x2   :  { %v143_v2 = vld [vmem:[%s225_s1] ss:$0 sm:$0xff]  ;;  %v20_v6 = vld [vmem:[%s224_s0 + $0x18] sm:$0xff]  ;;  %v137_v11 = vld [vmem:[%s227_s3 + $0x8] sm:$0xff]  }
   0x3   :  { %v144_v3 = vld [vmem:[%s226_s2] ss:$0 sm:$0xff]  ;;  %v29_v7 = vmul.f32 %v143_v2, %v17_v0  ;;  %v30_v8 = vmul.f32 %v143_v2, %v18_v1  ;;  %v22_v13 = vld [vmem:[%s224_s0 + $0x28] sm:$0xff]  ;;  %v31_v14 = vmul.f32 %v143_v2, %v19_v5  ;;  %v32_v15 = vmul.f32 %v143_v2, %v20_v6  ;;  %v138_v18 = vld [vmem:[%s227_s3 + $0x10] sm:$0xff]  }
   0x4   :  { %v102_v4 = vld [vmem:[%s227_s3] sm:$0xff]   ;;  %v107_v16 = vunpack.c.l.bf16 %v137_v11  ;;  %v108_v17 = vunpack.c.h.bf16 %v137_v11  ;;  %v34_v22 = vmul.f32 %v143_v2, %v22_v13  ;;  %v23_v23 = vld [vmem:[%s224_s0 + $0x30] sm:$0xff]  ;;  %v24_v24 = vld [vmem:[%s224_s0 + $0x38] sm:$0xff]  ;;  %v111_v27 = vunpack.c.l.bf16 %v138_v18 }
   0x5   :  { %v103_v9 = vunpack.c.l.bf16 %v102_v4  ;;  %v104_v10 = vunpack.c.h.bf16 %v102_v4  ;;  %v21_v12 = vld [vmem:[%s224_s0 + $0x20] sm:$0xff]  ;;  %v41_v19 = vadd.f32 %v144_v3, %v29_v7  ;;  %v42_v20 = vadd.f32 %v144_v3, %v30_v8  ;;  %v139_v37 = vld [vmem:[%s227_s3 + $0x18] sm:$0xff]  }
   0x6   :  { %v33_v21 = vmul.f32 %v143_v2, %v21_v12  ;;  %v43_v25 = vadd.f32 %v144_v3, %v31_v14  ;;  %v44_v26 = vadd.f32 %v144_v3, %v32_v15  ;;  %v112_v28 = vunpack.c.h.bf16 %v138_v18 }
   0x7   :  { %v65_v29 = vadd.f32 %v103_v9, %v41_v19  ;;  %v66_v30 = vadd.f32 %v104_v10, %v42_v20  ;;  %v46_v32 = vadd.f32 %v144_v3, %v34_v22  ;;  %v35_v35 = vmul.f32 %v143_v2, %v23_v23 }
   0x8   :  { %v45_v31 = vadd.f32 %v144_v3, %v33_v21  ;;  %v67_v33 = vadd.f32 %v107_v16, %v43_v25  ;;  %v68_v34 = vadd.f32 %v108_v17, %v44_v26  ;;  %v36_v36 = vmul.f32 %v143_v2, %v24_v24 }
   0x9   :  { %v73_v38 = vmax.f32 %v65_v29, 0.0  ;;  %v74_v39 = vmax.f32 %v66_v30, 0.0  ;;  %v70_v41 = vadd.f32 %v112_v28, %v46_v32  ;;  %v47_v44 = vadd.f32 %v144_v3, %v35_v35 }
   0xa   :  { %v69_v40 = vadd.f32 %v111_v27, %v45_v31  ;;  %v75_v42 = vmax.f32 %v67_v33, 0.0  ;;  %v76_v43 = vmax.f32 %v68_v34, 0.0  ;;  %v48_v45 = vadd.f32 %v144_v3, %v36_v36 }
   0xb   :  { %v120_v46 = vpack.c.bf16 %v74_v39, %v73_v38  ;;  %v78_v48 = vmax.f32 %v70_v41, 0.0  ;;  %v115_v49 = vunpack.c.l.bf16 %v139_v37  ;;  %v116_v51 = vunpack.c.h.bf16 %v139_v37 }
   0xc   :  { %v77_v47 = vmax.f32 %v69_v40, 0.0  ;;  %v125_v50 = vpack.c.bf16 %v76_v43, %v75_v42 }
   0xd   :  { %121 = vst [vmem:[%s228_s4] sm:$0xff] %v120_v46   ;;  %v71_v53 = vadd.f32 %v115_v49, %v47_v44  ;;  %v72_v54 = vadd.f32 %v116_v51, %v48_v45 }
   0xe   :  { %v130_v52 = vpack.c.bf16 %v78_v48, %v77_v47  ;;  %140 = vst [vmem:[%s228_s4 + $0x8] sm:$0xff] %v125_v50  }
   0xf   :  { %v79_v55 = vmax.f32 %v71_v53, 0.0  ;;  %v80_v56 = vmax.f32 %v72_v54, 0.0 }
  0x10   :  { %141 = vst [vmem:[%s228_s4 + $0x10] sm:$0xff] %v130_v52  }
  0x11   :  { %v135_v57 = vpack.c.bf16 %v80_v56, %v79_v55 }
  0x13   :  { %142 = vst [vmem:[%s228_s4 + $0x18] sm:$0xff] %v135_v57  }

// kernel: resnet3d_forward.15
= control target key start
LH: loop header
LB: loop body
LE: loop exit
PB: predicated region body
PF: predicated region fallthrough
CT: control target
= control target key end

     0   :  { %s80_s0 = inlined_call_operand.vmem [shape: f32[16,128], index: 0, kind: input, shape index: {}]   ;;  %s81_s1 = inlined_call_operand.vmem [shape: f32[1,128], index: 1, kind: input, shape index: {}]   ;;  %s82_s2 = inlined_call_operand.vmem [shape: f32[1,128], index: 2, kind: input, shape index: {}]   ;;  %s83_s3 = inlined_call_operand.vmem [shape: bf16[16,128], index: 3, kind: output, shape index: {}]  }
   0x1   :  { %v14_v0 = vld [vmem:[%s80_s0] sm:$0xff]  ;;  %v15_v1 = vld [vmem:[%s80_s0 + $0x8] sm:$0xff] }
   0x2   :  { %v43_v2 = vld [vmem:[%s81_s1] ss:$0 sm:$0xff] }
   0x3   :  { %v44_v3 = vld [vmem:[%s82_s2] ss:$0 sm:$0xff]  ;;  %v20_v4 = vmul.f32 %v43_v2, %v14_v0  ;;  %v21_v5 = vmul.f32 %v43_v2, %v15_v1 }
   0x5   :  { %v26_v6 = vadd.f32 %v44_v3, %v20_v4  ;;  %v27_v7 = vadd.f32 %v44_v3, %v21_v5 }
   0x7   :  { %v28_v8 = vmax.f32 %v26_v6, 0.0  ;;  %v29_v9 = vmax.f32 %v27_v7, 0.0 }
   0x9   :  { %v41_v10 = vpack.c.bf16 %v29_v9, %v28_v8 }
   0xb   :  { %42 = vst [vmem:[%s83_s3] sm:$0xff] %v41_v10  }

// kernel: reverse
= control target key start
LH: loop header
LB: loop body
LE: loop exit
PB: predicated region body
PF: predicated region fallthrough
CT: control target
= control target key end

     0   :  { %s5192_s0 = inlined_call_operand.vmem [shape: bf16[3,3,3,128,128], index: 0, kind: input, shape index: {}]   ;;  %s5193_s1 = inlined_call_operand.vmem [shape: bf16[3,3,3,128,128], index: 1, kind: output, shape index: {}]  }
   0x1   :  { %v3024_v0 = vld [vmem:[%s5192_s0 + $0x680] sm:$0xff]   ;;  %v3130_v27 = vld [vmem:[%s5192_s0 + $0x688] sm:$0xff]   ;;  %v3238_v54 = vld [vmem:[%s5192_s0 + $0x690] sm:$0xff]  }
   0x2   :  { %v3025_v1 = vld [vmem:[%s5192_s0 + $0x440] sm:$0xff]   ;;  %7 = vst [vmem:[%s5193_s1] sm:$0xff] %v3024_v0   ;;  %v3132_v28 = vld [vmem:[%s5192_s0 + $0x448] sm:$0xff]   ;;  %v3240_v55 = vld [vmem:[%s5192_s0 + $0x450] sm:$0xff]  }
   0x3   :  { %v3027_v2 = vld [vmem:[%s5192_s0 + $0x200] sm:$0xff]   ;;  %3026 = vst [vmem:[%s5193_s1 + $0x240] sm:$0xff] %v3025_v1   ;;  %v3134_v29 = vld [vmem:[%s5192_s0 + $0x208] sm:$0xff]   ;;  %v3242_v56 = vld [vmem:[%s5192_s0 + $0x210] sm:$0xff]  }
   0x4   :  { %v3029_v3 = vld [vmem:[%s5192_s0 + $0x5c0] sm:$0xff]   ;;  %3028 = vst [vmem:[%s5193_s1 + $0x480] sm:$0xff] %v3027_v2   ;;  %v3136_v30 = vld [vmem:[%s5192_s0 + $0x5c8] sm:$0xff]   ;;  %v3244_v57 = vld [vmem:[%s5192_s0 + $0x5d0] sm:$0xff]  }
   0x5   :  { %v3031_v4 = vld [vmem:[%s5192_s0 + $0x380] sm:$0xff]   ;;  %3030 = vst [vmem:[%s5193_s1 + $0xc0] sm:$0xff] %v3029_v3   ;;  %v3138_v31 = vld [vmem:[%s5192_s0 + $0x388] sm:$0xff]   ;;  %v3246_v58 = vld [vmem:[%s5192_s0 + $0x390] sm:$0xff]  }
   0x6   :  { %v3033_v5 = vld [vmem:[%s5192_s0 + $0x140] sm:$0xff]   ;;  %3032 = vst [vmem:[%s5193_s1 + $0x300] sm:$0xff] %v3031_v4   ;;  %v3140_v32 = vld [vmem:[%s5192_s0 + $0x148] sm:$0xff]   ;;  %v3248_v59 = vld [vmem:[%s5192_s0 + $0x150] sm:$0xff]  }
   0x7   :  { %v3035_v6 = vld [vmem:[%s5192_s0 + $0x500] sm:$0xff]   ;;  %3034 = vst [vmem:[%s5193_s1 + $0x540] sm:$0xff] %v3033_v5   ;;  %v3142_v33 = vld [vmem:[%s5192_s0 + $0x508] sm:$0xff]   ;;  %v3250_v60 = vld [vmem:[%s5192_s0 + $0x510] sm:$0xff]  }
   0x8   :  { %v3037_v7 = vld [vmem:[%s5192_s0 + $0x2c0] sm:$0xff]   ;;  %3036 = vst [vmem:[%s5193_s1 + $0x180] sm:$0xff] %v3035_v6   ;;  %v3144_v34 = vld [vmem:[%s5192_s0 + $0x2c8] sm:$0xff]   ;;  %v3252_v61 = vld [vmem:[%s5192_s0 + $0x2d0] sm:$0xff]  }
   0x9   :  { %v3039_v8 = vld [vmem:[%s5192_s0 + $0x80] sm:$0xff]   ;;  %3038 = vst [vmem:[%s5193_s1 + $0x3c0] sm:$0xff] %v3037_v7   ;;  %v3146_v35 = vld [vmem:[%s5192_s0 + $0x88] sm:$0xff]   ;;  %v3254_v62 = vld [vmem:[%s5192_s0 + $0x90] sm:$0xff]  }
   0xa   :  { %v3041_v9 = vld [vmem:[%s5192_s0 + $0x640] sm:$0xff]   ;;  %3040 = vst [vmem:[%s5193_s1 + $0x600] sm:$0xff] %v3039_v8   ;;  %v3148_v36 = vld [vmem:[%s5192_s0 + $0x648] sm:$0xff]   ;;  %v3256_v63 = vld [vmem:[%s5192_s0 + $0x650] sm:$0xff]  }
   0xb   :  { %v3043_v10 = vld [vmem:[%s5192_s0 + $0x400] sm:$0xff]   ;;  %3042 = vst [vmem:[%s5193_s1 + $0x40] sm:$0xff] %v3041_v9   ;;  %v3150_v37 = vld [vmem:[%s5192_s0 + $0x408] sm:$0xff]   ;;  %v3258_v0 = vld [vmem:[%s5192_s0 + $0x410] sm:$0xff]  }
   0xc   :  { %v3045_v11 = vld [vmem:[%s5192_s0 + $0x1c0] sm:$0xff]   ;;  %3044 = vst [vmem:[%s5193_s1 + $0x280] sm:$0xff] %v3043_v10   ;;  %v3152_v38 = vld [vmem:[%s5192_s0 + $0x1c8] sm:$0xff]   ;;  %v3260_v1 = vld [vmem:[%s5192_s0 + $0x1d0] sm:$0xff]  }
   0xd   :  { %v3047_v12 = vld [vmem:[%s5192_s0 + $0x580] sm:$0xff]   ;;  %3046 = vst [vmem:[%s5193_s1 + $0x4c0] sm:$0xff] %v3045_v11   ;;  %v3154_v39 = vld [vmem:[%s5192_s0 + $0x588] sm:$0xff]   ;;  %v3262_v2 = vld [vmem:[%s5192_s0 + $0x590] sm:$0xff]  }
   0xe   :  { %v3049_v13 = vld [vmem:[%s5192_s0 + $0x340] sm:$0xff]   ;;  %3048 = vst [vmem:[%s5193_s1 + $0x100] sm:$0xff] %v3047_v12   ;;  %v3156_v40 = vld [vmem:[%s5192_s0 + $0x348] sm:$0xff]   ;;  %v3264_v3 = vld [vmem:[%s5192_s0 + $0x350] sm:$0xff]  }
   0xf   :  { %v3051_v14 = vld [vmem:[%s5192_s0 + $0x100] sm:$0xff]   ;;  %3050 = vst [vmem:[%s5193_s1 + $0x340] sm:$0xff] %v3049_v13   ;;  %v3158_v41 = vld [vmem:[%s5192_s0 + $0x108] sm:$0xff]   ;;  %v3266_v4 = vld [vmem:[%s5192_s0 + $0x110] sm:$0xff]  }
  0x10   :  { %v3053_v15 = vld [vmem:[%s5192_s0 + $0x4c0] sm:$0xff]   ;;  %3052 = vst [vmem:[%s5193_s1 + $0x580] sm:$0xff] %v3051_v14   ;;  %v3160_v42 = vld [vmem:[%s5192_s0 + $0x4c8] sm:$0xff]   ;;  %v3268_v5 = vld [vmem:[%s5192_s0 + $0x4d0] sm:$0xff]  }
  0x11   :  { %v3055_v16 = vld [vmem:[%s5192_s0 + $0x280] sm:$0xff]   ;;  %3054 = vst [vmem:[%s5193_s1 + $0x1c0] sm:$0xff] %v3053_v15   ;;  %v3162_v43 = vld [vmem:[%s5192_s0 + $0x288] sm:$0xff]   ;;  %v3270_v6 = vld [vmem:[%s5192_s0 + $0x290] sm:$0xff]  }
  0x12   :  { %v3057_v17 = vld [vmem:[%s5192_s0 + $0x40] sm:$0xff]   ;;  %3056 = vst [vmem:[%s5193_s1 + $0x400] sm:$0xff] %v3055_v16   ;;  %v3164_v44 = vld [vmem:[%s5192_s0 + $0x48] sm:$0xff]   ;;  %v3272_v7 = vld [vmem:[%s5192_s0 + $0x50] sm:$0xff]  }
  0x13   :  { %v3059_v18 = vld [vmem:[%s5192_s0 + $0x600] sm:$0xff]   ;;  %3058 = vst [vmem:[%s5193_s1 + $0x640] sm:$0xff] %v3057_v17   ;;  %v3166_v45 = vld [vmem:[%s5192_s0 + $0x608] sm:$0xff]   ;;  %v3274_v8 = vld [vmem:[%s5192_s0 + $0x610] sm:$0xff]  }
  0x14   :  { %v3061_v19 = vld [vmem:[%s5192_s0 + $0x3c0] sm:$0xff]   ;;  %3060 = vst [vmem:[%s5193_s1 + $0x80] sm:$0xff] %v3059_v18   ;;  %v3168_v46 = vld [vmem:[%s5192_s0 + $0x3c8] sm:$0xff]   ;;  %v3276_v9 = vld [vmem:[%s5192_s0 + $0x3d0] sm:$0xff]  }
  0x15   :  { %v3063_v20 = vld [vmem:[%s5192_s0 + $0x180] sm:$0xff]   ;;  %3062 = vst [vmem:[%s5193_s1 + $0x2c0] sm:$0xff] %v3061_v19   ;;  %v3170_v47 = vld [vmem:[%s5192_s0 + $0x188] sm:$0xff]   ;;  %v3278_v10 = vld [vmem:[%s5192_s0 + $0x190] sm:$0xff]  }
  0x16   :  { %v3065_v21 = vld [vmem:[%s5192_s0 + $0x540] sm:$0xff]   ;;  %3064 = vst [vmem:[%s5193_s1 + $0x500] sm:$0xff] %v3063_v20   ;;  %v3172_v48 = vld [vmem:[%s5192_s0 + $0x548] sm:$0xff]   ;;  %v3280_v11 = vld [vmem:[%s5192_s0 + $0x550] sm:$0xff]  }
  0x17   :  { %v3067_v22 = vld [vmem:[%s5192_s0 + $0x300] sm:$0xff]   ;;  %3066 = vst [vmem:[%s5193_s1 + $0x140] sm:$0xff] %v3065_v21   ;;  %v3174_v49 = vld [vmem:[%s5192_s0 + $0x308] sm:$0xff]   ;;  %v3282_v12 = vld [vmem:[%s5192_s0 + $0x310] sm:$0xff]  }
  0x18   :  { %v3069_v23 = vld [vmem:[%s5192_s0 + $0xc0] sm:$0xff]   ;;  %3068 = vst [vmem:[%s5193_s1 + $0x380] sm:$0xff] %v3067_v22   ;;  %v3176_v50 = vld [vmem:[%s5192_s0 + $0xc8] sm:$0xff]   ;;  %v3284_v13 = vld [vmem:[%s5192_s0 + $0xd0] sm:$0xff]  }
  0x19   :  { %v3071_v24 = vld [vmem:[%s5192_s0 + $0x480] sm:$0xff]   ;;  %3070 = vst [vmem:[%s5193_s1 + $0x5c0] sm:$0xff] %v3069_v23   ;;  %v3178_v51 = vld [vmem:[%s5192_s0 + $0x488] sm:$0xff]   ;;  %v3286_v14 = vld [vmem:[%s5192_s0 + $0x490] sm:$0xff]  }
  0x1a   :  { %v3073_v25 = vld [vmem:[%s5192_s0 + $0x240] sm:$0xff]   ;;  %3072 = vst [vmem:[%s5193_s1 + $0x200] sm:$0xff] %v3071_v24   ;;  %v3180_v52 = vld [vmem:[%s5192_s0 + $0x248] sm:$0xff]   ;;  %v3288_v15 = vld [vmem:[%s5192_s0 + $0x250] sm:$0xff]  }
  0x1b   :  { %v183_v26 = vld [vmem:[%s5192_s0] sm:$0xff]   ;;  %3074 = vst [vmem:[%s5193_s1 + $0x440] sm:$0xff] %v3073_v25   ;;  %v3182_v53 = vld [vmem:[%s5192_s0 + $0x8] sm:$0xff]   ;;  %v3290_v16 = vld [vmem:[%s5192_s0 + $0x10] sm:$0xff]  }
  0x1c   :  { %3075 = vst [vmem:[%s5193_s1 + $0x680] sm:$0xff] %v183_v26   ;;  %v3346_v17 = vld [vmem:[%s5192_s0 + $0x698] sm:$0xff]  }
  0x1d   :  { %3131 = vst [vmem:[%s5193_s1 + $0x8] sm:$0xff] %v3130_v27   ;;  %v3348_v18 = vld [vmem:[%s5192_s0 + $0x458] sm:$0xff]  }
  0x1e   :  { %3133 = vst [vmem:[%s5193_s1 + $0x248] sm:$0xff] %v3132_v28   ;;  %v3350_v19 = vld [vmem:[%s5192_s0 + $0x218] sm:$0xff]  }
  0x1f   :  { %3135 = vst [vmem:[%s5193_s1 + $0x488] sm:$0xff] %v3134_v29   ;;  %v3352_v20 = vld [vmem:[%s5192_s0 + $0x5d8] sm:$0xff]  }
  0x20   :  { %3137 = vst [vmem:[%s5193_s1 + $0xc8] sm:$0xff] %v3136_v30   ;;  %v3354_v21 = vld [vmem:[%s5192_s0 + $0x398] sm:$0xff]  }
  0x21   :  { %3139 = vst [vmem:[%s5193_s1 + $0x308] sm:$0xff] %v3138_v31   ;;  %v3356_v22 = vld [vmem:[%s5192_s0 + $0x158] sm:$0xff]  }
  0x22   :  { %3141 = vst [vmem:[%s5193_s1 + $0x548] sm:$0xff] %v3140_v32   ;;  %v3358_v23 = vld [vmem:[%s5192_s0 + $0x518] sm:$0xff]  }
  0x23   :  { %3143 = vst [vmem:[%s5193_s1 + $0x188] sm:$0xff] %v3142_v33   ;;  %v3360_v24 = vld [vmem:[%s5192_s0 + $0x2d8] sm:$0xff]  }
  0x24   :  { %3145 = vst [vmem:[%s5193_s1 + $0x3c8] sm:$0xff] %v3144_v34   ;;  %v3362_v25 = vld [vmem:[%s5192_s0 + $0x98] sm:$0xff]  }
  0x25   :  { %3147 = vst [vmem:[%s5193_s1 + $0x608] sm:$0xff] %v3146_v35   ;;  %v3364_v26 = vld [vmem:[%s5192_s0 + $0x658] sm:$0xff]  }
  0x26   :  { %3149 = vst [vmem:[%s5193_s1 + $0x48] sm:$0xff] %v3148_v36   ;;  %v3366_v27 = vld [vmem:[%s5192_s0 + $0x418] sm:$0xff]  }
  0x27   :  { %3151 = vst [vmem:[%s5193_s1 + $0x288] sm:$0xff] %v3150_v37   ;;  %v3368_v28 = vld [vmem:[%s5192_s0 + $0x1d8] sm:$0xff]  }
  0x28   :  { %3153 = vst [vmem:[%s5193_s1 + $0x4c8] sm:$0xff] %v3152_v38   ;;  %v3370_v29 = vld [vmem:[%s5192_s0 + $0x598] sm:$0xff]  }
  0x29   :  { %3155 = vst [vmem:[%s5193_s1 + $0x108] sm:$0xff] %v3154_v39   ;;  %v3372_v30 = vld [vmem:[%s5192_s0 + $0x358] sm:$0xff]  }
  0x2a   :  { %3157 = vst [vmem:[%s5193_s1 + $0x348] sm:$0xff] %v3156_v40   ;;  %v3374_v31 = vld [vmem:[%s5192_s0 + $0x118] sm:$0xff]  }
  0x2b   :  { %3159 = vst [vmem:[%s5193_s1 + $0x588] sm:$0xff] %v3158_v41   ;;  %v3376_v32 = vld [vmem:[%s5192_s0 + $0x4d8] sm:$0xff]  }
  0x2c   :  { %3161 = vst [vmem:[%s5193_s1 + $0x1c8] sm:$0xff] %v3160_v42   ;;  %v3378_v33 = vld [vmem:[%s5192_s0 + $0x298] sm:$0xff]  }
  0x2d   :  { %3163 = vst [vmem:[%s5193_s1 + $0x408] sm:$0xff] %v3162_v43   ;;  %v3380_v34 = vld [vmem:[%s5192_s0 + $0x58] sm:$0xff]  }
  0x2e   :  { %3165 = vst [vmem:[%s5193_s1 + $0x648] sm:$0xff] %v3164_v44   ;;  %v3382_v35 = vld [vmem:[%s5192_s0 + $0x618] sm:$0xff]   ;;  %v3454_v44 = vld [vmem:[%s5192_s0 + $0x6a0] sm:$0xff]  }
  0x2f   :  { %3167 = vst [vmem:[%s5193_s1 + $0x88] sm:$0xff] %v3166_v45   ;;  %v3384_v36 = vld [vmem:[%s5192_s0 + $0x3d8] sm:$0xff]   ;;  %v3456_v45 = vld [vmem:[%s5192_s0 + $0x460] sm:$0xff]  }
  0x30   :  { %3169 = vst [vmem:[%s5193_s1 + $0x2c8] sm:$0xff] %v3168_v46   ;;  %v3386_v37 = vld [vmem:[%s5192_s0 + $0x198] sm:$0xff]   ;;  %v3458_v46 = vld [vmem:[%s5192_s0 + $0x220] sm:$0xff]  }
  0x31   :  { %3171 = vst [vmem:[%s5193_s1 + $0x508] sm:$0xff] %v3170_v47   ;;  %v3388_v38 = vld [vmem:[%s5192_s0 + $0x558] sm:$0xff]   ;;  %v3460_v47 = vld [vmem:[%s5192_s0 + $0x5e0] sm:$0xff]  }
  0x32   :  { %3173 = vst [vmem:[%s5193_s1 + $0x148] sm:$0xff] %v3172_v48   ;;  %v3390_v39 = vld [vmem:[%s5192_s0 + $0x318] sm:$0xff]   ;;  %v3462_v48 = vld [vmem:[%s5192_s0 + $0x3a0] sm:$0xff]  }
  0x33   :  { %3175 = vst [vmem:[%s5193_s1 + $0x388] sm:$0xff] %v3174_v49   ;;  %v3392_v40 = vld [vmem:[%s5192_s0 + $0xd8] sm:$0xff]   ;;  %v3464_v49 = vld [vmem:[%s5192_s0 + $0x160] sm:$0xff]  }
  0x34   :  { %3177 = vst [vmem:[%s5193_s1 + $0x5c8] sm:$0xff] %v3176_v50   ;;  %v3394_v41 = vld [vmem:[%s5192_s0 + $0x498] sm:$0xff]   ;;  %v3466_v50 = vld [vmem:[%s5192_s0 + $0x520] sm:$0xff]  }
  0x35   :  { %3179 = vst [vmem:[%s5193_s1 + $0x208] sm:$0xff] %v3178_v51   ;;  %v3396_v42 = vld [vmem:[%s5192_s0 + $0x258] sm:$0xff]   ;;  %v3468_v51 = vld [vmem:[%s5192_s0 + $0x2e0] sm:$0xff]  }
  0x36   :  { %3181 = vst [vmem:[%s5193_s1 + $0x448] sm:$0xff] %v3180_v52   ;;  %v3398_v43 = vld [vmem:[%s5192_s0 + $0x18] sm:$0xff]   ;;  %v3470_v52 = vld [vmem:[%s5192_s0 + $0xa0] sm:$0xff]  }
  0x37   :  { %3183 = vst [vmem:[%s5193_s1 + $0x688] sm:$0xff] %v3182_v53   ;;  %v3472_v53 = vld [vmem:[%s5192_s0 + $0x660] sm:$0xff]  }
  0x38   :  { %3239 = vst [vmem:[%s5193_s1 + $0x10] sm:$0xff] %v3238_v54   ;;  %v3474_v54 = vld [vmem:[%s5192_s0 + $0x420] sm:$0xff]  }
  0x39   :  { %3241 = vst [vmem:[%s5193_s1 + $0x250] sm:$0xff] %v3240_v55   ;;  %v3476_v55 = vld [vmem:[%s5192_s0 + $0x1e0] sm:$0xff]  }
  0x3a   :  { %3243 = vst [vmem:[%s5193_s1 + $0x490] sm:$0xff] %v3242_v56   ;;  %v3478_v56 = vld [vmem:[%s5192_s0 + $0x5a0] sm:$0xff]  }
  0x3b   :  { %3245 = vst [vmem:[%s5193_s1 + $0xd0] sm:$0xff] %v3244_v57   ;;  %v3480_v57 = vld [vmem:[%s5192_s0 + $0x360] sm:$0xff]  }
  0x3c   :  { %3247 = vst [vmem:[%s5193_s1 + $0x310] sm:$0xff] %v3246_v58   ;;  %v3482_v58 = vld [vmem:[%s5192_s0 + $0x120] sm:$0xff]  }
  0x3d   :  { %3249 = vst [vmem:[%s5193_s1 + $0x550] sm:$0xff] %v3248_v59   ;;  %v3484_v59 = vld [vmem:[%s5192_s0 + $0x4e0] sm:$0xff]  }
  0x3e   :  { %3251 = vst [vmem:[%s5193_s1 + $0x190] sm:$0xff] %v3250_v60   ;;  %v3486_v60 = vld [vmem:[%s5192_s0 + $0x2a0] sm:$0xff]  }
  0x3f   :  { %3253 = vst [vmem:[%s5193_s1 + $0x3d0] sm:$0xff] %v3252_v61   ;;  %v3488_v61 = vld [vmem:[%s5192_s0 + $0x60] sm:$0xff]  }
  0x40   :  { %3255 = vst [vmem:[%s5193_s1 + $0x610] sm:$0xff] %v3254_v62   ;;  %v3490_v62 = vld [vmem:[%s5192_s0 + $0x620] sm:$0xff]  }
  0x41   :  { %3257 = vst [vmem:[%s5193_s1 + $0x50] sm:$0xff] %v3256_v63   ;;  %v3492_v63 = vld [vmem:[%s5192_s0 + $0x3e0] sm:$0xff]  }
  0x42   :  { %3259 = vst [vmem:[%s5193_s1 + $0x290] sm:$0xff] %v3258_v0   ;;  %v3494_v0 = vld [vmem:[%s5192_s0 + $0x1a0] sm:$0xff]  }
  0x43   :  { %3261 = vst [vmem:[%s5193_s1 + $0x4d0] sm:$0xff] %v3260_v1   ;;  %v3496_v1 = vld [vmem:[%s5192_s0 + $0x560] sm:$0xff]  }
  0x44   :  { %3263 = vst [vmem:[%s5193_s1 + $0x110] sm:$0xff] %v3262_v2   ;;  %v3498_v2 = vld [vmem:[%s5192_s0 + $0x320] sm:$0xff]  }
  0x45   :  { %3265 = vst [vmem:[%s5193_s1 + $0x350] sm:$0xff] %v3264_v3   ;;  %v3500_v3 = vld [vmem:[%s5192_s0 + $0xe0] sm:$0xff]  }
  0x46   :  { %3267 = vst [vmem:[%s5193_s1 + $0x590] sm:$0xff] %v3266_v4   ;;  %v3502_v4 = vld [vmem:[%s5192_s0 + $0x4a0] sm:$0xff]  }
  0x47   :  { %3269 = vst [vmem:[%s5193_s1 + $0x1d0] sm:$0xff] %v3268_v5   ;;  %v3504_v5 = vld [vmem:[%s5192_s0 + $0x260] sm:$0xff]  }
  0x48   :  { %3271 = vst [vmem:[%s5193_s1 + $0x410] sm:$0xff] %v3270_v6   ;;  %v3506_v6 = vld [vmem:[%s5192_s0 + $0x20] sm:$0xff]  }
  0x49   :  { %3273 = vst [vmem:[%s5193_s1 + $0x650] sm:$0xff] %v3272_v7   ;;  %v3562_v7 = vld [vmem:[%s5192_s0 + $0x6a8] sm:$0xff]  }
  0x4a   :  { %3275 = vst [vmem:[%s5193_s1 + $0x90] sm:$0xff] %v3274_v8   ;;  %v3564_v8 = vld [vmem:[%s5192_s0 + $0x468] sm:$0xff]  }
  0x4b   :  { %3277 = vst [vmem:[%s5193_s1 + $0x2d0] sm:$0xff] %v3276_v9   ;;  %v3566_v9 = vld [vmem:[%s5192_s0 + $0x228] sm:$0xff]  }
  0x4c   :  { %3279 = vst [vmem:[%s5193_s1 + $0x510] sm:$0xff] %v3278_v10   ;;  %v3568_v10 = vld [vmem:[%s5192_s0 + $0x5e8] sm:$0xff]  }
  0x4d   :  { %3281 = vst [vmem:[%s5193_s1 + $0x150] sm:$0xff] %v3280_v11   ;;  %v3570_v11 = vld [vmem:[%s5192_s0 + $0x3a8] sm:$0xff]  }
  0x4e   :  { %3283 = vst [vmem:[%s5193_s1 + $0x390] sm:$0xff] %v3282_v12   ;;  %v3572_v12 = vld [vmem:[%s5192_s0 + $0x168] sm:$0xff]  }
  0x4f   :  { %3285 = vst [vmem:[%s5193_s1 + $0x5d0] sm:$0xff] %v3284_v13   ;;  %v3574_v13 = vld [vmem:[%s5192_s0 + $0x528] sm:$0xff]  }
  0x50   :  { %3287 = vst [vmem:[%s5193_s1 + $0x210] sm:$0xff] %v3286_v14   ;;  %v3576_v14 = vld [vmem:[%s5192_s0 + $0x2e8] sm:$0xff]  }
  0x51   :  { %3289 = vst [vmem:[%s5193_s1 + $0x450] sm:$0xff] %v3288_v15   ;;  %v3578_v15 = vld [vmem:[%s5192_s0 + $0xa8] sm:$0xff]  }
  0x52   :  { %3291 = vst [vmem:[%s5193_s1 + $0x690] sm:$0xff] %v3290_v16   ;;  %v3580_v16 = vld [vmem:[%s5192_s0 + $0x668] sm:$0xff]  }
  0x53   :  { %3347 = vst [vmem:[%s5193_s1 + $0x18] sm:$0xff] %v3346_v17   ;;  %v3582_v17 = vld [vmem:[%s5192_s0 + $0x428] sm:$0xff]  }
  0x54   :  { %3349 = vst [vmem:[%s5193_s1 + $0x258] sm:$0xff] %v3348_v18   ;;  %v3584_v18 = vld [vmem:[%s5192_s0 + $0x1e8] sm:$0xff]  }
  0x55   :  { %3351 = vst [vmem:[%s5193_s1 + $0x498] sm:$0xff] %v3350_v19   ;;  %v3586_v19 = vld [vmem:[%s5192_s0 + $0x5a8] sm:$0xff]  }
  0x56   :  { %3353 = vst [vmem:[%s5193_s1 + $0xd8] sm:$0xff] %v3352_v20   ;;  %v3588_v20 = vld [vmem:[%s5192_s0 + $0x368] sm:$0xff]  }
  0x57   :  { %3355 = vst [vmem:[%s5193_s1 + $0x318] sm:$0xff] %v3354_v21   ;;  %v3590_v21 = vld [vmem:[%s5192_s0 + $0x128] sm:$0xff]  }
  0x58   :  { %3357 = vst [vmem:[%s5193_s1 + $0x558] sm:$0xff] %v3356_v22   ;;  %v3592_v22 = vld [vmem:[%s5192_s0 + $0x4e8] sm:$0xff]  }
  0x59   :  { %3359 = vst [vmem:[%s5193_s1 + $0x198] sm:$0xff] %v3358_v23   ;;  %v3594_v23 = vld [vmem:[%s5192_s0 + $0x2a8] sm:$0xff]  }
  0x5a   :  { %3361 = vst [vmem:[%s5193_s1 + $0x3d8] sm:$0xff] %v3360_v24   ;;  %v3596_v24 = vld [vmem:[%s5192_s0 + $0x68] sm:$0xff]  }
  0x5b   :  { %3363 = vst [vmem:[%s5193_s1 + $0x618] sm:$0xff] %v3362_v25   ;;  %v3598_v25 = vld [vmem:[%s5192_s0 + $0x628] sm:$0xff]  }
  0x5c   :  { %3365 = vst [vmem:[%s5193_s1 + $0x58] sm:$0xff] %v3364_v26   ;;  %v3600_v26 = vld [vmem:[%s5192_s0 + $0x3e8] sm:$0xff]  }
  0x5d   :  { %3367 = vst [vmem:[%s5193_s1 + $0x298] sm:$0xff] %v3366_v27   ;;  %v3602_v27 = vld [vmem:[%s5192_s0 + $0x1a8] sm:$0xff]  }
  0x5e   :  { %3369 = vst [vmem:[%s5193_s1 + $0x4d8] sm:$0xff] %v3368_v28   ;;  %v3604_v28 = vld [vmem:[%s5192_s0 + $0x568] sm:$0xff]  }
  0x5f   :  { %3371 = vst [vmem:[%s5193_s1 + $0x118] sm:$0xff] %v3370_v29   ;;  %v3606_v29 = vld [vmem:[%s5192_s0 + $0x328] sm:$0xff]  }
  0x60   :  { %3373 = vst [vmem:[%s5193_s1 + $0x358] sm:$0xff] %v3372_v30   ;;  %v3608_v30 = vld [vmem:[%s5192_s0 + $0xe8] sm:$0xff]  }
  0x61   :  { %3375 = vst [vmem:[%s5193_s1 + $0x598] sm:$0xff] %v3374_v31   ;;  %v3610_v31 = vld [vmem:[%s5192_s0 + $0x4a8] sm:$0xff]  }
  0x62   :  { %3377 = vst [vmem:[%s5193_s1 + $0x1d8] sm:$0xff] %v3376_v32   ;;  %v3612_v32 = vld [vmem:[%s5192_s0 + $0x268] sm:$0xff]  }
  0x63   :  { %3379 = vst [vmem:[%s5193_s1 + $0x418] sm:$0xff] %v3378_v33   ;;  %v3614_v33 = vld [vmem:[%s5192_s0 + $0x28] sm:$0xff]  }
  0x64   :  { %3381 = vst [vmem:[%s5193_s1 + $0x658] sm:$0xff] %v3380_v34   ;;  %v3670_v34 = vld [vmem:[%s5192_s0 + $0x6b0] sm:$0xff]  }
  0x65   :  { %3383 = vst [vmem:[%s5193_s1 + $0x98] sm:$0xff] %v3382_v35   ;;  %v3672_v35 = vld [vmem:[%s5192_s0 + $0x470] sm:$0xff]  }
  0x66   :  { %3385 = vst [vmem:[%s5193_s1 + $0x2d8] sm:$0xff] %v3384_v36   ;;  %v3674_v36 = vld [vmem:[%s5192_s0 + $0x230] sm:$0xff]  }
  0x67   :  { %3387 = vst [vmem:[%s5193_s1 + $0x518] sm:$0xff] %v3386_v37   ;;  %v3676_v37 = vld [vmem:[%s5192_s0 + $0x5f0] sm:$0xff]  }
  0x68   :  { %3389 = vst [vmem:[%s5193_s1 + $0x158] sm:$0xff] %v3388_v38   ;;  %v3678_v38 = vld [vmem:[%s5192_s0 + $0x3b0] sm:$0xff]  }
  0x69   :  { %3391 = vst [vmem:[%s5193_s1 + $0x398] sm:$0xff] %v3390_v39   ;;  %v3680_v39 = vld [vmem:[%s5192_s0 + $0x170] sm:$0xff]  }
  0x6a   :  { %3393 = vst [vmem:[%s5193_s1 + $0x5d8] sm:$0xff] %v3392_v40   ;;  %v3682_v40 = vld [vmem:[%s5192_s0 + $0x530] sm:$0xff]  }
  0x6b   :  { %3395 = vst [vmem:[%s5193_s1 + $0x218] sm:$0xff] %v3394_v41   ;;  %v3684_v41 = vld [vmem:[%s5192_s0 + $0x2f0] sm:$0xff]  }
  0x6c   :  { %3397 = vst [vmem:[%s5193_s1 + $0x458] sm:$0xff] %v3396_v42   ;;  %v3686_v42 = vld [vmem:[%s5192_s0 + $0xb0] sm:$0xff]  }
  0x6d   :  { %3399 = vst [vmem:[%s5193_s1 + $0x698] sm:$0xff] %v3398_v43   ;;  %v3688_v43 = vld [vmem:[%s5192_s0 + $0x670] sm:$0xff]  }
  0x6e   :  { %3455 = vst [vmem:[%s5193_s1 + $0x20] sm:$0xff] %v3454_v44   ;;  %v3690_v44 = vld [vmem:[%s5192_s0 + $0x430] sm:$0xff]  }
  0x6f   :  { %3457 = vst [vmem:[%s5193_s1 + $0x260] sm:$0xff] %v3456_v45   ;;  %v3692_v45 = vld [vmem:[%s5192_s0 + $0x1f0] sm:$0xff]  }
  0x70   :  { %3459 = vst [vmem:[%s5193_s1 + $0x4a0] sm:$0xff] %v3458_v46   ;;  %v3694_v46 = vld [vmem:[%s5192_s0 + $0x5b0] sm:$0xff]  }
  0x71   :  { %3461 = vst [vmem:[%s5193_s1 + $0xe0] sm:$0xff] %v3460_v47   ;;  %v3696_v47 = vld [vmem:[%s5192_s0 + $0x370] sm:$0xff]  }
  0x72   :  { %3463 = vst [vmem:[%s5193_s1 + $0x320] sm:$0xff] %v3462_v48   ;;  %v3698_v48 = vld [vmem:[%s5192_s0 + $0x130] sm:$0xff]  }
  0x73   :  { %3465 = vst [vmem:[%s5193_s1 + $0x560] sm:$0xff] %v3464_v49   ;;  %v3700_v49 = vld [vmem:[%s5192_s0 + $0x4f0] sm:$0xff]  }
  0x74   :  { %3467 = vst [vmem:[%s5193_s1 + $0x1a0] sm:$0xff] %v3466_v50   ;;  %v3702_v50 = vld [vmem:[%s5192_s0 + $0x2b0] sm:$0xff]  }
  0x75   :  { %3469 = vst [vmem:[%s5193_s1 + $0x3e0] sm:$0xff] %v3468_v51   ;;  %v3704_v51 = vld [vmem:[%s5192_s0 + $0x70] sm:$0xff]  }
  0x76   :  { %3471 = vst [vmem:[%s5193_s1 + $0x620] sm:$0xff] %v3470_v52   ;;  %v3706_v52 = vld [vmem:[%s5192_s0 + $0x630] sm:$0xff]  }
  0x77   :  { %3473 = vst [vmem:[%s5193_s1 + $0x60] sm:$0xff] %v3472_v53   ;;  %v3708_v53 = vld [vmem:[%s5192_s0 + $0x3f0] sm:$0xff]  }
  0x78   :  { %3475 = vst [vmem:[%s5193_s1 + $0x2a0] sm:$0xff] %v3474_v54   ;;  %v3710_v54 = vld [vmem:[%s5192_s0 + $0x1b0] sm:$0xff]  }
  0x79   :  { %3477 = vst [vmem:[%s5193_s1 + $0x4e0] sm:$0xff] %v3476_v55   ;;  %v3712_v55 = vld [vmem:[%s5192_s0 + $0x570] sm:$0xff]  }
  0x7a   :  { %3479 = vst [vmem:[%s5193_s1 + $0x120] sm:$0xff] %v3478_v56   ;;  %v3714_v56 = vld [vmem:[%s5192_s0 + $0x330] sm:$0xff]  }
  0x7b   :  { %3481 = vst [vmem:[%s5193_s1 + $0x360] sm:$0xff] %v3480_v57   ;;  %v3716_v57 = vld [vmem:[%s5192_s0 + $0xf0] sm:$0xff]  }
  0x7c   :  { %3483 = vst [vmem:[%s5193_s1 + $0x5a0] sm:$0xff] %v3482_v58   ;;  %v3718_v58 = vld [vmem:[%s5192_s0 + $0x4b0] sm:$0xff]  }
  0x7d   :  { %3485 = vst [vmem:[%s5193_s1 + $0x1e0] sm:$0xff] %v3484_v59   ;;  %v3720_v59 = vld [vmem:[%s5192_s0 + $0x270] sm:$0xff]  }
  0x7e   :  { %3487 = vst [vmem:[%s5193_s1 + $0x420] sm:$0xff] %v3486_v60   ;;  %v3722_v60 = vld [vmem:[%s5192_s0 + $0x30] sm:$0xff]  }
  0x7f   :  { %3489 = vst [vmem:[%s5193_s1 + $0x660] sm:$0xff] %v3488_v61   ;;  %v3778_v61 = vld [vmem:[%s5192_s0 + $0x6b8] sm:$0xff]  }
  0x80   :  { %3491 = vst [vmem:[%s5193_s1 + $0xa0] sm:$0xff] %v3490_v62   ;;  %v3780_v62 = vld [vmem:[%s5192_s0 + $0x478] sm:$0xff]  }
  0x81   :  { %3493 = vst [vmem:[%s5193_s1 + $0x2e0] sm:$0xff] %v3492_v63   ;;  %v3782_v63 = vld [vmem:[%s5192_s0 + $0x238] sm:$0xff]  }
  0x82   :  { %3495 = vst [vmem:[%s5193_s1 + $0x520] sm:$0xff] %v3494_v0   ;;  %v3784_v0 = vld [vmem:[%s5192_s0 + $0x5f8] sm:$0xff]  }
  0x83   :  { %3497 = vst [vmem:[%s5193_s1 + $0x160] sm:$0xff] %v3496_v1   ;;  %v3786_v1 = vld [vmem:[%s5192_s0 + $0x3b8] sm:$0xff]  }
  0x84   :  { %3499 = vst [vmem:[%s5193_s1 + $0x3a0] sm:$0xff] %v3498_v2   ;;  %v3788_v2 = vld [vmem:[%s5192_s0 + $0x178] sm:$0xff]  }
  0x85   :  { %3501 = vst [vmem:[%s5193_s1 + $0x5e0] sm:$0xff] %v3500_v3   ;;  %v3790_v3 = vld [vmem:[%s5192_s0 + $0x538] sm:$0xff]  }
  0x86   :  { %3503 = vst [vmem:[%s5193_s1 + $0x220] sm:$0xff] %v3502_v4   ;;  %v3792_v4 = vld [vmem:[%s5192_s0 + $0x2f8] sm:$0xff]  }
  0x87   :  { %3505 = vst [vmem:[%s5193_s1 + $0x460] sm:$0xff] %v3504_v5   ;;  %v3794_v5 = vld [vmem:[%s5192_s0 + $0xb8] sm:$0xff]  }
  0x88   :  { %3507 = vst [vmem:[%s5193_s1 + $0x6a0] sm:$0xff] %v3506_v6   ;;  %v3796_v6 = vld [vmem:[%s5192_s0 + $0x678] sm:$0xff]  }
  0x89   :  { %3563 = vst [vmem:[%s5193_s1 + $0x28] sm:$0xff] %v3562_v7   ;;  %v3798_v7 = vld [vmem:[%s5192_s0 + $0x438] sm:$0xff]  }
  0x8a   :  { %3565 = vst [vmem:[%s5193_s1 + $0x268] sm:$0xff] %v3564_v8   ;;  %v3800_v8 = vld [vmem:[%s5192_s0 + $0x1f8] sm:$0xff]  }
  0x8b   :  { %3567 = vst [vmem:[%s5193_s1 + $0x4a8] sm:$0xff] %v3566_v9   ;;  %v3802_v9 = vld [vmem:[%s5192_s0 + $0x5b8] sm:$0xff]  }
  0x8c   :  { %3569 = vst [vmem:[%s5193_s1 + $0xe8] sm:$0xff] %v3568_v10   ;;  %v3804_v10 = vld [vmem:[%s5192_s0 + $0x378] sm:$0xff]  }
  0x8d   :  { %3571 = vst [vmem:[%s5193_s1 + $0x328] sm:$0xff] %v3570_v11   ;;  %v3806_v11 = vld [vmem:[%s5192_s0 + $0x138] sm:$0xff]  }
  0x8e   :  { %3573 = vst [vmem:[%s5193_s1 + $0x568] sm:$0xff] %v3572_v12   ;;  %v3808_v12 = vld [vmem:[%s5192_s0 + $0x4f8] sm:$0xff]  }
  0x8f   :  { %3575 = vst [vmem:[%s5193_s1 + $0x1a8] sm:$0xff] %v3574_v13   ;;  %v3810_v13 = vld [vmem:[%s5192_s0 + $0x2b8] sm:$0xff]  }
  0x90   :  { %3577 = vst [vmem:[%s5193_s1 + $0x3e8] sm:$0xff] %v3576_v14   ;;  %v3812_v14 = vld [vmem:[%s5192_s0 + $0x78] sm:$0xff]  }
  0x91   :  { %3579 = vst [vmem:[%s5193_s1 + $0x628] sm:$0xff] %v3578_v15   ;;  %v3814_v15 = vld [vmem:[%s5192_s0 + $0x638] sm:$0xff]  }
  0x92   :  { %3581 = vst [vmem:[%s5193_s1 + $0x68] sm:$0xff] %v3580_v16   ;;  %v3816_v16 = vld [vmem:[%s5192_s0 + $0x3f8] sm:$0xff]  }
  0x93   :  { %3583 = vst [vmem:[%s5193_s1 + $0x2a8] sm:$0xff] %v3582_v17   ;;  %v3818_v17 = vld [vmem:[%s5192_s0 + $0x1b8] sm:$0xff]  }
  0x94   :  { %3585 = vst [vmem:[%s5193_s1 + $0x4e8] sm:$0xff] %v3584_v18   ;;  %v3820_v18 = vld [vmem:[%s5192_s0 + $0x578] sm:$0xff]  }
  0x95   :  { %3587 = vst [vmem:[%s5193_s1 + $0x128] sm:$0xff] %v3586_v19   ;;  %v3822_v19 = vld [vmem:[%s5192_s0 + $0x338] sm:$0xff]  }
  0x96   :  { %3589 = vst [vmem:[%s5193_s1 + $0x368] sm:$0xff] %v3588_v20   ;;  %v3824_v20 = vld [vmem:[%s5192_s0 + $0xf8] sm:$0xff]  }
  0x97   :  { %3591 = vst [vmem:[%s5193_s1 + $0x5a8] sm:$0xff] %v3590_v21   ;;  %v3826_v21 = vld [vmem:[%s5192_s0 + $0x4b8] sm:$0xff]  }
  0x98   :  { %3593 = vst [vmem:[%s5193_s1 + $0x1e8] sm:$0xff] %v3592_v22   ;;  %v3828_v22 = vld [vmem:[%s5192_s0 + $0x278] sm:$0xff]  }
  0x99   :  { %3595 = vst [vmem:[%s5193_s1 + $0x428] sm:$0xff] %v3594_v23   ;;  %v3830_v23 = vld [vmem:[%s5192_s0 + $0x38] sm:$0xff]  }
  0x9a   :  { %3597 = vst [vmem:[%s5193_s1 + $0x668] sm:$0xff] %v3596_v24  }
  0x9b   :  { %3599 = vst [vmem:[%s5193_s1 + $0xa8] sm:$0xff] %v3598_v25  }
  0x9c   :  { %3601 = vst [vmem:[%s5193_s1 + $0x2e8] sm:$0xff] %v3600_v26  }
  0x9d   :  { %3603 = vst [vmem:[%s5193_s1 + $0x528] sm:$0xff] %v3602_v27  }
  0x9e   :  { %3605 = vst [vmem:[%s5193_s1 + $0x168] sm:$0xff] %v3604_v28  }
  0x9f   :  { %3607 = vst [vmem:[%s5193_s1 + $0x3a8] sm:$0xff] %v3606_v29  }
  0xa0   :  { %3609 = vst [vmem:[%s5193_s1 + $0x5e8] sm:$0xff] %v3608_v30  }
  0xa1   :  { %3611 = vst [vmem:[%s5193_s1 + $0x228] sm:$0xff] %v3610_v31  }
  0xa2   :  { %3613 = vst [vmem:[%s5193_s1 + $0x468] sm:$0xff] %v3612_v32  }
  0xa3   :  { %3615 = vst [vmem:[%s5193_s1 + $0x6a8] sm:$0xff] %v3614_v33  }
  0xa4   :  { %3671 = vst [vmem:[%s5193_s1 + $0x30] sm:$0xff] %v3670_v34  }
  0xa5   :  { %3673 = vst [vmem:[%s5193_s1 + $0x270] sm:$0xff] %v3672_v35  }
  0xa6   :  { %3675 = vst [vmem:[%s5193_s1 + $0x4b0] sm:$0xff] %v3674_v36  }
  0xa7   :  { %3677 = vst [vmem:[%s5193_s1 + $0xf0] sm:$0xff] %v3676_v37  }
  0xa8   :  { %3679 = vst [vmem:[%s5193_s1 + $0x330] sm:$0xff] %v3678_v38  }
  0xa9   :  { %3681 = vst [vmem:[%s5193_s1 + $0x570] sm:$0xff] %v3680_v39  }
  0xaa   :  { %3683 = vst [vmem:[%s5193_s1 + $0x1b0] sm:$0xff] %v3682_v40  }
  0xab   :  { %3685 = vst [vmem:[%s5193_s1 + $0x3f0] sm:$0xff] %v3684_v41  }
  0xac   :  { %3687 = vst [vmem:[%s5193_s1 + $0x630] sm:$0xff] %v3686_v42  }
  0xad   :  { %3689 = vst [vmem:[%s5193_s1 + $0x70] sm:$0xff] %v3688_v43  }
  0xae   :  { %3691 = vst [vmem:[%s5193_s1 + $0x2b0] sm:$0xff] %v3690_v44  }
  0xaf   :  { %3693 = vst [vmem:[%s5193_s1 + $0x4f0] sm:$0xff] %v3692_v45  }
  0xb0   :  { %3695 = vst [vmem:[%s5193_s1 + $0x130] sm:$0xff] %v3694_v46  }
  0xb1   :  { %3697 = vst [vmem:[%s5193_s1 + $0x370] sm:$0xff] %v3696_v47  }
  0xb2   :  { %3699 = vst [vmem:[%s5193_s1 + $0x5b0] sm:$0xff] %v3698_v48  }
  0xb3   :  { %3701 = vst [vmem:[%s5193_s1 + $0x1f0] sm:$0xff] %v3700_v49  }
  0xb4   :  { %3703 = vst [vmem:[%s5193_s1 + $0x430] sm:$0xff] %v3702_v50  }
  0xb5   :  { %3705 = vst [vmem:[%s5193_s1 + $0x670] sm:$0xff] %v3704_v51  }
  0xb6   :  { %3707 = vst [vmem:[%s5193_s1 + $0xb0] sm:$0xff] %v3706_v52  }
  0xb7   :  { %3709 = vst [vmem:[%s5193_s1 + $0x2f0] sm:$0xff] %v3708_v53  }
  0xb8   :  { %3711 = vst [vmem:[%s5193_s1 + $0x530] sm:$0xff] %v3710_v54  }
  0xb9   :  { %3713 = vst [vmem:[%s5193_s1 + $0x170] sm:$0xff] %v3712_v55  }
  0xba   :  { %3715 = vst [vmem:[%s5193_s1 + $0x3b0] sm:$0xff] %v3714_v56  }
  0xbb   :  { %3717 = vst [vmem:[%s5193_s1 + $0x5f0] sm:$0xff] %v3716_v57  }
  0xbc   :  { %3719 = vst [vmem:[%s5193_s1 + $0x230] sm:$0xff] %v3718_v58  }
  0xbd   :  { %3721 = vst [vmem:[%s5193_s1 + $0x470] sm:$0xff] %v3720_v59  }
  0xbe   :  { %3723 = vst [vmem:[%s5193_s1 + $0x6b0] sm:$0xff] %v3722_v60  }
  0xbf   :  { %3779 = vst [vmem:[%s5193_s1 + $0x38] sm:$0xff] %v3778_v61  }
  0xc0   :  { %3781 = vst [vmem:[%s5193_s1 + $0x278] sm:$0xff] %v3780_v62  }
  0xc1   :  { %3783 = vst [vmem:[%s5193_s1 + $0x4b8] sm:$0xff] %v3782_v63  }
  0xc2   :  { %3785 = vst [vmem:[%s5193_s1 + $0xf8] sm:$0xff] %v3784_v0  }
  0xc3   :  { %3787 = vst [vmem:[%s5193_s1 + $0x338] sm:$0xff] %v3786_v1  }
  0xc4   :  { %3789 = vst [vmem:[%s5193_s1 + $0x578] sm:$0xff] %v3788_v2  }
  0xc5   :  { %3791 = vst [vmem:[%s5193_s1 + $0x1b8] sm:$0xff] %v3790_v3  }
  0xc6   :  { %3793 = vst [vmem:[%s5193_s1 + $0x3f8] sm:$0xff] %v3792_v4  }
  0xc7   :  { %3795 = vst [vmem:[%s5193_s1 + $0x638] sm:$0xff] %v3794_v5  }
  0xc8   :  { %3797 = vst [vmem:[%s5193_s1 + $0x78] sm:$0xff] %v3796_v6  }
  0xc9   :  { %3799 = vst [vmem:[%s5193_s1 + $0x2b8] sm:$0xff] %v3798_v7  }
  0xca   :  { %3801 = vst [vmem:[%s5193_s1 + $0x4f8] sm:$0xff] %v3800_v8  }
  0xcb   :  { %3803 = vst [vmem:[%s5193_s1 + $0x138] sm:$0xff] %v3802_v9  }
  0xcc   :  { %3805 = vst [vmem:[%s5193_s1 + $0x378] sm:$0xff] %v3804_v10  }
  0xcd   :  { %3807 = vst [vmem:[%s5193_s1 + $0x5b8] sm:$0xff] %v3806_v11  }
  0xce   :  { %3809 = vst [vmem:[%s5193_s1 + $0x1f8] sm:$0xff] %v3808_v12  }
  0xcf   :  { %3811 = vst [vmem:[%s5193_s1 + $0x438] sm:$0xff] %v3810_v13  }
  0xd0   :  { %3813 = vst [vmem:[%s5193_s1 + $0x678] sm:$0xff] %v3812_v14  }
  0xd1   :  { %3815 = vst [vmem:[%s5193_s1 + $0xb8] sm:$0xff] %v3814_v15  }
  0xd2   :  { %3817 = vst [vmem:[%s5193_s1 + $0x2f8] sm:$0xff] %v3816_v16  }
  0xd3   :  { %3819 = vst [vmem:[%s5193_s1 + $0x538] sm:$0xff] %v3818_v17  }
  0xd4   :  { %3821 = vst [vmem:[%s5193_s1 + $0x178] sm:$0xff] %v3820_v18  }
  0xd5   :  { %3823 = vst [vmem:[%s5193_s1 + $0x3b8] sm:$0xff] %v3822_v19  }
  0xd6   :  { %3825 = vst [vmem:[%s5193_s1 + $0x5f8] sm:$0xff] %v3824_v20  }
  0xd7   :  { %3827 = vst [vmem:[%s5193_s1 + $0x238] sm:$0xff] %v3826_v21  }
  0xd8   :  { %3829 = vst [vmem:[%s5193_s1 + $0x478] sm:$0xff] %v3828_v22  }
  0xd9   :  { %3831 = vst [vmem:[%s5193_s1 + $0x6b8] sm:$0xff] %v3830_v23  }

// kernel: resnet3d_forward.16
= control target key start
LH: loop header
LB: loop body
LE: loop exit
PB: predicated region body
PF: predicated region fallthrough
CT: control target
= control target key end

     0   :  { %vm57_vm0 = vcmask 523264   ;;  %s177_s1 = inlined_call_operand.vmem [shape: bf16[64,128], index: 1, kind: input, shape index: {}]   ;;  %s178_s2 = inlined_call_operand.vmem [shape: f32[1,128], index: 2, kind: input, shape index: {}]   ;;  %s179_s3 = inlined_call_operand.vmem [shape: f32[1,128], index: 3, kind: input, shape index: {}]   ;;  %s180_s0 = inlined_call_operand.vmem [shape: bf16[16,64], index: 0, kind: input, shape index: {}]   ;;  %s181_s4 = inlined_call_operand.vmem [shape: bf16[16,128], index: 4, kind: output, shape index: {}]  }
   0x1   :  { %v120_v0 = vld [vmem:[%s177_s1 + $0x18] sm:$0xff]  ;;  %v119_v1 = vld [vmem:[%s177_s1 + $0x10] sm:$0xff]  ;;  %v118_v2 = vld [vmem:[%s177_s1 + $0x8] sm:$0xff] }
   0x2   :  { %65 = vmatpush.bf16.msra.mxu0 %v120_v0  ;;  %v117_v3 = vld [vmem:[%s177_s1] sm:$0xff] }
   0x3   :  { %v116_v4 = vld [vmem:[%s180_s0] sm:$0xff] }
   0x4   :  { %v126_v6 = vld [vmem:[%s178_s2] ss:$0 sm:$0xff] }
   0x5   :  { %v127_v8 = vld [vmem:[%s179_s3] ss:$0 sm:$0xff] }
   0x6   :  { %66 = vmatpush.bf16.msra.mxu0 %v119_v1 }
   0xa   :  { %67 = vmatpush.bf16.msra.mxu0 %v118_v2 }
   0xe   :  { %68 = vmatpush.bf16.msra.mxu0 %v117_v3 }
  0x11   :  { %115 = vmatmul.msk.bf16.vlgmr.msra.gmra.mxu0 %vm57_vm0, %v116_v4 }
  0x8e   :  { %v70_v5 = vpop.f32.mrf.mxu0 }
  0x8f   :  { %v79_v7 = vmul.f32 %v126_v6, %v70_v5 }
  0x91   :  { %v85_v11 = vadd.f32 %v127_v8, %v79_v7 }
  0x96   :  { %v72_v9 = vpop.f32.mrf.mxu0 }
  0x97   :  { %v80_v10 = vmul.f32 %v126_v6, %v72_v9 }
  0x99   :  { %v86_v12 = vadd.f32 %v127_v8, %v80_v10 }
  0x9b   :  { %v124_v13 = vpack.c.bf16 %v86_v12, %v85_v11 }
  0x9d   :  { %125 = vst [vmem:[%s181_s4] sm:$0xff] %v124_v13  }

// kernel: resnet3d_forward.17
= control target key start
LH: loop header
LB: loop body
LE: loop exit
PB: predicated region body
PF: predicated region fallthrough
CT: control target
= control target key end

     0   :  { %s101_s0 = inlined_call_operand.vmem [shape: f32[16,128], index: 0, kind: input, shape index: {}]   ;;  %s102_s1 = inlined_call_operand.vmem [shape: f32[1,128], index: 1, kind: input, shape index: {}]   ;;  %s103_s2 = inlined_call_operand.vmem [shape: f32[1,128], index: 2, kind: input, shape index: {}]   ;;  %s104_s3 = inlined_call_operand.vmem [shape: bf16[16,128], index: 3, kind: input, shape index: {}]   ;;  %s105_s4 = inlined_call_operand.vmem [shape: bf16[16,128], index: 4, kind: output, shape index: {}]  }
   0x1   :  { %v17_v0 = vld [vmem:[%s101_s0] sm:$0xff]  ;;  %v18_v1 = vld [vmem:[%s101_s0 + $0x8] sm:$0xff] }
   0x2   :  { %v56_v2 = vld [vmem:[%s102_s1] ss:$0 sm:$0xff] }
   0x3   :  { %v57_v3 = vld [vmem:[%s103_s2] ss:$0 sm:$0xff]  ;;  %v23_v5 = vmul.f32 %v56_v2, %v17_v0  ;;  %v24_v6 = vmul.f32 %v56_v2, %v18_v1 }
   0x4   :  { %v48_v4 = vld [vmem:[%s104_s3] sm:$0xff]  }
   0x5   :  { %v49_v7 = vunpack.c.l.bf16 %v48_v4  ;;  %v50_v8 = vunpack.c.h.bf16 %v48_v4  ;;  %v29_v9 = vadd.f32 %v57_v3, %v23_v5  ;;  %v30_v10 = vadd.f32 %v57_v3, %v24_v6 }
   0x7   :  { %v35_v11 = vadd.f32 %v49_v7, %v29_v9  ;;  %v36_v12 = vadd.f32 %v50_v8, %v30_v10 }
   0x9   :  { %v37_v13 = vmax.f32 %v35_v11, 0.0  ;;  %v38_v14 = vmax.f32 %v36_v12, 0.0 }
   0xb   :  { %v54_v15 = vpack.c.bf16 %v38_v14, %v37_v13 }
   0xd   :  { %55 = vst [vmem:[%s105_s4] sm:$0xff] %v54_v15  }

// kernel: reverse.1
= control target key start
LH: loop header
LB: loop body
LE: loop exit
PB: predicated region body
PF: predicated region fallthrough
CT: control target
= control target key end

     0   :  { %s12105_s0 = inlined_call_operand.vmem [shape: bf16[3,3,3,128,256], index: 0, kind: input, shape index: {}]   ;;  %s12106_s1 = inlined_call_operand.vmem [shape: bf16[3,3,3,128,256], index: 1, kind: output, shape index: {}]  }
   0x1   :  { %v9071_v0 = vld [vmem:[%s12105_s0 + $0xd00] sm:$0xff]  ;;  %v9098_v27 = vld [vmem:[%s12105_s0 + $0xd08] sm:$0xff]  ;;  %v9125_v54 = vld [vmem:[%s12105_s0 + $0xd10] sm:$0xff] }
   0x2   :  { %v9072_v1 = vld [vmem:[%s12105_s0 + $0x880] sm:$0xff]  ;;  %6484 = vst [vmem:[%s12106_s1] sm:$0xff] %v9071_v0  ;;  %v9099_v28 = vld [vmem:[%s12105_s0 + $0x888] sm:$0xff]  ;;  %v9126_v55 = vld [vmem:[%s12105_s0 + $0x890] sm:$0xff] }
   0x3   :  { %v9073_v2 = vld [vmem:[%s12105_s0 + $0x400] sm:$0xff]  ;;  %6490 = vst [vmem:[%s12106_s1 + $0x480] sm:$0xff] %v9072_v1  ;;  %v9100_v29 = vld [vmem:[%s12105_s0 + $0x408] sm:$0xff]  ;;  %v9127_v56 = vld [vmem:[%s12105_s0 + $0x410] sm:$0xff] }
   0x4   :  { %v9074_v3 = vld [vmem:[%s12105_s0 + $0xb80] sm:$0xff]  ;;  %6496 = vst [vmem:[%s12106_s1 + $0x900] sm:$0xff] %v9073_v2  ;;  %v9101_v30 = vld [vmem:[%s12105_s0 + $0xb88] sm:$0xff]  ;;  %v9128_v57 = vld [vmem:[%s12105_s0 + $0xb90] sm:$0xff] }
   0x5   :  { %v9075_v4 = vld [vmem:[%s12105_s0 + $0x700] sm:$0xff]  ;;  %6502 = vst [vmem:[%s12106_s1 + $0x180] sm:$0xff] %v9074_v3  ;;  %v9102_v31 = vld [vmem:[%s12105_s0 + $0x708] sm:$0xff]  ;;  %v9129_v58 = vld [vmem:[%s12105_s0 + $0x710] sm:$0xff] }
   0x6   :  { %v9076_v5 = vld [vmem:[%s12105_s0 + $0x280] sm:$0xff]  ;;  %6508 = vst [vmem:[%s12106_s1 + $0x600] sm:$0xff] %v9075_v4  ;;  %v9103_v32 = vld [vmem:[%s12105_s0 + $0x288] sm:$0xff]  ;;  %v9130_v59 = vld [vmem:[%s12105_s0 + $0x290] sm:$0xff] }
   0x7   :  { %v9077_v6 = vld [vmem:[%s12105_s0 + $0xa00] sm:$0xff]  ;;  %6514 = vst [vmem:[%s12106_s1 + $0xa80] sm:$0xff] %v9076_v5  ;;  %v9104_v33 = vld [vmem:[%s12105_s0 + $0xa08] sm:$0xff]  ;;  %v9131_v60 = vld [vmem:[%s12105_s0 + $0xa10] sm:$0xff] }
   0x8   :  { %v9078_v7 = vld [vmem:[%s12105_s0 + $0x580] sm:$0xff]  ;;  %6520 = vst [vmem:[%s12106_s1 + $0x300] sm:$0xff] %v9077_v6  ;;  %v9105_v34 = vld [vmem:[%s12105_s0 + $0x588] sm:$0xff]  ;;  %v9132_v61 = vld [vmem:[%s12105_s0 + $0x590] sm:$0xff] }
   0x9   :  { %v9079_v8 = vld [vmem:[%s12105_s0 + $0x100] sm:$0xff]  ;;  %6526 = vst [vmem:[%s12106_s1 + $0x780] sm:$0xff] %v9078_v7  ;;  %v9106_v35 = vld [vmem:[%s12105_s0 + $0x108] sm:$0xff]  ;;  %v9133_v62 = vld [vmem:[%s12105_s0 + $0x110] sm:$0xff] }
   0xa   :  { %v9080_v9 = vld [vmem:[%s12105_s0 + $0xc80] sm:$0xff]  ;;  %6532 = vst [vmem:[%s12106_s1 + $0xc00] sm:$0xff] %v9079_v8  ;;  %v9107_v36 = vld [vmem:[%s12105_s0 + $0xc88] sm:$0xff]  ;;  %v9134_v63 = vld [vmem:[%s12105_s0 + $0xc90] sm:$0xff] }
   0xb   :  { %v9081_v10 = vld [vmem:[%s12105_s0 + $0x800] sm:$0xff]  ;;  %6538 = vst [vmem:[%s12106_s1 + $0x80] sm:$0xff] %v9080_v9  ;;  %v9108_v37 = vld [vmem:[%s12105_s0 + $0x808] sm:$0xff]  ;;  %v9135_v0 = vld [vmem:[%s12105_s0 + $0x810] sm:$0xff] }
   0xc   :  { %v9082_v11 = vld [vmem:[%s12105_s0 + $0x380] sm:$0xff]  ;;  %6544 = vst [vmem:[%s12106_s1 + $0x500] sm:$0xff] %v9081_v10  ;;  %v9109_v38 = vld [vmem:[%s12105_s0 + $0x388] sm:$0xff]  ;;  %v9136_v1 = vld [vmem:[%s12105_s0 + $0x390] sm:$0xff] }
   0xd   :  { %v9083_v12 = vld [vmem:[%s12105_s0 + $0xb00] sm:$0xff]  ;;  %6550 = vst [vmem:[%s12106_s1 + $0x980] sm:$0xff] %v9082_v11  ;;  %v9110_v39 = vld [vmem:[%s12105_s0 + $0xb08] sm:$0xff]  ;;  %v9137_v2 = vld [vmem:[%s12105_s0 + $0xb10] sm:$0xff] }
   0xe   :  { %v9084_v13 = vld [vmem:[%s12105_s0 + $0x680] sm:$0xff]  ;;  %6556 = vst [vmem:[%s12106_s1 + $0x200] sm:$0xff] %v9083_v12  ;;  %v9111_v40 = vld [vmem:[%s12105_s0 + $0x688] sm:$0xff]  ;;  %v9138_v3 = vld [vmem:[%s12105_s0 + $0x690] sm:$0xff] }
   0xf   :  { %v9085_v14 = vld [vmem:[%s12105_s0 + $0x200] sm:$0xff]  ;;  %6562 = vst [vmem:[%s12106_s1 + $0x680] sm:$0xff] %v9084_v13  ;;  %v9112_v41 = vld [vmem:[%s12105_s0 + $0x208] sm:$0xff]  ;;  %v9139_v4 = vld [vmem:[%s12105_s0 + $0x210] sm:$0xff] }
  0x10   :  { %v9086_v15 = vld [vmem:[%s12105_s0 + $0x980] sm:$0xff]  ;;  %6568 = vst [vmem:[%s12106_s1 + $0xb00] sm:$0xff] %v9085_v14  ;;  %v9113_v42 = vld [vmem:[%s12105_s0 + $0x988] sm:$0xff]  ;;  %v9140_v5 = vld [vmem:[%s12105_s0 + $0x990] sm:$0xff] }
  0x11   :  { %v9087_v16 = vld [vmem:[%s12105_s0 + $0x500] sm:$0xff]  ;;  %6574 = vst [vmem:[%s12106_s1 + $0x380] sm:$0xff] %v9086_v15  ;;  %v9114_v43 = vld [vmem:[%s12105_s0 + $0x508] sm:$0xff]  ;;  %v9141_v6 = vld [vmem:[%s12105_s0 + $0x510] sm:$0xff] }
  0x12   :  { %v9088_v17 = vld [vmem:[%s12105_s0 + $0x80] sm:$0xff]  ;;  %6580 = vst [vmem:[%s12106_s1 + $0x800] sm:$0xff] %v9087_v16  ;;  %v9115_v44 = vld [vmem:[%s12105_s0 + $0x88] sm:$0xff]  ;;  %v9142_v7 = vld [vmem:[%s12105_s0 + $0x90] sm:$0xff] }
  0x13   :  { %v9089_v18 = vld [vmem:[%s12105_s0 + $0xc00] sm:$0xff]  ;;  %6586 = vst [vmem:[%s12106_s1 + $0xc80] sm:$0xff] %v9088_v17  ;;  %v9116_v45 = vld [vmem:[%s12105_s0 + $0xc08] sm:$0xff]  ;;  %v9143_v8 = vld [vmem:[%s12105_s0 + $0xc10] sm:$0xff] }
  0x14   :  { %v9090_v19 = vld [vmem:[%s12105_s0 + $0x780] sm:$0xff]  ;;  %6592 = vst [vmem:[%s12106_s1 + $0x100] sm:$0xff] %v9089_v18  ;;  %v9117_v46 = vld [vmem:[%s12105_s0 + $0x788] sm:$0xff]  ;;  %v9144_v9 = vld [vmem:[%s12105_s0 + $0x790] sm:$0xff] }
  0x15   :  { %v9091_v20 = vld [vmem:[%s12105_s0 + $0x300] sm:$0xff]  ;;  %6598 = vst [vmem:[%s12106_s1 + $0x580] sm:$0xff] %v9090_v19  ;;  %v9118_v47 = vld [vmem:[%s12105_s0 + $0x308] sm:$0xff]  ;;  %v9145_v10 = vld [vmem:[%s12105_s0 + $0x310] sm:$0xff] }
  0x16   :  { %v9092_v21 = vld [vmem:[%s12105_s0 + $0xa80] sm:$0xff]  ;;  %6604 = vst [vmem:[%s12106_s1 + $0xa00] sm:$0xff] %v9091_v20  ;;  %v9119_v48 = vld [vmem:[%s12105_s0 + $0xa88] sm:$0xff]  ;;  %v9146_v11 = vld [vmem:[%s12105_s0 + $0xa90] sm:$0xff] }
  0x17   :  { %v9093_v22 = vld [vmem:[%s12105_s0 + $0x600] sm:$0xff]  ;;  %6610 = vst [vmem:[%s12106_s1 + $0x280] sm:$0xff] %v9092_v21  ;;  %v9120_v49 = vld [vmem:[%s12105_s0 + $0x608] sm:$0xff]  ;;  %v9147_v12 = vld [vmem:[%s12105_s0 + $0x610] sm:$0xff] }
  0x18   :  { %v9094_v23 = vld [vmem:[%s12105_s0 + $0x180] sm:$0xff]  ;;  %6616 = vst [vmem:[%s12106_s1 + $0x700] sm:$0xff] %v9093_v22  ;;  %v9121_v50 = vld [vmem:[%s12105_s0 + $0x188] sm:$0xff]  ;;  %v9148_v13 = vld [vmem:[%s12105_s0 + $0x190] sm:$0xff] }
  0x19   :  { %v9095_v24 = vld [vmem:[%s12105_s0 + $0x900] sm:$0xff]  ;;  %6622 = vst [vmem:[%s12106_s1 + $0xb80] sm:$0xff] %v9094_v23  ;;  %v9122_v51 = vld [vmem:[%s12105_s0 + $0x908] sm:$0xff]  ;;  %v9149_v14 = vld [vmem:[%s12105_s0 + $0x910] sm:$0xff] }
  0x1a   :  { %v9096_v25 = vld [vmem:[%s12105_s0 + $0x480] sm:$0xff]  ;;  %6628 = vst [vmem:[%s12106_s1 + $0x400] sm:$0xff] %v9095_v24  ;;  %v9123_v52 = vld [vmem:[%s12105_s0 + $0x488] sm:$0xff]  ;;  %v9150_v15 = vld [vmem:[%s12105_s0 + $0x490] sm:$0xff] }
  0x1b   :  { %v9097_v26 = vld [vmem:[%s12105_s0] sm:$0xff]  ;;  %6634 = vst [vmem:[%s12106_s1 + $0x880] sm:$0xff] %v9096_v25  ;;  %v9124_v53 = vld [vmem:[%s12105_s0 + $0x8] sm:$0xff]  ;;  %v9151_v16 = vld [vmem:[%s12105_s0 + $0x10] sm:$0xff] }
  0x1c   :  { %6640 = vst [vmem:[%s12106_s1 + $0xd00] sm:$0xff] %v9097_v26  ;;  %v9152_v17 = vld [vmem:[%s12105_s0 + $0xd18] sm:$0xff] }
  0x1d   :  { %6646 = vst [vmem:[%s12106_s1 + $0x8] sm:$0xff] %v9098_v27  ;;  %v9153_v18 = vld [vmem:[%s12105_s0 + $0x898] sm:$0xff] }
  0x1e   :  { %6652 = vst [vmem:[%s12106_s1 + $0x488] sm:$0xff] %v9099_v28  ;;  %v9154_v19 = vld [vmem:[%s12105_s0 + $0x418] sm:$0xff] }
  0x1f   :  { %6658 = vst [vmem:[%s12106_s1 + $0x908] sm:$0xff] %v9100_v29  ;;  %v9155_v20 = vld [vmem:[%s12105_s0 + $0xb98] sm:$0xff] }
  0x20   :  { %6664 = vst [vmem:[%s12106_s1 + $0x188] sm:$0xff] %v9101_v30  ;;  %v9156_v21 = vld [vmem:[%s12105_s0 + $0x718] sm:$0xff] }
  0x21   :  { %6670 = vst [vmem:[%s12106_s1 + $0x608] sm:$0xff] %v9102_v31  ;;  %v9157_v22 = vld [vmem:[%s12105_s0 + $0x298] sm:$0xff] }
  0x22   :  { %6676 = vst [vmem:[%s12106_s1 + $0xa88] sm:$0xff] %v9103_v32  ;;  %v9158_v23 = vld [vmem:[%s12105_s0 + $0xa18] sm:$0xff] }
  0x23   :  { %6682 = vst [vmem:[%s12106_s1 + $0x308] sm:$0xff] %v9104_v33  ;;  %v9159_v24 = vld [vmem:[%s12105_s0 + $0x598] sm:$0xff] }
  0x24   :  { %6688 = vst [vmem:[%s12106_s1 + $0x788] sm:$0xff] %v9105_v34  ;;  %v9160_v25 = vld [vmem:[%s12105_s0 + $0x118] sm:$0xff] }
  0x25   :  { %6694 = vst [vmem:[%s12106_s1 + $0xc08] sm:$0xff] %v9106_v35  ;;  %v9161_v26 = vld [vmem:[%s12105_s0 + $0xc98] sm:$0xff] }
  0x26   :  { %6700 = vst [vmem:[%s12106_s1 + $0x88] sm:$0xff] %v9107_v36  ;;  %v9162_v27 = vld [vmem:[%s12105_s0 + $0x818] sm:$0xff] }
  0x27   :  { %6706 = vst [vmem:[%s12106_s1 + $0x508] sm:$0xff] %v9108_v37  ;;  %v9163_v28 = vld [vmem:[%s12105_s0 + $0x398] sm:$0xff] }
  0x28   :  { %6712 = vst [vmem:[%s12106_s1 + $0x988] sm:$0xff] %v9109_v38  ;;  %v9164_v29 = vld [vmem:[%s12105_s0 + $0xb18] sm:$0xff] }
  0x29   :  { %6718 = vst [vmem:[%s12106_s1 + $0x208] sm:$0xff] %v9110_v39  ;;  %v9165_v30 = vld [vmem:[%s12105_s0 + $0x698] sm:$0xff] }
  0x2a   :  { %6724 = vst [vmem:[%s12106_s1 + $0x688] sm:$0xff] %v9111_v40  ;;  %v9166_v31 = vld [vmem:[%s12105_s0 + $0x218] sm:$0xff] }
  0x2b   :  { %6730 = vst [vmem:[%s12106_s1 + $0xb08] sm:$0xff] %v9112_v41  ;;  %v9167_v32 = vld [vmem:[%s12105_s0 + $0x998] sm:$0xff] }
  0x2c   :  { %6736 = vst [vmem:[%s12106_s1 + $0x388] sm:$0xff] %v9113_v42  ;;  %v9168_v33 = vld [vmem:[%s12105_s0 + $0x518] sm:$0xff] }
  0x2d   :  { %6742 = vst [vmem:[%s12106_s1 + $0x808] sm:$0xff] %v9114_v43  ;;  %v9169_v34 = vld [vmem:[%s12105_s0 + $0x98] sm:$0xff] }
  0x2e   :  { %6748 = vst [vmem:[%s12106_s1 + $0xc88] sm:$0xff] %v9115_v44  ;;  %v9170_v35 = vld [vmem:[%s12105_s0 + $0xc18] sm:$0xff]  ;;  %v9179_v44 = vld [vmem:[%s12105_s0 + $0xd20] sm:$0xff] }
  0x2f   :  { %6754 = vst [vmem:[%s12106_s1 + $0x108] sm:$0xff] %v9116_v45  ;;  %v9171_v36 = vld [vmem:[%s12105_s0 + $0x798] sm:$0xff]  ;;  %v9180_v45 = vld [vmem:[%s12105_s0 + $0x8a0] sm:$0xff] }
  0x30   :  { %6760 = vst [vmem:[%s12106_s1 + $0x588] sm:$0xff] %v9117_v46  ;;  %v9172_v37 = vld [vmem:[%s12105_s0 + $0x318] sm:$0xff]  ;;  %v9181_v46 = vld [vmem:[%s12105_s0 + $0x420] sm:$0xff] }
  0x31   :  { %6766 = vst [vmem:[%s12106_s1 + $0xa08] sm:$0xff] %v9118_v47  ;;  %v9173_v38 = vld [vmem:[%s12105_s0 + $0xa98] sm:$0xff]  ;;  %v9182_v47 = vld [vmem:[%s12105_s0 + $0xba0] sm:$0xff] }
  0x32   :  { %6772 = vst [vmem:[%s12106_s1 + $0x288] sm:$0xff] %v9119_v48  ;;  %v9174_v39 = vld [vmem:[%s12105_s0 + $0x618] sm:$0xff]  ;;  %v9183_v48 = vld [vmem:[%s12105_s0 + $0x720] sm:$0xff] }
  0x33   :  { %6778 = vst [vmem:[%s12106_s1 + $0x708] sm:$0xff] %v9120_v49  ;;  %v9175_v40 = vld [vmem:[%s12105_s0 + $0x198] sm:$0xff]  ;;  %v9184_v49 = vld [vmem:[%s12105_s0 + $0x2a0] sm:$0xff] }
  0x34   :  { %6784 = vst [vmem:[%s12106_s1 + $0xb88] sm:$0xff] %v9121_v50  ;;  %v9176_v41 = vld [vmem:[%s12105_s0 + $0x918] sm:$0xff]  ;;  %v9185_v50 = vld [vmem:[%s12105_s0 + $0xa20] sm:$0xff] }
  0x35   :  { %6790 = vst [vmem:[%s12106_s1 + $0x408] sm:$0xff] %v9122_v51  ;;  %v9177_v42 = vld [vmem:[%s12105_s0 + $0x498] sm:$0xff]  ;;  %v9186_v51 = vld [vmem:[%s12105_s0 + $0x5a0] sm:$0xff] }
  0x36   :  { %6796 = vst [vmem:[%s12106_s1 + $0x888] sm:$0xff] %v9123_v52  ;;  %v9178_v43 = vld [vmem:[%s12105_s0 + $0x18] sm:$0xff]  ;;  %v9187_v52 = vld [vmem:[%s12105_s0 + $0x120] sm:$0xff] }
  0x37   :  { %6802 = vst [vmem:[%s12106_s1 + $0xd08] sm:$0xff] %v9124_v53  ;;  %v9188_v53 = vld [vmem:[%s12105_s0 + $0xca0] sm:$0xff] }
  0x38   :  { %6808 = vst [vmem:[%s12106_s1 + $0x10] sm:$0xff] %v9125_v54  ;;  %v9189_v54 = vld [vmem:[%s12105_s0 + $0x820] sm:$0xff] }
  0x39   :  { %6814 = vst [vmem:[%s12106_s1 + $0x490] sm:$0xff] %v9126_v55  ;;  %v9190_v55 = vld [vmem:[%s12105_s0 + $0x3a0] sm:$0xff] }
  0x3a   :  { %6820 = vst [vmem:[%s12106_s1 + $0x910] sm:$0xff] %v9127_v56  ;;  %v9191_v56 = vld [vmem:[%s12105_s0 + $0xb20] sm:$0xff] }
  0x3b   :  { %6826 = vst [vmem:[%s12106_s1 + $0x190] sm:$0xff] %v9128_v57  ;;  %v9192_v57 = vld [vmem:[%s12105_s0 + $0x6a0] sm:$0xff] }
  0x3c   :  { %6832 = vst [vmem:[%s12106_s1 + $0x610] sm:$0xff] %v9129_v58  ;;  %v9193_v58 = vld [vmem:[%s12105_s0 + $0x220] sm:$0xff] }
  0x3d   :  { %6838 = vst [vmem:[%s12106_s1 + $0xa90] sm:$0xff] %v9130_v59  ;;  %v9194_v59 = vld [vmem:[%s12105_s0 + $0x9a0] sm:$0xff] }
  0x3e   :  { %6844 = vst [vmem:[%s12106_s1 + $0x310] sm:$0xff] %v9131_v60  ;;  %v9195_v60 = vld [vmem:[%s12105_s0 + $0x520] sm:$0xff] }
  0x3f   :  { %6850 = vst [vmem:[%s12106_s1 + $0x790] sm:$0xff] %v9132_v61  ;;  %v9196_v61 = vld [vmem:[%s12105_s0 + $0xa0] sm:$0xff] }
  0x40   :  { %6856 = vst [vmem:[%s12106_s1 + $0xc10] sm:$0xff] %v9133_v62  ;;  %v9197_v62 = vld [vmem:[%s12105_s0 + $0xc20] sm:$0xff] }
  0x41   :  { %6862 = vst [vmem:[%s12106_s1 + $0x90] sm:$0xff] %v9134_v63  ;;  %v9198_v63 = vld [vmem:[%s12105_s0 + $0x7a0] sm:$0xff] }
  0x42   :  { %6868 = vst [vmem:[%s12106_s1 + $0x510] sm:$0xff] %v9135_v0  ;;  %v9199_v0 = vld [vmem:[%s12105_s0 + $0x320] sm:$0xff] }
  0x43   :  { %6874 = vst [vmem:[%s12106_s1 + $0x990] sm:$0xff] %v9136_v1  ;;  %v9200_v1 = vld [vmem:[%s12105_s0 + $0xaa0] sm:$0xff] }
  0x44   :  { %6880 = vst [vmem:[%s12106_s1 + $0x210] sm:$0xff] %v9137_v2  ;;  %v9201_v2 = vld [vmem:[%s12105_s0 + $0x620] sm:$0xff] }
  0x45   :  { %6886 = vst [vmem:[%s12106_s1 + $0x690] sm:$0xff] %v9138_v3  ;;  %v9202_v3 = vld [vmem:[%s12105_s0 + $0x1a0] sm:$0xff] }
  0x46   :  { %6892 = vst [vmem:[%s12106_s1 + $0xb10] sm:$0xff] %v9139_v4  ;;  %v9203_v4 = vld [vmem:[%s12105_s0 + $0x920] sm:$0xff] }
  0x47   :  { %6898 = vst [vmem:[%s12106_s1 + $0x390] sm:$0xff] %v9140_v5  ;;  %v9204_v5 = vld [vmem:[%s12105_s0 + $0x4a0] sm:$0xff] }
  0x48   :  { %6904 = vst [vmem:[%s12106_s1 + $0x810] sm:$0xff] %v9141_v6  ;;  %v9205_v6 = vld [vmem:[%s12105_s0 + $0x20] sm:$0xff] }
  0x49   :  { %6910 = vst [vmem:[%s12106_s1 + $0xc90] sm:$0xff] %v9142_v7  ;;  %v9206_v7 = vld [vmem:[%s12105_s0 + $0xd28] sm:$0xff] }
  0x4a   :  { %6916 = vst [vmem:[%s12106_s1 + $0x110] sm:$0xff] %v9143_v8  ;;  %v9207_v8 = vld [vmem:[%s12105_s0 + $0x8a8] sm:$0xff] }
  0x4b   :  { %6922 = vst [vmem:[%s12106_s1 + $0x590] sm:$0xff] %v9144_v9  ;;  %v9208_v9 = vld [vmem:[%s12105_s0 + $0x428] sm:$0xff] }
  0x4c   :  { %6928 = vst [vmem:[%s12106_s1 + $0xa10] sm:$0xff] %v9145_v10  ;;  %v9209_v10 = vld [vmem:[%s12105_s0 + $0xba8] sm:$0xff] }
  0x4d   :  { %6934 = vst [vmem:[%s12106_s1 + $0x290] sm:$0xff] %v9146_v11  ;;  %v9210_v11 = vld [vmem:[%s12105_s0 + $0x728] sm:$0xff] }
  0x4e   :  { %6940 = vst [vmem:[%s12106_s1 + $0x710] sm:$0xff] %v9147_v12  ;;  %v9211_v12 = vld [vmem:[%s12105_s0 + $0x2a8] sm:$0xff] }
  0x4f   :  { %6946 = vst [vmem:[%s12106_s1 + $0xb90] sm:$0xff] %v9148_v13  ;;  %v9212_v13 = vld [vmem:[%s12105_s0 + $0xa28] sm:$0xff] }
  0x50   :  { %6952 = vst [vmem:[%s12106_s1 + $0x410] sm:$0xff] %v9149_v14  ;;  %v9213_v14 = vld [vmem:[%s12105_s0 + $0x5a8] sm:$0xff] }
  0x51   :  { %6958 = vst [vmem:[%s12106_s1 + $0x890] sm:$0xff] %v9150_v15  ;;  %v9214_v15 = vld [vmem:[%s12105_s0 + $0x128] sm:$0xff] }
  0x52   :  { %6964 = vst [vmem:[%s12106_s1 + $0xd10] sm:$0xff] %v9151_v16  ;;  %v9215_v16 = vld [vmem:[%s12105_s0 + $0xca8] sm:$0xff] }
  0x53   :  { %6970 = vst [vmem:[%s12106_s1 + $0x18] sm:$0xff] %v9152_v17  ;;  %v9216_v17 = vld [vmem:[%s12105_s0 + $0x828] sm:$0xff] }
  0x54   :  { %6976 = vst [vmem:[%s12106_s1 + $0x498] sm:$0xff] %v9153_v18  ;;  %v9217_v18 = vld [vmem:[%s12105_s0 + $0x3a8] sm:$0xff] }
  0x55   :  { %6982 = vst [vmem:[%s12106_s1 + $0x918] sm:$0xff] %v9154_v19  ;;  %v9218_v19 = vld [vmem:[%s12105_s0 + $0xb28] sm:$0xff] }
  0x56   :  { %6988 = vst [vmem:[%s12106_s1 + $0x198] sm:$0xff] %v9155_v20  ;;  %v9219_v20 = vld [vmem:[%s12105_s0 + $0x6a8] sm:$0xff] }
  0x57   :  { %6994 = vst [vmem:[%s12106_s1 + $0x618] sm:$0xff] %v9156_v21  ;;  %v9220_v21 = vld [vmem:[%s12105_s0 + $0x228] sm:$0xff] }
  0x58   :  { %7000 = vst [vmem:[%s12106_s1 + $0xa98] sm:$0xff] %v9157_v22  ;;  %v9221_v22 = vld [vmem:[%s12105_s0 + $0x9a8] sm:$0xff] }
  0x59   :  { %7006 = vst [vmem:[%s12106_s1 + $0x318] sm:$0xff] %v9158_v23  ;;  %v9222_v23 = vld [vmem:[%s12105_s0 + $0x528] sm:$0xff] }
  0x5a   :  { %7012 = vst [vmem:[%s12106_s1 + $0x798] sm:$0xff] %v9159_v24  ;;  %v9223_v24 = vld [vmem:[%s12105_s0 + $0xa8] sm:$0xff] }
  0x5b   :  { %7018 = vst [vmem:[%s12106_s1 + $0xc18] sm:$0xff] %v9160_v25  ;;  %v9224_v25 = vld [vmem:[%s12105_s0 + $0xc28] sm:$0xff] }
  0x5c   :  { %7024 = vst [vmem:[%s12106_s1 + $0x98] sm:$0xff] %v9161_v26  ;;  %v9225_v26 = vld [vmem:[%s12105_s0 + $0x7a8] sm:$0xff] }
  0x5d   :  { %7030 = vst [vmem:[%s12106_s1 + $0x518] sm:$0xff] %v9162_v27  ;;  %v9226_v27 = vld [vmem:[%s12105_s0 + $0x328] sm:$0xff] }
  0x5e   :  { %7036 = vst [vmem:[%s12106_s1 + $0x998] sm:$0xff] %v9163_v28  ;;  %v9227_v28 = vld [vmem:[%s12105_s0 + $0xaa8] sm:$0xff] }
  0x5f   :  { %7042 = vst [vmem:[%s12106_s1 + $0x218] sm:$0xff] %v9164_v29  ;;  %v9228_v29 = vld [vmem:[%s12105_s0 + $0x628] sm:$0xff] }
  0x60   :  { %7048 = vst [vmem:[%s12106_s1 + $0x698] sm:$0xff] %v9165_v30  ;;  %v9229_v30 = vld [vmem:[%s12105_s0 + $0x1a8] sm:$0xff] }
  0x61   :  { %7054 = vst [vmem:[%s12106_s1 + $0xb18] sm:$0xff] %v9166_v31  ;;  %v9230_v31 = vld [vmem:[%s12105_s0 + $0x928] sm:$0xff] }
  0x62   :  { %7060 = vst [vmem:[%s12106_s1 + $0x398] sm:$0xff] %v9167_v32  ;;  %v9231_v32 = vld [vmem:[%s12105_s0 + $0x4a8] sm:$0xff] }
  0x63   :  { %7066 = vst [vmem:[%s12106_s1 + $0x818] sm:$0xff] %v9168_v33  ;;  %v9232_v33 = vld [vmem:[%s12105_s0 + $0x28] sm:$0xff] }
  0x64   :  { %7072 = vst [vmem:[%s12106_s1 + $0xc98] sm:$0xff] %v9169_v34  ;;  %v9233_v34 = vld [vmem:[%s12105_s0 + $0xd30] sm:$0xff] }
  0x65   :  { %7078 = vst [vmem:[%s12106_s1 + $0x118] sm:$0xff] %v9170_v35  ;;  %v9234_v35 = vld [vmem:[%s12105_s0 + $0x8b0] sm:$0xff] }
  0x66   :  { %7084 = vst [vmem:[%s12106_s1 + $0x598] sm:$0xff] %v9171_v36  ;;  %v9235_v36 = vld [vmem:[%s12105_s0 + $0x430] sm:$0xff] }
  0x67   :  { %7090 = vst [vmem:[%s12106_s1 + $0xa18] sm:$0xff] %v9172_v37  ;;  %v9236_v37 = vld [vmem:[%s12105_s0 + $0xbb0] sm:$0xff] }
  0x68   :  { %7096 = vst [vmem:[%s12106_s1 + $0x298] sm:$0xff] %v9173_v38  ;;  %v9237_v38 = vld [vmem:[%s12105_s0 + $0x730] sm:$0xff] }
  0x69   :  { %7102 = vst [vmem:[%s12106_s1 + $0x718] sm:$0xff] %v9174_v39  ;;  %v9238_v39 = vld [vmem:[%s12105_s0 + $0x2b0] sm:$0xff] }
  0x6a   :  { %7108 = vst [vmem:[%s12106_s1 + $0xb98] sm:$0xff] %v9175_v40  ;;  %v9239_v40 = vld [vmem:[%s12105_s0 + $0xa30] sm:$0xff] }
  0x6b   :  { %7114 = vst [vmem:[%s12106_s1 + $0x418] sm:$0xff] %v9176_v41  ;;  %v9240_v41 = vld [vmem:[%s12105_s0 + $0x5b0] sm:$0xff] }
  0x6c   :  { %7120 = vst [vmem:[%s12106_s1 + $0x898] sm:$0xff] %v9177_v42  ;;  %v9241_v42 = vld [vmem:[%s12105_s0 + $0x130] sm:$0xff] }
  0x6d   :  { %7126 = vst [vmem:[%s12106_s1 + $0xd18] sm:$0xff] %v9178_v43  ;;  %v9242_v43 = vld [vmem:[%s12105_s0 + $0xcb0] sm:$0xff] }
  0x6e   :  { %7132 = vst [vmem:[%s12106_s1 + $0x20] sm:$0xff] %v9179_v44  ;;  %v9243_v44 = vld [vmem:[%s12105_s0 + $0x830] sm:$0xff] }
  0x6f   :  { %7138 = vst [vmem:[%s12106_s1 + $0x4a0] sm:$0xff] %v9180_v45  ;;  %v9244_v45 = vld [vmem:[%s12105_s0 + $0x3b0] sm:$0xff] }
  0x70   :  { %7144 = vst [vmem:[%s12106_s1 + $0x920] sm:$0xff] %v9181_v46  ;;  %v9245_v46 = vld [vmem:[%s12105_s0 + $0xb30] sm:$0xff] }
  0x71   :  { %7150 = vst [vmem:[%s12106_s1 + $0x1a0] sm:$0xff] %v9182_v47  ;;  %v9246_v47 = vld [vmem:[%s12105_s0 + $0x6b0] sm:$0xff] }
  0x72   :  { %7156 = vst [vmem:[%s12106_s1 + $0x620] sm:$0xff] %v9183_v48  ;;  %v9247_v48 = vld [vmem:[%s12105_s0 + $0x230] sm:$0xff] }
  0x73   :  { %7162 = vst [vmem:[%s12106_s1 + $0xaa0] sm:$0xff] %v9184_v49  ;;  %v9248_v49 = vld [vmem:[%s12105_s0 + $0x9b0] sm:$0xff] }
  0x74   :  { %7168 = vst [vmem:[%s12106_s1 + $0x320] sm:$0xff] %v9185_v50  ;;  %v9249_v50 = vld [vmem:[%s12105_s0 + $0x530] sm:$0xff] }
  0x75   :  { %7174 = vst [vmem:[%s12106_s1 + $0x7a0] sm:$0xff] %v9186_v51  ;;  %v9250_v51 = vld [vmem:[%s12105_s0 + $0xb0] sm:$0xff] }
  0x76   :  { %7180 = vst [vmem:[%s12106_s1 + $0xc20] sm:$0xff] %v9187_v52  ;;  %v9251_v52 = vld [vmem:[%s12105_s0 + $0xc30] sm:$0xff] }
  0x77   :  { %7186 = vst [vmem:[%s12106_s1 + $0xa0] sm:$0xff] %v9188_v53  ;;  %v9252_v53 = vld [vmem:[%s12105_s0 + $0x7b0] sm:$0xff] }
  0x78   :  { %7192 = vst [vmem:[%s12106_s1 + $0x520] sm:$0xff] %v9189_v54  ;;  %v9253_v54 = vld [vmem:[%s12105_s0 + $0x330] sm:$0xff] }
  0x79   :  { %7198 = vst [vmem:[%s12106_s1 + $0x9a0] sm:$0xff] %v9190_v55  ;;  %v9254_v55 = vld [vmem:[%s12105_s0 + $0xab0] sm:$0xff] }
  0x7a   :  { %7204 = vst [vmem:[%s12106_s1 + $0x220] sm:$0xff] %v9191_v56  ;;  %v9255_v56 = vld [vmem:[%s12105_s0 + $0x630] sm:$0xff] }
  0x7b   :  { %7210 = vst [vmem:[%s12106_s1 + $0x6a0] sm:$0xff] %v9192_v57  ;;  %v9256_v57 = vld [vmem:[%s12105_s0 + $0x1b0] sm:$0xff] }
  0x7c   :  { %7216 = vst [vmem:[%s12106_s1 + $0xb20] sm:$0xff] %v9193_v58  ;;  %v9257_v58 = vld [vmem:[%s12105_s0 + $0x930] sm:$0xff] }
  0x7d   :  { %7222 = vst [vmem:[%s12106_s1 + $0x3a0] sm:$0xff] %v9194_v59  ;;  %v9258_v59 = vld [vmem:[%s12105_s0 + $0x4b0] sm:$0xff] }
  0x7e   :  { %7228 = vst [vmem:[%s12106_s1 + $0x820] sm:$0xff] %v9195_v60  ;;  %v9259_v60 = vld [vmem:[%s12105_s0 + $0x30] sm:$0xff] }
  0x7f   :  { %7234 = vst [vmem:[%s12106_s1 + $0xca0] sm:$0xff] %v9196_v61  ;;  %v9260_v61 = vld [vmem:[%s12105_s0 + $0xd38] sm:$0xff] }
  0x80   :  { %7240 = vst [vmem:[%s12106_s1 + $0x120] sm:$0xff] %v9197_v62  ;;  %v9261_v62 = vld [vmem:[%s12105_s0 + $0x8b8] sm:$0xff] }
  0x81   :  { %7246 = vst [vmem:[%s12106_s1 + $0x5a0] sm:$0xff] %v9198_v63  ;;  %v9262_v63 = vld [vmem:[%s12105_s0 + $0x438] sm:$0xff] }
  0x82   :  { %7252 = vst [vmem:[%s12106_s1 + $0xa20] sm:$0xff] %v9199_v0  ;;  %v9263_v0 = vld [vmem:[%s12105_s0 + $0xbb8] sm:$0xff] }
  0x83   :  { %7258 = vst [vmem:[%s12106_s1 + $0x2a0] sm:$0xff] %v9200_v1  ;;  %v9264_v1 = vld [vmem:[%s12105_s0 + $0x738] sm:$0xff] }
  0x84   :  { %7264 = vst [vmem:[%s12106_s1 + $0x720] sm:$0xff] %v9201_v2  ;;  %v9265_v2 = vld [vmem:[%s12105_s0 + $0x2b8] sm:$0xff] }
  0x85   :  { %7270 = vst [vmem:[%s12106_s1 + $0xba0] sm:$0xff] %v9202_v3  ;;  %v9266_v3 = vld [vmem:[%s12105_s0 + $0xa38] sm:$0xff] }
  0x86   :  { %7276 = vst [vmem:[%s12106_s1 + $0x420] sm:$0xff] %v9203_v4  ;;  %v9267_v4 = vld [vmem:[%s12105_s0 + $0x5b8] sm:$0xff] }
  0x87   :  { %7282 = vst [vmem:[%s12106_s1 + $0x8a0] sm:$0xff] %v9204_v5  ;;  %v9268_v5 = vld [vmem:[%s12105_s0 + $0x138] sm:$0xff] }
  0x88   :  { %7288 = vst [vmem:[%s12106_s1 + $0xd20] sm:$0xff] %v9205_v6  ;;  %v9269_v6 = vld [vmem:[%s12105_s0 + $0xcb8] sm:$0xff] }
  0x89   :  { %7294 = vst [vmem:[%s12106_s1 + $0x28] sm:$0xff] %v9206_v7  ;;  %v9270_v7 = vld [vmem:[%s12105_s0 + $0x838] sm:$0xff] }
  0x8a   :  { %7300 = vst [vmem:[%s12106_s1 + $0x4a8] sm:$0xff] %v9207_v8  ;;  %v9271_v8 = vld [vmem:[%s12105_s0 + $0x3b8] sm:$0xff] }
  0x8b   :  { %7306 = vst [vmem:[%s12106_s1 + $0x928] sm:$0xff] %v9208_v9  ;;  %v9272_v9 = vld [vmem:[%s12105_s0 + $0xb38] sm:$0xff] }
  0x8c   :  { %7312 = vst [vmem:[%s12106_s1 + $0x1a8] sm:$0xff] %v9209_v10  ;;  %v9273_v10 = vld [vmem:[%s12105_s0 + $0x6b8] sm:$0xff] }
  0x8d   :  { %7318 = vst [vmem:[%s12106_s1 + $0x628] sm:$0xff] %v9210_v11  ;;  %v9274_v11 = vld [vmem:[%s12105_s0 + $0x238] sm:$0xff] }
  0x8e   :  { %7324 = vst [vmem:[%s12106_s1 + $0xaa8] sm:$0xff] %v9211_v12  ;;  %v9275_v12 = vld [vmem:[%s12105_s0 + $0x9b8] sm:$0xff] }
  0x8f   :  { %7330 = vst [vmem:[%s12106_s1 + $0x328] sm:$0xff] %v9212_v13  ;;  %v9276_v13 = vld [vmem:[%s12105_s0 + $0x538] sm:$0xff] }
  0x90   :  { %7336 = vst [vmem:[%s12106_s1 + $0x7a8] sm:$0xff] %v9213_v14  ;;  %v9277_v14 = vld [vmem:[%s12105_s0 + $0xb8] sm:$0xff] }
  0x91   :  { %7342 = vst [vmem:[%s12106_s1 + $0xc28] sm:$0xff] %v9214_v15  ;;  %v9278_v15 = vld [vmem:[%s12105_s0 + $0xc38] sm:$0xff] }
  0x92   :  { %7348 = vst [vmem:[%s12106_s1 + $0xa8] sm:$0xff] %v9215_v16  ;;  %v9279_v16 = vld [vmem:[%s12105_s0 + $0x7b8] sm:$0xff] }
  0x93   :  { %7354 = vst [vmem:[%s12106_s1 + $0x528] sm:$0xff] %v9216_v17  ;;  %v9280_v17 = vld [vmem:[%s12105_s0 + $0x338] sm:$0xff] }
  0x94   :  { %7360 = vst [vmem:[%s12106_s1 + $0x9a8] sm:$0xff] %v9217_v18  ;;  %v9281_v18 = vld [vmem:[%s12105_s0 + $0xab8] sm:$0xff] }
  0x95   :  { %7366 = vst [vmem:[%s12106_s1 + $0x228] sm:$0xff] %v9218_v19  ;;  %v9282_v19 = vld [vmem:[%s12105_s0 + $0x638] sm:$0xff] }
  0x96   :  { %7372 = vst [vmem:[%s12106_s1 + $0x6a8] sm:$0xff] %v9219_v20  ;;  %v9283_v20 = vld [vmem:[%s12105_s0 + $0x1b8] sm:$0xff] }
  0x97   :  { %7378 = vst [vmem:[%s12106_s1 + $0xb28] sm:$0xff] %v9220_v21  ;;  %v9284_v21 = vld [vmem:[%s12105_s0 + $0x938] sm:$0xff] }
  0x98   :  { %7384 = vst [vmem:[%s12106_s1 + $0x3a8] sm:$0xff] %v9221_v22  ;;  %v9285_v22 = vld [vmem:[%s12105_s0 + $0x4b8] sm:$0xff] }
  0x99   :  { %7390 = vst [vmem:[%s12106_s1 + $0x828] sm:$0xff] %v9222_v23  ;;  %v9286_v23 = vld [vmem:[%s12105_s0 + $0x38] sm:$0xff] }
  0x9a   :  { %7396 = vst [vmem:[%s12106_s1 + $0xca8] sm:$0xff] %v9223_v24  ;;  %v9287_v24 = vld [vmem:[%s12105_s0 + $0xd40] sm:$0xff] }
  0x9b   :  { %7402 = vst [vmem:[%s12106_s1 + $0x128] sm:$0xff] %v9224_v25  ;;  %v9288_v25 = vld [vmem:[%s12105_s0 + $0x8c0] sm:$0xff] }
  0x9c   :  { %7408 = vst [vmem:[%s12106_s1 + $0x5a8] sm:$0xff] %v9225_v26  ;;  %v9289_v26 = vld [vmem:[%s12105_s0 + $0x440] sm:$0xff] }
  0x9d   :  { %7414 = vst [vmem:[%s12106_s1 + $0xa28] sm:$0xff] %v9226_v27  ;;  %v9290_v27 = vld [vmem:[%s12105_s0 + $0xbc0] sm:$0xff] }
  0x9e   :  { %7420 = vst [vmem:[%s12106_s1 + $0x2a8] sm:$0xff] %v9227_v28  ;;  %v9291_v28 = vld [vmem:[%s12105_s0 + $0x740] sm:$0xff] }
  0x9f   :  { %7426 = vst [vmem:[%s12106_s1 + $0x728] sm:$0xff] %v9228_v29  ;;  %v9292_v29 = vld [vmem:[%s12105_s0 + $0x2c0] sm:$0xff] }
  0xa0   :  { %7432 = vst [vmem:[%s12106_s1 + $0xba8] sm:$0xff] %v9229_v30  ;;  %v9293_v30 = vld [vmem:[%s12105_s0 + $0xa40] sm:$0xff] }
  0xa1   :  { %7438 = vst [vmem:[%s12106_s1 + $0x428] sm:$0xff] %v9230_v31  ;;  %v9294_v31 = vld [vmem:[%s12105_s0 + $0x5c0] sm:$0xff] }
  0xa2   :  { %7444 = vst [vmem:[%s12106_s1 + $0x8a8] sm:$0xff] %v9231_v32  ;;  %v9295_v32 = vld [vmem:[%s12105_s0 + $0x140] sm:$0xff] }
  0xa3   :  { %7450 = vst [vmem:[%s12106_s1 + $0xd28] sm:$0xff] %v9232_v33  ;;  %v9296_v33 = vld [vmem:[%s12105_s0 + $0xcc0] sm:$0xff] }
  0xa4   :  { %7456 = vst [vmem:[%s12106_s1 + $0x30] sm:$0xff] %v9233_v34  ;;  %v9297_v34 = vld [vmem:[%s12105_s0 + $0x840] sm:$0xff] }
  0xa5   :  { %7462 = vst [vmem:[%s12106_s1 + $0x4b0] sm:$0xff] %v9234_v35  ;;  %v9298_v35 = vld [vmem:[%s12105_s0 + $0x3c0] sm:$0xff] }
  0xa6   :  { %7468 = vst [vmem:[%s12106_s1 + $0x930] sm:$0xff] %v9235_v36  ;;  %v9299_v36 = vld [vmem:[%s12105_s0 + $0xb40] sm:$0xff] }
  0xa7   :  { %7474 = vst [vmem:[%s12106_s1 + $0x1b0] sm:$0xff] %v9236_v37  ;;  %v9300_v37 = vld [vmem:[%s12105_s0 + $0x6c0] sm:$0xff] }
  0xa8   :  { %7480 = vst [vmem:[%s12106_s1 + $0x630] sm:$0xff] %v9237_v38  ;;  %v9301_v38 = vld [vmem:[%s12105_s0 + $0x240] sm:$0xff] }
  0xa9   :  { %7486 = vst [vmem:[%s12106_s1 + $0xab0] sm:$0xff] %v9238_v39  ;;  %v9302_v39 = vld [vmem:[%s12105_s0 + $0x9c0] sm:$0xff] }
  0xaa   :  { %7492 = vst [vmem:[%s12106_s1 + $0x330] sm:$0xff] %v9239_v40  ;;  %v9303_v40 = vld [vmem:[%s12105_s0 + $0x540] sm:$0xff] }
  0xab   :  { %7498 = vst [vmem:[%s12106_s1 + $0x7b0] sm:$0xff] %v9240_v41  ;;  %v9304_v41 = vld [vmem:[%s12105_s0 + $0xc0] sm:$0xff] }
  0xac   :  { %7504 = vst [vmem:[%s12106_s1 + $0xc30] sm:$0xff] %v9241_v42  ;;  %v9305_v42 = vld [vmem:[%s12105_s0 + $0xc40] sm:$0xff] }
  0xad   :  { %7510 = vst [vmem:[%s12106_s1 + $0xb0] sm:$0xff] %v9242_v43  ;;  %v9306_v43 = vld [vmem:[%s12105_s0 + $0x7c0] sm:$0xff] }
  0xae   :  { %7516 = vst [vmem:[%s12106_s1 + $0x530] sm:$0xff] %v9243_v44  ;;  %v9307_v44 = vld [vmem:[%s12105_s0 + $0x340] sm:$0xff] }
  0xaf   :  { %7522 = vst [vmem:[%s12106_s1 + $0x9b0] sm:$0xff] %v9244_v45  ;;  %v9308_v45 = vld [vmem:[%s12105_s0 + $0xac0] sm:$0xff] }
  0xb0   :  { %7528 = vst [vmem:[%s12106_s1 + $0x230] sm:$0xff] %v9245_v46  ;;  %v9309_v46 = vld [vmem:[%s12105_s0 + $0x640] sm:$0xff] }
  0xb1   :  { %7534 = vst [vmem:[%s12106_s1 + $0x6b0] sm:$0xff] %v9246_v47  ;;  %v9310_v47 = vld [vmem:[%s12105_s0 + $0x1c0] sm:$0xff] }
  0xb2   :  { %7540 = vst [vmem:[%s12106_s1 + $0xb30] sm:$0xff] %v9247_v48  ;;  %v9311_v48 = vld [vmem:[%s12105_s0 + $0x940] sm:$0xff] }
  0xb3   :  { %7546 = vst [vmem:[%s12106_s1 + $0x3b0] sm:$0xff] %v9248_v49  ;;  %v9312_v49 = vld [vmem:[%s12105_s0 + $0x4c0] sm:$0xff] }
  0xb4   :  { %7552 = vst [vmem:[%s12106_s1 + $0x830] sm:$0xff] %v9249_v50  ;;  %v9313_v50 = vld [vmem:[%s12105_s0 + $0x40] sm:$0xff] }
  0xb5   :  { %7558 = vst [vmem:[%s12106_s1 + $0xcb0] sm:$0xff] %v9250_v51  ;;  %v9314_v51 = vld [vmem:[%s12105_s0 + $0xd48] sm:$0xff] }
  0xb6   :  { %7564 = vst [vmem:[%s12106_s1 + $0x130] sm:$0xff] %v9251_v52  ;;  %v9315_v52 = vld [vmem:[%s12105_s0 + $0x8c8] sm:$0xff] }
  0xb7   :  { %7570 = vst [vmem:[%s12106_s1 + $0x5b0] sm:$0xff] %v9252_v53  ;;  %v9316_v53 = vld [vmem:[%s12105_s0 + $0x448] sm:$0xff] }
  0xb8   :  { %7576 = vst [vmem:[%s12106_s1 + $0xa30] sm:$0xff] %v9253_v54  ;;  %v9317_v54 = vld [vmem:[%s12105_s0 + $0xbc8] sm:$0xff] }
  0xb9   :  { %7582 = vst [vmem:[%s12106_s1 + $0x2b0] sm:$0xff] %v9254_v55  ;;  %v9318_v55 = vld [vmem:[%s12105_s0 + $0x748] sm:$0xff] }
  0xba   :  { %7588 = vst [vmem:[%s12106_s1 + $0x730] sm:$0xff] %v9255_v56  ;;  %v9319_v56 = vld [vmem:[%s12105_s0 + $0x2c8] sm:$0xff] }
  0xbb   :  { %7594 = vst [vmem:[%s12106_s1 + $0xbb0] sm:$0xff] %v9256_v57  ;;  %v9320_v57 = vld [vmem:[%s12105_s0 + $0xa48] sm:$0xff] }
  0xbc   :  { %7600 = vst [vmem:[%s12106_s1 + $0x430] sm:$0xff] %v9257_v58  ;;  %v9321_v58 = vld [vmem:[%s12105_s0 + $0x5c8] sm:$0xff] }
  0xbd   :  { %7606 = vst [vmem:[%s12106_s1 + $0x8b0] sm:$0xff] %v9258_v59  ;;  %v9322_v59 = vld [vmem:[%s12105_s0 + $0x148] sm:$0xff] }
  0xbe   :  { %7612 = vst [vmem:[%s12106_s1 + $0xd30] sm:$0xff] %v9259_v60  ;;  %v9323_v60 = vld [vmem:[%s12105_s0 + $0xcc8] sm:$0xff] }
  0xbf   :  { %7618 = vst [vmem:[%s12106_s1 + $0x38] sm:$0xff] %v9260_v61  ;;  %v9324_v61 = vld [vmem:[%s12105_s0 + $0x848] sm:$0xff] }
  0xc0   :  { %7624 = vst [vmem:[%s12106_s1 + $0x4b8] sm:$0xff] %v9261_v62  ;;  %v9325_v62 = vld [vmem:[%s12105_s0 + $0x3c8] sm:$0xff] }
  0xc1   :  { %7630 = vst [vmem:[%s12106_s1 + $0x938] sm:$0xff] %v9262_v63  ;;  %v9326_v63 = vld [vmem:[%s12105_s0 + $0xb48] sm:$0xff] }
  0xc2   :  { %7636 = vst [vmem:[%s12106_s1 + $0x1b8] sm:$0xff] %v9263_v0  ;;  %v9327_v0 = vld [vmem:[%s12105_s0 + $0x6c8] sm:$0xff] }
  0xc3   :  { %7642 = vst [vmem:[%s12106_s1 + $0x638] sm:$0xff] %v9264_v1  ;;  %v9328_v1 = vld [vmem:[%s12105_s0 + $0x248] sm:$0xff] }
  0xc4   :  { %7648 = vst [vmem:[%s12106_s1 + $0xab8] sm:$0xff] %v9265_v2  ;;  %v9329_v2 = vld [vmem:[%s12105_s0 + $0x9c8] sm:$0xff] }
  0xc5   :  { %7654 = vst [vmem:[%s12106_s1 + $0x338] sm:$0xff] %v9266_v3  ;;  %v9330_v3 = vld [vmem:[%s12105_s0 + $0x548] sm:$0xff] }
  0xc6   :  { %7660 = vst [vmem:[%s12106_s1 + $0x7b8] sm:$0xff] %v9267_v4  ;;  %v9331_v4 = vld [vmem:[%s12105_s0 + $0xc8] sm:$0xff] }
  0xc7   :  { %7666 = vst [vmem:[%s12106_s1 + $0xc38] sm:$0xff] %v9268_v5  ;;  %v9332_v5 = vld [vmem:[%s12105_s0 + $0xc48] sm:$0xff] }
  0xc8   :  { %7672 = vst [vmem:[%s12106_s1 + $0xb8] sm:$0xff] %v9269_v6  ;;  %v9333_v6 = vld [vmem:[%s12105_s0 + $0x7c8] sm:$0xff] }
  0xc9   :  { %7678 = vst [vmem:[%s12106_s1 + $0x538] sm:$0xff] %v9270_v7  ;;  %v9334_v7 = vld [vmem:[%s12105_s0 + $0x348] sm:$0xff] }
  0xca   :  { %7684 = vst [vmem:[%s12106_s1 + $0x9b8] sm:$0xff] %v9271_v8  ;;  %v9335_v8 = vld [vmem:[%s12105_s0 + $0xac8] sm:$0xff] }
  0xcb   :  { %7690 = vst [vmem:[%s12106_s1 + $0x238] sm:$0xff] %v9272_v9  ;;  %v9336_v9 = vld [vmem:[%s12105_s0 + $0x648] sm:$0xff] }
  0xcc   :  { %7696 = vst [vmem:[%s12106_s1 + $0x6b8] sm:$0xff] %v9273_v10  ;;  %v9337_v10 = vld [vmem:[%s12105_s0 + $0x1c8] sm:$0xff] }
  0xcd   :  { %7702 = vst [vmem:[%s12106_s1 + $0xb38] sm:$0xff] %v9274_v11  ;;  %v9338_v11 = vld [vmem:[%s12105_s0 + $0x948] sm:$0xff] }
  0xce   :  { %7708 = vst [vmem:[%s12106_s1 + $0x3b8] sm:$0xff] %v9275_v12  ;;  %v9339_v12 = vld [vmem:[%s12105_s0 + $0x4c8] sm:$0xff] }
  0xcf   :  { %7714 = vst [vmem:[%s12106_s1 + $0x838] sm:$0xff] %v9276_v13  ;;  %v9340_v13 = vld [vmem:[%s12105_s0 + $0x48] sm:$0xff] }
  0xd0   :  { %7720 = vst [vmem:[%s12106_s1 + $0xcb8] sm:$0xff] %v9277_v14  ;;  %v9341_v14 = vld [vmem:[%s12105_s0 + $0xd50] sm:$0xff] }
  0xd1   :  { %7726 = vst [vmem:[%s12106_s1 + $0x138] sm:$0xff] %v9278_v15  ;;  %v9342_v15 = vld [vmem:[%s12105_s0 + $0x8d0] sm:$0xff] }
  0xd2   :  { %7732 = vst [vmem:[%s12106_s1 + $0x5b8] sm:$0xff] %v9279_v16  ;;  %v9343_v16 = vld [vmem:[%s12105_s0 + $0x450] sm:$0xff] }
  0xd3   :  { %7738 = vst [vmem:[%s12106_s1 + $0xa38] sm:$0xff] %v9280_v17  ;;  %v9344_v17 = vld [vmem:[%s12105_s0 + $0xbd0] sm:$0xff] }
  0xd4   :  { %7744 = vst [vmem:[%s12106_s1 + $0x2b8] sm:$0xff] %v9281_v18  ;;  %v9345_v18 = vld [vmem:[%s12105_s0 + $0x750] sm:$0xff] }
  0xd5   :  { %7750 = vst [vmem:[%s12106_s1 + $0x738] sm:$0xff] %v9282_v19  ;;  %v9346_v19 = vld [vmem:[%s12105_s0 + $0x2d0] sm:$0xff] }
  0xd6   :  { %7756 = vst [vmem:[%s12106_s1 + $0xbb8] sm:$0xff] %v9283_v20  ;;  %v9347_v20 = vld [vmem:[%s12105_s0 + $0xa50] sm:$0xff] }
  0xd7   :  { %7762 = vst [vmem:[%s12106_s1 + $0x438] sm:$0xff] %v9284_v21  ;;  %v9348_v21 = vld [vmem:[%s12105_s0 + $0x5d0] sm:$0xff] }
  0xd8   :  { %7768 = vst [vmem:[%s12106_s1 + $0x8b8] sm:$0xff] %v9285_v22  ;;  %v9349_v22 = vld [vmem:[%s12105_s0 + $0x150] sm:$0xff] }
  0xd9   :  { %7774 = vst [vmem:[%s12106_s1 + $0xd38] sm:$0xff] %v9286_v23  ;;  %v9350_v23 = vld [vmem:[%s12105_s0 + $0xcd0] sm:$0xff] }
  0xda   :  { %7780 = vst [vmem:[%s12106_s1 + $0x40] sm:$0xff] %v9287_v24  ;;  %v9351_v24 = vld [vmem:[%s12105_s0 + $0x850] sm:$0xff] }
  0xdb   :  { %7786 = vst [vmem:[%s12106_s1 + $0x4c0] sm:$0xff] %v9288_v25  ;;  %v9352_v25 = vld [vmem:[%s12105_s0 + $0x3d0] sm:$0xff] }
  0xdc   :  { %7792 = vst [vmem:[%s12106_s1 + $0x940] sm:$0xff] %v9289_v26  ;;  %v9353_v26 = vld [vmem:[%s12105_s0 + $0xb50] sm:$0xff] }
  0xdd   :  { %7798 = vst [vmem:[%s12106_s1 + $0x1c0] sm:$0xff] %v9290_v27  ;;  %v9354_v27 = vld [vmem:[%s12105_s0 + $0x6d0] sm:$0xff] }
  0xde   :  { %7804 = vst [vmem:[%s12106_s1 + $0x640] sm:$0xff] %v9291_v28  ;;  %v9355_v28 = vld [vmem:[%s12105_s0 + $0x250] sm:$0xff] }
  0xdf   :  { %7810 = vst [vmem:[%s12106_s1 + $0xac0] sm:$0xff] %v9292_v29  ;;  %v9356_v29 = vld [vmem:[%s12105_s0 + $0x9d0] sm:$0xff] }
  0xe0   :  { %7816 = vst [vmem:[%s12106_s1 + $0x340] sm:$0xff] %v9293_v30  ;;  %v9357_v30 = vld [vmem:[%s12105_s0 + $0x550] sm:$0xff] }
  0xe1   :  { %7822 = vst [vmem:[%s12106_s1 + $0x7c0] sm:$0xff] %v9294_v31  ;;  %v9358_v31 = vld [vmem:[%s12105_s0 + $0xd0] sm:$0xff] }
  0xe2   :  { %7828 = vst [vmem:[%s12106_s1 + $0xc40] sm:$0xff] %v9295_v32  ;;  %v9359_v32 = vld [vmem:[%s12105_s0 + $0xc50] sm:$0xff] }
  0xe3   :  { %7834 = vst [vmem:[%s12106_s1 + $0xc0] sm:$0xff] %v9296_v33  ;;  %v9360_v33 = vld [vmem:[%s12105_s0 + $0x7d0] sm:$0xff] }
  0xe4   :  { %7840 = vst [vmem:[%s12106_s1 + $0x540] sm:$0xff] %v9297_v34  ;;  %v9361_v34 = vld [vmem:[%s12105_s0 + $0x350] sm:$0xff] }
  0xe5   :  { %7846 = vst [vmem:[%s12106_s1 + $0x9c0] sm:$0xff] %v9298_v35  ;;  %v9362_v35 = vld [vmem:[%s12105_s0 + $0xad0] sm:$0xff] }
  0xe6   :  { %7852 = vst [vmem:[%s12106_s1 + $0x240] sm:$0xff] %v9299_v36  ;;  %v9363_v36 = vld [vmem:[%s12105_s0 + $0x650] sm:$0xff] }
  0xe7   :  { %7858 = vst [vmem:[%s12106_s1 + $0x6c0] sm:$0xff] %v9300_v37  ;;  %v9364_v37 = vld [vmem:[%s12105_s0 + $0x1d0] sm:$0xff] }
  0xe8   :  { %7864 = vst [vmem:[%s12106_s1 + $0xb40] sm:$0xff] %v9301_v38  ;;  %v9365_v38 = vld [vmem:[%s12105_s0 + $0x950] sm:$0xff] }
  0xe9   :  { %7870 = vst [vmem:[%s12106_s1 + $0x3c0] sm:$0xff] %v9302_v39  ;;  %v9366_v39 = vld [vmem:[%s12105_s0 + $0x4d0] sm:$0xff] }
  0xea   :  { %7876 = vst [vmem:[%s12106_s1 + $0x840] sm:$0xff] %v9303_v40  ;;  %v9367_v40 = vld [vmem:[%s12105_s0 + $0x50] sm:$0xff] }
  0xeb   :  { %7882 = vst [vmem:[%s12106_s1 + $0xcc0] sm:$0xff] %v9304_v41  ;;  %v9368_v41 = vld [vmem:[%s12105_s0 + $0xd58] sm:$0xff] }
  0xec   :  { %7888 = vst [vmem:[%s12106_s1 + $0x140] sm:$0xff] %v9305_v42  ;;  %v9369_v42 = vld [vmem:[%s12105_s0 + $0x8d8] sm:$0xff] }
  0xed   :  { %7894 = vst [vmem:[%s12106_s1 + $0x5c0] sm:$0xff] %v9306_v43  ;;  %v9370_v43 = vld [vmem:[%s12105_s0 + $0x458] sm:$0xff] }
  0xee   :  { %7900 = vst [vmem:[%s12106_s1 + $0xa40] sm:$0xff] %v9307_v44  ;;  %v9371_v44 = vld [vmem:[%s12105_s0 + $0xbd8] sm:$0xff] }
  0xef   :  { %7906 = vst [vmem:[%s12106_s1 + $0x2c0] sm:$0xff] %v9308_v45  ;;  %v9372_v45 = vld [vmem:[%s12105_s0 + $0x758] sm:$0xff] }
  0xf0   :  { %7912 = vst [vmem:[%s12106_s1 + $0x740] sm:$0xff] %v9309_v46  ;;  %v9373_v46 = vld [vmem:[%s12105_s0 + $0x2d8] sm:$0xff] }
  0xf1   :  { %7918 = vst [vmem:[%s12106_s1 + $0xbc0] sm:$0xff] %v9310_v47  ;;  %v9374_v47 = vld [vmem:[%s12105_s0 + $0xa58] sm:$0xff] }
  0xf2   :  { %7924 = vst [vmem:[%s12106_s1 + $0x440] sm:$0xff] %v9311_v48  ;;  %v9375_v48 = vld [vmem:[%s12105_s0 + $0x5d8] sm:$0xff] }
  0xf3   :  { %7930 = vst [vmem:[%s12106_s1 + $0x8c0] sm:$0xff] %v9312_v49  ;;  %v9376_v49 = vld [vmem:[%s12105_s0 + $0x158] sm:$0xff] }
  0xf4   :  { %7936 = vst [vmem:[%s12106_s1 + $0xd40] sm:$0xff] %v9313_v50  ;;  %v9377_v50 = vld [vmem:[%s12105_s0 + $0xcd8] sm:$0xff] }
  0xf5   :  { %7942 = vst [vmem:[%s12106_s1 + $0x48] sm:$0xff] %v9314_v51  ;;  %v9378_v51 = vld [vmem:[%s12105_s0 + $0x858] sm:$0xff] }
  0xf6   :  { %7948 = vst [vmem:[%s12106_s1 + $0x4c8] sm:$0xff] %v9315_v52  ;;  %v9379_v52 = vld [vmem:[%s12105_s0 + $0x3d8] sm:$0xff] }
  0xf7   :  { %7954 = vst [vmem:[%s12106_s1 + $0x948] sm:$0xff] %v9316_v53  ;;  %v9380_v53 = vld [vmem:[%s12105_s0 + $0xb58] sm:$0xff] }
  0xf8   :  { %7960 = vst [vmem:[%s12106_s1 + $0x1c8] sm:$0xff] %v9317_v54  ;;  %v9381_v54 = vld [vmem:[%s12105_s0 + $0x6d8] sm:$0xff] }
  0xf9   :  { %7966 = vst [vmem:[%s12106_s1 + $0x648] sm:$0xff] %v9318_v55  ;;  %v9382_v55 = vld [vmem:[%s12105_s0 + $0x258] sm:$0xff] }
  0xfa   :  { %7972 = vst [vmem:[%s12106_s1 + $0xac8] sm:$0xff] %v9319_v56  ;;  %v9383_v56 = vld [vmem:[%s12105_s0 + $0x9d8] sm:$0xff] }
  0xfb   :  { %7978 = vst [vmem:[%s12106_s1 + $0x348] sm:$0xff] %v9320_v57  ;;  %v9384_v57 = vld [vmem:[%s12105_s0 + $0x558] sm:$0xff] }
  0xfc   :  { %7984 = vst [vmem:[%s12106_s1 + $0x7c8] sm:$0xff] %v9321_v58  ;;  %v9385_v58 = vld [vmem:[%s12105_s0 + $0xd8] sm:$0xff] }
  0xfd   :  { %7990 = vst [vmem:[%s12106_s1 + $0xc48] sm:$0xff] %v9322_v59  ;;  %v9386_v59 = vld [vmem:[%s12105_s0 + $0xc58] sm:$0xff] }
  0xfe   :  { %7996 = vst [vmem:[%s12106_s1 + $0xc8] sm:$0xff] %v9323_v60  ;;  %v9387_v60 = vld [vmem:[%s12105_s0 + $0x7d8] sm:$0xff] }
  0xff   :  { %8002 = vst [vmem:[%s12106_s1 + $0x548] sm:$0xff] %v9324_v61  ;;  %v9388_v61 = vld [vmem:[%s12105_s0 + $0x358] sm:$0xff] }
 0x100   :  { %8008 = vst [vmem:[%s12106_s1 + $0x9c8] sm:$0xff] %v9325_v62  ;;  %v9389_v62 = vld [vmem:[%s12105_s0 + $0xad8] sm:$0xff] }
 0x101   :  { %8014 = vst [vmem:[%s12106_s1 + $0x248] sm:$0xff] %v9326_v63  ;;  %v9390_v63 = vld [vmem:[%s12105_s0 + $0x658] sm:$0xff] }
 0x102   :  { %8020 = vst [vmem:[%s12106_s1 + $0x6c8] sm:$0xff] %v9327_v0  ;;  %v9391_v0 = vld [vmem:[%s12105_s0 + $0x1d8] sm:$0xff] }
 0x103   :  { %8026 = vst [vmem:[%s12106_s1 + $0xb48] sm:$0xff] %v9328_v1  ;;  %v9392_v1 = vld [vmem:[%s12105_s0 + $0x958] sm:$0xff] }
 0x104   :  { %8032 = vst [vmem:[%s12106_s1 + $0x3c8] sm:$0xff] %v9329_v2  ;;  %v9393_v2 = vld [vmem:[%s12105_s0 + $0x4d8] sm:$0xff] }
 0x105   :  { %8038 = vst [vmem:[%s12106_s1 + $0x848] sm:$0xff] %v9330_v3  ;;  %v9394_v3 = vld [vmem:[%s12105_s0 + $0x58] sm:$0xff] }
 0x106   :  { %8044 = vst [vmem:[%s12106_s1 + $0xcc8] sm:$0xff] %v9331_v4  ;;  %v9395_v4 = vld [vmem:[%s12105_s0 + $0xd60] sm:$0xff] }
 0x107   :  { %8050 = vst [vmem:[%s12106_s1 + $0x148] sm:$0xff] %v9332_v5  ;;  %v9396_v5 = vld [vmem:[%s12105_s0 + $0x8e0] sm:$0xff] }
 0x108   :  { %8056 = vst [vmem:[%s12106_s1 + $0x5c8] sm:$0xff] %v9333_v6  ;;  %v9397_v6 = vld [vmem:[%s12105_s0 + $0x460] sm:$0xff] }
 0x109   :  { %8062 = vst [vmem:[%s12106_s1 + $0xa48] sm:$0xff] %v9334_v7  ;;  %v9398_v7 = vld [vmem:[%s12105_s0 + $0xbe0] sm:$0xff] }
 0x10a   :  { %8068 = vst [vmem:[%s12106_s1 + $0x2c8] sm:$0xff] %v9335_v8  ;;  %v9399_v8 = vld [vmem:[%s12105_s0 + $0x760] sm:$0xff] }
 0x10b   :  { %8074 = vst [vmem:[%s12106_s1 + $0x748] sm:$0xff] %v9336_v9  ;;  %v9400_v9 = vld [vmem:[%s12105_s0 + $0x2e0] sm:$0xff] }
 0x10c   :  { %8080 = vst [vmem:[%s12106_s1 + $0xbc8] sm:$0xff] %v9337_v10  ;;  %v9401_v10 = vld [vmem:[%s12105_s0 + $0xa60] sm:$0xff] }
 0x10d   :  { %8086 = vst [vmem:[%s12106_s1 + $0x448] sm:$0xff] %v9338_v11  ;;  %v9402_v11 = vld [vmem:[%s12105_s0 + $0x5e0] sm:$0xff] }
 0x10e   :  { %8092 = vst [vmem:[%s12106_s1 + $0x8c8] sm:$0xff] %v9339_v12  ;;  %v9403_v12 = vld [vmem:[%s12105_s0 + $0x160] sm:$0xff] }
 0x10f   :  { %8098 = vst [vmem:[%s12106_s1 + $0xd48] sm:$0xff] %v9340_v13  ;;  %v9404_v13 = vld [vmem:[%s12105_s0 + $0xce0] sm:$0xff] }
 0x110   :  { %8104 = vst [vmem:[%s12106_s1 + $0x50] sm:$0xff] %v9341_v14  ;;  %v9405_v14 = vld [vmem:[%s12105_s0 + $0x860] sm:$0xff] }
 0x111   :  { %8110 = vst [vmem:[%s12106_s1 + $0x4d0] sm:$0xff] %v9342_v15  ;;  %v9406_v15 = vld [vmem:[%s12105_s0 + $0x3e0] sm:$0xff] }
 0x112   :  { %8116 = vst [vmem:[%s12106_s1 + $0x950] sm:$0xff] %v9343_v16  ;;  %v9407_v16 = vld [vmem:[%s12105_s0 + $0xb60] sm:$0xff] }
 0x113   :  { %8122 = vst [vmem:[%s12106_s1 + $0x1d0] sm:$0xff] %v9344_v17  ;;  %v9408_v17 = vld [vmem:[%s12105_s0 + $0x6e0] sm:$0xff] }
 0x114   :  { %8128 = vst [vmem:[%s12106_s1 + $0x650] sm:$0xff] %v9345_v18  ;;  %v9409_v18 = vld [vmem:[%s12105_s0 + $0x260] sm:$0xff] }
 0x115   :  { %8134 = vst [vmem:[%s12106_s1 + $0xad0] sm:$0xff] %v9346_v19  ;;  %v9410_v19 = vld [vmem:[%s12105_s0 + $0x9e0] sm:$0xff] }
 0x116   :  { %8140 = vst [vmem:[%s12106_s1 + $0x350] sm:$0xff] %v9347_v20  ;;  %v9411_v20 = vld [vmem:[%s12105_s0 + $0x560] sm:$0xff] }
 0x117   :  { %8146 = vst [vmem:[%s12106_s1 + $0x7d0] sm:$0xff] %v9348_v21  ;;  %v9412_v21 = vld [vmem:[%s12105_s0 + $0xe0] sm:$0xff] }
 0x118   :  { %8152 = vst [vmem:[%s12106_s1 + $0xc50] sm:$0xff] %v9349_v22  ;;  %v9413_v22 = vld [vmem:[%s12105_s0 + $0xc60] sm:$0xff] }
 0x119   :  { %8158 = vst [vmem:[%s12106_s1 + $0xd0] sm:$0xff] %v9350_v23  ;;  %v9414_v23 = vld [vmem:[%s12105_s0 + $0x7e0] sm:$0xff] }
 0x11a   :  { %8164 = vst [vmem:[%s12106_s1 + $0x550] sm:$0xff] %v9351_v24  ;;  %v9415_v24 = vld [vmem:[%s12105_s0 + $0x360] sm:$0xff] }
 0x11b   :  { %8170 = vst [vmem:[%s12106_s1 + $0x9d0] sm:$0xff] %v9352_v25  ;;  %v9416_v25 = vld [vmem:[%s12105_s0 + $0xae0] sm:$0xff] }
 0x11c   :  { %8176 = vst [vmem:[%s12106_s1 + $0x250] sm:$0xff] %v9353_v26  ;;  %v9417_v26 = vld [vmem:[%s12105_s0 + $0x660] sm:$0xff] }
 0x11d   :  { %8182 = vst [vmem:[%s12106_s1 + $0x6d0] sm:$0xff] %v9354_v27  ;;  %v9418_v27 = vld [vmem:[%s12105_s0 + $0x1e0] sm:$0xff] }
 0x11e   :  { %8188 = vst [vmem:[%s12106_s1 + $0xb50] sm:$0xff] %v9355_v28  ;;  %v9419_v28 = vld [vmem:[%s12105_s0 + $0x960] sm:$0xff] }
 0x11f   :  { %8194 = vst [vmem:[%s12106_s1 + $0x3d0] sm:$0xff] %v9356_v29  ;;  %v9420_v29 = vld [vmem:[%s12105_s0 + $0x4e0] sm:$0xff] }
 0x120   :  { %8200 = vst [vmem:[%s12106_s1 + $0x850] sm:$0xff] %v9357_v30  ;;  %v9421_v30 = vld [vmem:[%s12105_s0 + $0x60] sm:$0xff] }
 0x121   :  { %8206 = vst [vmem:[%s12106_s1 + $0xcd0] sm:$0xff] %v9358_v31  ;;  %v9422_v31 = vld [vmem:[%s12105_s0 + $0xd68] sm:$0xff] }
 0x122   :  { %8212 = vst [vmem:[%s12106_s1 + $0x150] sm:$0xff] %v9359_v32  ;;  %v9423_v32 = vld [vmem:[%s12105_s0 + $0x8e8] sm:$0xff] }
 0x123   :  { %8218 = vst [vmem:[%s12106_s1 + $0x5d0] sm:$0xff] %v9360_v33  ;;  %v9424_v33 = vld [vmem:[%s12105_s0 + $0x468] sm:$0xff] }
 0x124   :  { %8224 = vst [vmem:[%s12106_s1 + $0xa50] sm:$0xff] %v9361_v34  ;;  %v9425_v34 = vld [vmem:[%s12105_s0 + $0xbe8] sm:$0xff] }
 0x125   :  { %8230 = vst [vmem:[%s12106_s1 + $0x2d0] sm:$0xff] %v9362_v35  ;;  %v9426_v35 = vld [vmem:[%s12105_s0 + $0x768] sm:$0xff] }
 0x126   :  { %8236 = vst [vmem:[%s12106_s1 + $0x750] sm:$0xff] %v9363_v36  ;;  %v9427_v36 = vld [vmem:[%s12105_s0 + $0x2e8] sm:$0xff] }
 0x127   :  { %8242 = vst [vmem:[%s12106_s1 + $0xbd0] sm:$0xff] %v9364_v37  ;;  %v9428_v37 = vld [vmem:[%s12105_s0 + $0xa68] sm:$0xff] }
 0x128   :  { %8248 = vst [vmem:[%s12106_s1 + $0x450] sm:$0xff] %v9365_v38  ;;  %v9429_v38 = vld [vmem:[%s12105_s0 + $0x5e8] sm:$0xff] }
 0x129   :  { %8254 = vst [vmem:[%s12106_s1 + $0x8d0] sm:$0xff] %v9366_v39  ;;  %v9430_v39 = vld [vmem:[%s12105_s0 + $0x168] sm:$0xff] }
 0x12a   :  { %8260 = vst [vmem:[%s12106_s1 + $0xd50] sm:$0xff] %v9367_v40  ;;  %v9431_v40 = vld [vmem:[%s12105_s0 + $0xce8] sm:$0xff] }
 0x12b   :  { %8266 = vst [vmem:[%s12106_s1 + $0x58] sm:$0xff] %v9368_v41  ;;  %v9432_v41 = vld [vmem:[%s12105_s0 + $0x868] sm:$0xff] }
 0x12c   :  { %8272 = vst [vmem:[%s12106_s1 + $0x4d8] sm:$0xff] %v9369_v42  ;;  %v9433_v42 = vld [vmem:[%s12105_s0 + $0x3e8] sm:$0xff] }
 0x12d   :  { %8278 = vst [vmem:[%s12106_s1 + $0x958] sm:$0xff] %v9370_v43  ;;  %v9434_v43 = vld [vmem:[%s12105_s0 + $0xb68] sm:$0xff] }
 0x12e   :  { %8284 = vst [vmem:[%s12106_s1 + $0x1d8] sm:$0xff] %v9371_v44  ;;  %v9435_v44 = vld [vmem:[%s12105_s0 + $0x6e8] sm:$0xff] }
 0x12f   :  { %8290 = vst [vmem:[%s12106_s1 + $0x658] sm:$0xff] %v9372_v45  ;;  %v9436_v45 = vld [vmem:[%s12105_s0 + $0x268] sm:$0xff] }
 0x130   :  { %8296 = vst [vmem:[%s12106_s1 + $0xad8] sm:$0xff] %v9373_v46  ;;  %v9437_v46 = vld [vmem:[%s12105_s0 + $0x9e8] sm:$0xff] }
 0x131   :  { %8302 = vst [vmem:[%s12106_s1 + $0x358] sm:$0xff] %v9374_v47  ;;  %v9438_v47 = vld [vmem:[%s12105_s0 + $0x568] sm:$0xff] }
 0x132   :  { %8308 = vst [vmem:[%s12106_s1 + $0x7d8] sm:$0xff] %v9375_v48  ;;  %v9439_v48 = vld [vmem:[%s12105_s0 + $0xe8] sm:$0xff] }
 0x133   :  { %8314 = vst [vmem:[%s12106_s1 + $0xc58] sm:$0xff] %v9376_v49  ;;  %v9440_v49 = vld [vmem:[%s12105_s0 + $0xc68] sm:$0xff] }
 0x134   :  { %8320 = vst [vmem:[%s12106_s1 + $0xd8] sm:$0xff] %v9377_v50  ;;  %v9441_v50 = vld [vmem:[%s12105_s0 + $0x7e8] sm:$0xff] }
 0x135   :  { %8326 = vst [vmem:[%s12106_s1 + $0x558] sm:$0xff] %v9378_v51  ;;  %v9442_v51 = vld [vmem:[%s12105_s0 + $0x368] sm:$0xff] }
 0x136   :  { %8332 = vst [vmem:[%s12106_s1 + $0x9d8] sm:$0xff] %v9379_v52  ;;  %v9443_v52 = vld [vmem:[%s12105_s0 + $0xae8] sm:$0xff] }
 0x137   :  { %8338 = vst [vmem:[%s12106_s1 + $0x258] sm:$0xff] %v9380_v53  ;;  %v9444_v53 = vld [vmem:[%s12105_s0 + $0x668] sm:$0xff] }
 0x138   :  { %8344 = vst [vmem:[%s12106_s1 + $0x6d8] sm:$0xff] %v9381_v54  ;;  %v9445_v54 = vld [vmem:[%s12105_s0 + $0x1e8] sm:$0xff] }
 0x139   :  { %8350 = vst [vmem:[%s12106_s1 + $0xb58] sm:$0xff] %v9382_v55  ;;  %v9446_v55 = vld [vmem:[%s12105_s0 + $0x968] sm:$0xff] }
 0x13a   :  { %8356 = vst [vmem:[%s12106_s1 + $0x3d8] sm:$0xff] %v9383_v56  ;;  %v9447_v56 = vld [vmem:[%s12105_s0 + $0x4e8] sm:$0xff] }
 0x13b   :  { %8362 = vst [vmem:[%s12106_s1 + $0x858] sm:$0xff] %v9384_v57  ;;  %v9448_v57 = vld [vmem:[%s12105_s0 + $0x68] sm:$0xff] }
 0x13c   :  { %8368 = vst [vmem:[%s12106_s1 + $0xcd8] sm:$0xff] %v9385_v58  ;;  %v9449_v58 = vld [vmem:[%s12105_s0 + $0xd70] sm:$0xff] }
 0x13d   :  { %8374 = vst [vmem:[%s12106_s1 + $0x158] sm:$0xff] %v9386_v59  ;;  %v9450_v59 = vld [vmem:[%s12105_s0 + $0x8f0] sm:$0xff] }
 0x13e   :  { %8380 = vst [vmem:[%s12106_s1 + $0x5d8] sm:$0xff] %v9387_v60  ;;  %v9451_v60 = vld [vmem:[%s12105_s0 + $0x470] sm:$0xff] }
 0x13f   :  { %8386 = vst [vmem:[%s12106_s1 + $0xa58] sm:$0xff] %v9388_v61  ;;  %v9452_v61 = vld [vmem:[%s12105_s0 + $0xbf0] sm:$0xff] }
 0x140   :  { %8392 = vst [vmem:[%s12106_s1 + $0x2d8] sm:$0xff] %v9389_v62  ;;  %v9453_v62 = vld [vmem:[%s12105_s0 + $0x770] sm:$0xff] }
 0x141   :  { %8398 = vst [vmem:[%s12106_s1 + $0x758] sm:$0xff] %v9390_v63  ;;  %v9454_v63 = vld [vmem:[%s12105_s0 + $0x2f0] sm:$0xff] }
 0x142   :  { %8404 = vst [vmem:[%s12106_s1 + $0xbd8] sm:$0xff] %v9391_v0  ;;  %v9455_v0 = vld [vmem:[%s12105_s0 + $0xa70] sm:$0xff] }
 0x143   :  { %8410 = vst [vmem:[%s12106_s1 + $0x458] sm:$0xff] %v9392_v1  ;;  %v9456_v1 = vld [vmem:[%s12105_s0 + $0x5f0] sm:$0xff] }
 0x144   :  { %8416 = vst [vmem:[%s12106_s1 + $0x8d8] sm:$0xff] %v9393_v2  ;;  %v9457_v2 = vld [vmem:[%s12105_s0 + $0x170] sm:$0xff] }
 0x145   :  { %8422 = vst [vmem:[%s12106_s1 + $0xd58] sm:$0xff] %v9394_v3  ;;  %v9458_v3 = vld [vmem:[%s12105_s0 + $0xcf0] sm:$0xff] }
 0x146   :  { %8428 = vst [vmem:[%s12106_s1 + $0x60] sm:$0xff] %v9395_v4  ;;  %v9459_v4 = vld [vmem:[%s12105_s0 + $0x870] sm:$0xff] }
 0x147   :  { %8434 = vst [vmem:[%s12106_s1 + $0x4e0] sm:$0xff] %v9396_v5  ;;  %v9460_v5 = vld [vmem:[%s12105_s0 + $0x3f0] sm:$0xff] }
 0x148   :  { %8440 = vst [vmem:[%s12106_s1 + $0x960] sm:$0xff] %v9397_v6  ;;  %v9461_v6 = vld [vmem:[%s12105_s0 + $0xb70] sm:$0xff] }
 0x149   :  { %8446 = vst [vmem:[%s12106_s1 + $0x1e0] sm:$0xff] %v9398_v7  ;;  %v9462_v7 = vld [vmem:[%s12105_s0 + $0x6f0] sm:$0xff] }
 0x14a   :  { %8452 = vst [vmem:[%s12106_s1 + $0x660] sm:$0xff] %v9399_v8  ;;  %v9463_v8 = vld [vmem:[%s12105_s0 + $0x270] sm:$0xff] }
 0x14b   :  { %8458 = vst [vmem:[%s12106_s1 + $0xae0] sm:$0xff] %v9400_v9  ;;  %v9464_v9 = vld [vmem:[%s12105_s0 + $0x9f0] sm:$0xff] }
 0x14c   :  { %8464 = vst [vmem:[%s12106_s1 + $0x360] sm:$0xff] %v9401_v10  ;;  %v9465_v10 = vld [vmem:[%s12105_s0 + $0x570] sm:$0xff] }
 0x14d   :  { %8470 = vst [vmem:[%s12106_s1 + $0x7e0] sm:$0xff] %v9402_v11  ;;  %v9466_v11 = vld [vmem:[%s12105_s0 + $0xf0] sm:$0xff] }
 0x14e   :  { %8476 = vst [vmem:[%s12106_s1 + $0xc60] sm:$0xff] %v9403_v12  ;;  %v9467_v12 = vld [vmem:[%s12105_s0 + $0xc70] sm:$0xff] }
 0x14f   :  { %8482 = vst [vmem:[%s12106_s1 + $0xe0] sm:$0xff] %v9404_v13  ;;  %v9468_v13 = vld [vmem:[%s12105_s0 + $0x7f0] sm:$0xff] }
 0x150   :  { %8488 = vst [vmem:[%s12106_s1 + $0x560] sm:$0xff] %v9405_v14  ;;  %v9469_v14 = vld [vmem:[%s12105_s0 + $0x370] sm:$0xff] }
 0x151   :  { %8494 = vst [vmem:[%s12106_s1 + $0x9e0] sm:$0xff] %v9406_v15  ;;  %v9470_v15 = vld [vmem:[%s12105_s0 + $0xaf0] sm:$0xff] }
 0x152   :  { %8500 = vst [vmem:[%s12106_s1 + $0x260] sm:$0xff] %v9407_v16  ;;  %v9471_v16 = vld [vmem:[%s12105_s0 + $0x670] sm:$0xff] }
 0x153   :  { %8506 = vst [vmem:[%s12106_s1 + $0x6e0] sm:$0xff] %v9408_v17  ;;  %v9472_v17 = vld [vmem:[%s12105_s0 + $0x1f0] sm:$0xff] }
 0x154   :  { %8512 = vst [vmem:[%s12106_s1 + $0xb60] sm:$0xff] %v9409_v18  ;;  %v9473_v18 = vld [vmem:[%s12105_s0 + $0x970] sm:$0xff] }
 0x155   :  { %8518 = vst [vmem:[%s12106_s1 + $0x3e0] sm:$0xff] %v9410_v19  ;;  %v9474_v19 = vld [vmem:[%s12105_s0 + $0x4f0] sm:$0xff] }
 0x156   :  { %8524 = vst [vmem:[%s12106_s1 + $0x860] sm:$0xff] %v9411_v20  ;;  %v9475_v20 = vld [vmem:[%s12105_s0 + $0x70] sm:$0xff] }
 0x157   :  { %8530 = vst [vmem:[%s12106_s1 + $0xce0] sm:$0xff] %v9412_v21  ;;  %v9476_v21 = vld [vmem:[%s12105_s0 + $0xd78] sm:$0xff] }
 0x158   :  { %8536 = vst [vmem:[%s12106_s1 + $0x160] sm:$0xff] %v9413_v22  ;;  %v9477_v22 = vld [vmem:[%s12105_s0 + $0x8f8] sm:$0xff] }
 0x159   :  { %8542 = vst [vmem:[%s12106_s1 + $0x5e0] sm:$0xff] %v9414_v23  ;;  %v9478_v23 = vld [vmem:[%s12105_s0 + $0x478] sm:$0xff] }
 0x15a   :  { %8548 = vst [vmem:[%s12106_s1 + $0xa60] sm:$0xff] %v9415_v24  ;;  %v9479_v24 = vld [vmem:[%s12105_s0 + $0xbf8] sm:$0xff] }
 0x15b   :  { %8554 = vst [vmem:[%s12106_s1 + $0x2e0] sm:$0xff] %v9416_v25  ;;  %v9480_v25 = vld [vmem:[%s12105_s0 + $0x778] sm:$0xff] }
 0x15c   :  { %8560 = vst [vmem:[%s12106_s1 + $0x760] sm:$0xff] %v9417_v26  ;;  %v9481_v26 = vld [vmem:[%s12105_s0 + $0x2f8] sm:$0xff] }
 0x15d   :  { %8566 = vst [vmem:[%s12106_s1 + $0xbe0] sm:$0xff] %v9418_v27  ;;  %v9482_v27 = vld [vmem:[%s12105_s0 + $0xa78] sm:$0xff] }
 0x15e   :  { %8572 = vst [vmem:[%s12106_s1 + $0x460] sm:$0xff] %v9419_v28  ;;  %v9483_v28 = vld [vmem:[%s12105_s0 + $0x5f8] sm:$0xff] }
 0x15f   :  { %8578 = vst [vmem:[%s12106_s1 + $0x8e0] sm:$0xff] %v9420_v29  ;;  %v9484_v29 = vld [vmem:[%s12105_s0 + $0x178] sm:$0xff] }
 0x160   :  { %8584 = vst [vmem:[%s12106_s1 + $0xd60] sm:$0xff] %v9421_v30  ;;  %v9485_v30 = vld [vmem:[%s12105_s0 + $0xcf8] sm:$0xff] }
 0x161   :  { %8590 = vst [vmem:[%s12106_s1 + $0x68] sm:$0xff] %v9422_v31  ;;  %v9486_v31 = vld [vmem:[%s12105_s0 + $0x878] sm:$0xff] }
 0x162   :  { %8596 = vst [vmem:[%s12106_s1 + $0x4e8] sm:$0xff] %v9423_v32  ;;  %v9487_v32 = vld [vmem:[%s12105_s0 + $0x3f8] sm:$0xff] }
 0x163   :  { %8602 = vst [vmem:[%s12106_s1 + $0x968] sm:$0xff] %v9424_v33  ;;  %v9488_v33 = vld [vmem:[%s12105_s0 + $0xb78] sm:$0xff] }
 0x164   :  { %8608 = vst [vmem:[%s12106_s1 + $0x1e8] sm:$0xff] %v9425_v34  ;;  %v9489_v34 = vld [vmem:[%s12105_s0 + $0x6f8] sm:$0xff] }
 0x165   :  { %8614 = vst [vmem:[%s12106_s1 + $0x668] sm:$0xff] %v9426_v35  ;;  %v9490_v35 = vld [vmem:[%s12105_s0 + $0x278] sm:$0xff] }
 0x166   :  { %8620 = vst [vmem:[%s12106_s1 + $0xae8] sm:$0xff] %v9427_v36  ;;  %v9491_v36 = vld [vmem:[%s12105_s0 + $0x9f8] sm:$0xff] }
 0x167   :  { %8626 = vst [vmem:[%s12106_s1 + $0x368] sm:$0xff] %v9428_v37  ;;  %v9492_v37 = vld [vmem:[%s12105_s0 + $0x578] sm:$0xff] }
 0x168   :  { %8632 = vst [vmem:[%s12106_s1 + $0x7e8] sm:$0xff] %v9429_v38  ;;  %v9493_v38 = vld [vmem:[%s12105_s0 + $0xf8] sm:$0xff] }
 0x169   :  { %8638 = vst [vmem:[%s12106_s1 + $0xc68] sm:$0xff] %v9430_v39  ;;  %v9494_v39 = vld [vmem:[%s12105_s0 + $0xc78] sm:$0xff] }
 0x16a   :  { %8644 = vst [vmem:[%s12106_s1 + $0xe8] sm:$0xff] %v9431_v40  ;;  %v9495_v40 = vld [vmem:[%s12105_s0 + $0x7f8] sm:$0xff] }
 0x16b   :  { %8650 = vst [vmem:[%s12106_s1 + $0x568] sm:$0xff] %v9432_v41  ;;  %v9496_v41 = vld [vmem:[%s12105_s0 + $0x378] sm:$0xff] }
 0x16c   :  { %8656 = vst [vmem:[%s12106_s1 + $0x9e8] sm:$0xff] %v9433_v42  ;;  %v9497_v42 = vld [vmem:[%s12105_s0 + $0xaf8] sm:$0xff] }
 0x16d   :  { %8662 = vst [vmem:[%s12106_s1 + $0x268] sm:$0xff] %v9434_v43  ;;  %v9498_v43 = vld [vmem:[%s12105_s0 + $0x678] sm:$0xff] }
 0x16e   :  { %8668 = vst [vmem:[%s12106_s1 + $0x6e8] sm:$0xff] %v9435_v44  ;;  %v9499_v44 = vld [vmem:[%s12105_s0 + $0x1f8] sm:$0xff] }
 0x16f   :  { %8674 = vst [vmem:[%s12106_s1 + $0xb68] sm:$0xff] %v9436_v45  ;;  %v9500_v45 = vld [vmem:[%s12105_s0 + $0x978] sm:$0xff] }
 0x170   :  { %8680 = vst [vmem:[%s12106_s1 + $0x3e8] sm:$0xff] %v9437_v46  ;;  %v9501_v46 = vld [vmem:[%s12105_s0 + $0x4f8] sm:$0xff] }
 0x171   :  { %8686 = vst [vmem:[%s12106_s1 + $0x868] sm:$0xff] %v9438_v47  ;;  %v9502_v47 = vld [vmem:[%s12105_s0 + $0x78] sm:$0xff] }
 0x172   :  { %8692 = vst [vmem:[%s12106_s1 + $0xce8] sm:$0xff] %v9439_v48 }
 0x173   :  { %8698 = vst [vmem:[%s12106_s1 + $0x168] sm:$0xff] %v9440_v49 }
 0x174   :  { %8704 = vst [vmem:[%s12106_s1 + $0x5e8] sm:$0xff] %v9441_v50 }
 0x175   :  { %8710 = vst [vmem:[%s12106_s1 + $0xa68] sm:$0xff] %v9442_v51 }
 0x176   :  { %8716 = vst [vmem:[%s12106_s1 + $0x2e8] sm:$0xff] %v9443_v52 }
 0x177   :  { %8722 = vst [vmem:[%s12106_s1 + $0x768] sm:$0xff] %v9444_v53 }
 0x178   :  { %8728 = vst [vmem:[%s12106_s1 + $0xbe8] sm:$0xff] %v9445_v54 }
 0x179   :  { %8734 = vst [vmem:[%s12106_s1 + $0x468] sm:$0xff] %v9446_v55 }
 0x17a   :  { %8740 = vst [vmem:[%s12106_s1 + $0x8e8] sm:$0xff] %v9447_v56 }
 0x17b   :  { %8746 = vst [vmem:[%s12106_s1 + $0xd68] sm:$0xff] %v9448_v57 }
 0x17c   :  { %8752 = vst [vmem:[%s12106_s1 + $0x70] sm:$0xff] %v9449_v58 }
 0x17d   :  { %8758 = vst [vmem:[%s12106_s1 + $0x4f0] sm:$0xff] %v9450_v59 }
 0x17e   :  { %8764 = vst [vmem:[%s12106_s1 + $0x970] sm:$0xff] %v9451_v60 }
 0x17f   :  { %8770 = vst [vmem:[%s12106_s1 + $0x1f0] sm:$0xff] %v9452_v61 }
 0x180   :  { %8776 = vst [vmem:[%s12106_s1 + $0x670] sm:$0xff] %v9453_v62 }
 0x181   :  { %8782 = vst [vmem:[%s12106_s1 + $0xaf0] sm:$0xff] %v9454_v63 }
 0x182   :  { %8788 = vst [vmem:[%s12106_s1 + $0x370] sm:$0xff] %v9455_v0 }
 0x183   :  { %8794 = vst [vmem:[%s12106_s1 + $0x7f0] sm:$0xff] %v9456_v1 }
 0x184   :  { %8800 = vst [vmem:[%s12106_s1 + $0xc70] sm:$0xff] %v9457_v2 }
 0x185   :  { %8806 = vst [vmem:[%s12106_s1 + $0xf0] sm:$0xff] %v9458_v3 }
 0x186   :  { %8812 = vst [vmem:[%s12106_s1 + $0x570] sm:$0xff] %v9459_v4 }
 0x187   :  { %8818 = vst [vmem:[%s12106_s1 + $0x9f0] sm:$0xff] %v9460_v5 }
 0x188   :  { %8824 = vst [vmem:[%s12106_s1 + $0x270] sm:$0xff] %v9461_v6 }
 0x189   :  { %8830 = vst [vmem:[%s12106_s1 + $0x6f0] sm:$0xff] %v9462_v7 }
 0x18a   :  { %8836 = vst [vmem:[%s12106_s1 + $0xb70] sm:$0xff] %v9463_v8 }
 0x18b   :  { %8842 = vst [vmem:[%s12106_s1 + $0x3f0] sm:$0xff] %v9464_v9 }
 0x18c   :  { %8848 = vst [vmem:[%s12106_s1 + $0x870] sm:$0xff] %v9465_v10 }
 0x18d   :  { %8854 = vst [vmem:[%s12106_s1 + $0xcf0] sm:$0xff] %v9466_v11 }
 0x18e   :  { %8860 = vst [vmem:[%s12106_s1 + $0x170] sm:$0xff] %v9467_v12 }
 0x18f   :  { %8866 = vst [vmem:[%s12106_s1 + $0x5f0] sm:$0xff] %v9468_v13 }
 0x190   :  { %8872 = vst [vmem:[%s12106_s1 + $0xa70] sm:$0xff] %v9469_v14 }
 0x191   :  { %8878 = vst [vmem:[%s12106_s1 + $0x2f0] sm:$0xff] %v9470_v15 }
 0x192   :  { %8884 = vst [vmem:[%s12106_s1 + $0x770] sm:$0xff] %v9471_v16 }
 0x193   :  { %8890 = vst [vmem:[%s12106_s1 + $0xbf0] sm:$0xff] %v9472_v17 }
 0x194   :  { %8896 = vst [vmem:[%s12106_s1 + $0x470] sm:$0xff] %v9473_v18 }
 0x195   :  { %8902 = vst [vmem:[%s12106_s1 + $0x8f0] sm:$0xff] %v9474_v19 }
 0x196   :  { %8908 = vst [vmem:[%s12106_s1 + $0xd70] sm:$0xff] %v9475_v20 }
 0x197   :  { %8914 = vst [vmem:[%s12106_s1 + $0x78] sm:$0xff] %v9476_v21 }
 0x198   :  { %8920 = vst [vmem:[%s12106_s1 + $0x4f8] sm:$0xff] %v9477_v22 }
 0x199   :  { %8926 = vst [vmem:[%s12106_s1 + $0x978] sm:$0xff] %v9478_v23 }
 0x19a   :  { %8932 = vst [vmem:[%s12106_s1 + $0x1f8] sm:$0xff] %v9479_v24 }
 0x19b   :  { %8938 = vst [vmem:[%s12106_s1 + $0x678] sm:$0xff] %v9480_v25 }
 0x19c   :  { %8944 = vst [vmem:[%s12106_s1 + $0xaf8] sm:$0xff] %v9481_v26 }
 0x19d   :  { %8950 = vst [vmem:[%s12106_s1 + $0x378] sm:$0xff] %v9482_v27 }
 0x19e   :  { %8956 = vst [vmem:[%s12106_s1 + $0x7f8] sm:$0xff] %v9483_v28 }
 0x19f   :  { %8962 = vst [vmem:[%s12106_s1 + $0xc78] sm:$0xff] %v9484_v29 }
 0x1a0   :  { %8968 = vst [vmem:[%s12106_s1 + $0xf8] sm:$0xff] %v9485_v30 }
 0x1a1   :  { %8974 = vst [vmem:[%s12106_s1 + $0x578] sm:$0xff] %v9486_v31 }
 0x1a2   :  { %8980 = vst [vmem:[%s12106_s1 + $0x9f8] sm:$0xff] %v9487_v32 }
 0x1a3   :  { %8986 = vst [vmem:[%s12106_s1 + $0x278] sm:$0xff] %v9488_v33 }
 0x1a4   :  { %8992 = vst [vmem:[%s12106_s1 + $0x6f8] sm:$0xff] %v9489_v34 }
 0x1a5   :  { %8998 = vst [vmem:[%s12106_s1 + $0xb78] sm:$0xff] %v9490_v35 }
 0x1a6   :  { %9004 = vst [vmem:[%s12106_s1 + $0x3f8] sm:$0xff] %v9491_v36 }
 0x1a7   :  { %9010 = vst [vmem:[%s12106_s1 + $0x878] sm:$0xff] %v9492_v37 }
 0x1a8   :  { %9016 = vst [vmem:[%s12106_s1 + $0xcf8] sm:$0xff] %v9493_v38 }
 0x1a9   :  { %9022 = vst [vmem:[%s12106_s1 + $0x178] sm:$0xff] %v9494_v39 }
 0x1aa   :  { %9028 = vst [vmem:[%s12106_s1 + $0x5f8] sm:$0xff] %v9495_v40 }
 0x1ab   :  { %9034 = vst [vmem:[%s12106_s1 + $0xa78] sm:$0xff] %v9496_v41 }
 0x1ac   :  { %9040 = vst [vmem:[%s12106_s1 + $0x2f8] sm:$0xff] %v9497_v42 }
 0x1ad   :  { %9046 = vst [vmem:[%s12106_s1 + $0x778] sm:$0xff] %v9498_v43 }
 0x1ae   :  { %9052 = vst [vmem:[%s12106_s1 + $0xbf8] sm:$0xff] %v9499_v44 }
 0x1af   :  { %9058 = vst [vmem:[%s12106_s1 + $0x478] sm:$0xff] %v9500_v45 }
 0x1b0   :  { %9064 = vst [vmem:[%s12106_s1 + $0x8f8] sm:$0xff] %v9501_v46 }
 0x1b1   :  { %9070 = vst [vmem:[%s12106_s1 + $0xd78] sm:$0xff] %v9502_v47 }

// kernel: reverse.2
= control target key start
LH: loop header
LB: loop body
LE: loop exit
PB: predicated region body
PF: predicated region fallthrough
CT: control target
= control target key end

     0   :  { %s2050_s6 = smov 0   ;;  %s2052_s7 = smov 0   ;;  %s2249_s0 = inlined_call_operand.vmem [shape: bf16[3,3,3,256,256], index: 0, kind: input, shape index: {}]   ;;  %s2250_s1 = inlined_call_operand.vmem [shape: bf16[3,3,3,256,256], index: 1, kind: output, shape index: {}]  }
   0x1   :  { %s2054_s8 = smov 0   ;;  %s2056_s9 = smov 0  }
   0x2   :  { %s2058_s10 = smov 0  }
   0x3 LB: > { %s28_s11 = sadd.s32 1, %s2030_s8  ;;  %s40_s12 = sadd.s32 1, %s2034_s9  ;;  %s2038_s10 = sphi %s2058_s10, %s7_s10   ;;  %s2034_s9 = sphi %s2056_s9, %s2254_s9   ;;  %s2030_s8 = sphi %s2054_s8, %s2253_s8   ;;  %s2026_s7 = sphi %s2052_s7, %s2252_s7   ;;  %s2022_s6 = sphi %s2050_s6, %s2251_s6  }
   0x4   : > { %p30_p0 = scmp.ge.s32.totalorder %s28_s11, 4  ;;  %p1373_p1 = scmp.ge.s32.totalorder %s2038_s10, 1 }
   0x5   : > { %p90_p2 = scmp.lt.s32.totalorder %s2038_s10, 13 }
   0x6   : > { %s2256_s11 = smov (%p30_p0, %s28_s11), 0  ;;  %s2258_s12 = smov (!%p30_p0, %s40_s12), %s2034_s9 }
   0x7   : > { %p91_p3 = pnand %p1373_p1, %p90_p2  ;;  %p42_p4 = scmp.ge.s32.totalorder %s2258_s12, 3 }
   0x8   : > { %s151_s13 = ssub.s32 (!%p91_p3), 2, %s2026_s7  ;;  %s1374_s14 = sshll.u32 (!%p91_p3), %s2022_s6, 3 }
   0x9   : > { %s2260_s12 = smov (%p42_p4, %s2258_s12), 0  ;;  %94 = sbr.rel (%p91_p3) target bundleno = 94 (0x5e), region = 20 }
   0xa   : > { %p158_p5 = scmp.lt.s32.totalorder (!%p91_p3), %s151_s13, 2  ;;  %p164_p6 = scmp.lt.s32.totalorder (!%p91_p3), %s1374_s14, 31 }
   0xb   : > { %p189_p7 = scmp.lt.s32.totalorder (!%p91_p3), %s2026_s7, 2 }
   0xe   : > { %s2262_s13 = smov (!%p158_p5, %s151_s13), 2  ;;  %s2264_s14 = smov (!%p164_p6, %s1374_s14), 31 }
   0xf   : > { %s1958_s15 = smul.u32 576, %s2262_s13  ;;  %s1375_s16 = sshll.u32 %s2264_s14, 1 }
  0x10   : > { %s2266_s7 = smov (!%p189_p7, %s2026_s7), 2 }
  0x11   : > { %s175_s17 = sadd.s32 %s1958_s15, %s1375_s16  ;;  %s1959_s22 = smul.u32 576, %s2266_s7 }
  0x12   : > { %s1376_s18 = sshll.u32 %s175_s17, 2 }
  0x13   : > { %s2083_s21 = scalar_lea.vmem %s2249_s0, %s1376_s18  ;;  %s206_s23 = sadd.s32 %s1959_s22, %s1375_s16 }
  0x14   : > { %v1886_v0 = vld [vmem:[%s2083_s21 + $0x800] sm:$0xff]  ;;  %s1379_s24 = sshll.u32 %s206_s23, 2  ;;  %v1895_v9 = vld [vmem:[%s2083_s21 + $0x808] sm:$0xff]  ;;  %v1904_v18 = vld [vmem:[%s2083_s21 + $0x810] sm:$0xff] }
  0x15   : > { %v1887_v1 = vld [vmem:[%s2083_s21 + $0x500] sm:$0xff]  ;;  %s2091_s27 = scalar_lea.vmem %s2250_s1, %s1379_s24  ;;  %v1896_v10 = vld [vmem:[%s2083_s21 + $0x508] sm:$0xff]  ;;  %v1905_v19 = vld [vmem:[%s2083_s21 + $0x510] sm:$0xff] }
  0x16   : > { %v1888_v2 = vld [vmem:[%s2083_s21 + $0x200] sm:$0xff]  ;;  %1457 = vst [vmem:[%s2091_s27] sm:$0xff] %v1886_v0  ;;  %v1897_v11 = vld [vmem:[%s2083_s21 + $0x208] sm:$0xff]  ;;  %v1906_v20 = vld [vmem:[%s2083_s21 + $0x210] sm:$0xff] }
  0x17   : > { %v1889_v3 = vld [vmem:[%s2083_s21 + $0x700] sm:$0xff]  ;;  %1463 = vst [vmem:[%s2091_s27 + $0x300] sm:$0xff] %v1887_v1  ;;  %v1898_v12 = vld [vmem:[%s2083_s21 + $0x708] sm:$0xff]  ;;  %v1907_v21 = vld [vmem:[%s2083_s21 + $0x710] sm:$0xff] }
  0x18   : > { %v1890_v4 = vld [vmem:[%s2083_s21 + $0x400] sm:$0xff]  ;;  %1469 = vst [vmem:[%s2091_s27 + $0x600] sm:$0xff] %v1888_v2  ;;  %v1899_v13 = vld [vmem:[%s2083_s21 + $0x408] sm:$0xff]  ;;  %v1908_v22 = vld [vmem:[%s2083_s21 + $0x410] sm:$0xff] }
  0x19   : > { %v1891_v5 = vld [vmem:[%s2083_s21 + $0x100] sm:$0xff]  ;;  %1475 = vst [vmem:[%s2091_s27 + $0x100] sm:$0xff] %v1889_v3  ;;  %v1900_v14 = vld [vmem:[%s2083_s21 + $0x108] sm:$0xff]  ;;  %v1909_v23 = vld [vmem:[%s2083_s21 + $0x110] sm:$0xff] }
  0x1a   : > { %v1892_v6 = vld [vmem:[%s2083_s21 + $0x600] sm:$0xff]  ;;  %1481 = vst [vmem:[%s2091_s27 + $0x400] sm:$0xff] %v1890_v4  ;;  %v1901_v15 = vld [vmem:[%s2083_s21 + $0x608] sm:$0xff]  ;;  %v1910_v24 = vld [vmem:[%s2083_s21 + $0x610] sm:$0xff] }
  0x1b   : > { %v1893_v7 = vld [vmem:[%s2083_s21 + $0x300] sm:$0xff]  ;;  %1487 = vst [vmem:[%s2091_s27 + $0x700] sm:$0xff] %v1891_v5  ;;  %v1902_v16 = vld [vmem:[%s2083_s21 + $0x308] sm:$0xff]  ;;  %v1911_v25 = vld [vmem:[%s2083_s21 + $0x310] sm:$0xff] }
  0x1c   : > { %v1894_v8 = vld [vmem:[%s2083_s21] sm:$0xff]  ;;  %1493 = vst [vmem:[%s2091_s27 + $0x200] sm:$0xff] %v1892_v6  ;;  %v1903_v17 = vld [vmem:[%s2083_s21 + $0x8] sm:$0xff]  ;;  %v1912_v26 = vld [vmem:[%s2083_s21 + $0x10] sm:$0xff] }
  0x1d   : > { %1499 = vst [vmem:[%s2091_s27 + $0x500] sm:$0xff] %v1893_v7  ;;  %v1913_v27 = vld [vmem:[%s2083_s21 + $0x818] sm:$0xff]  ;;  %v1922_v36 = vld [vmem:[%s2083_s21 + $0x820] sm:$0xff]  ;;  %v1931_v45 = vld [vmem:[%s2083_s21 + $0x828] sm:$0xff] }
  0x1e   : > { %1505 = vst [vmem:[%s2091_s27 + $0x800] sm:$0xff] %v1894_v8  ;;  %v1914_v28 = vld [vmem:[%s2083_s21 + $0x518] sm:$0xff]  ;;  %v1923_v37 = vld [vmem:[%s2083_s21 + $0x520] sm:$0xff]  ;;  %v1932_v46 = vld [vmem:[%s2083_s21 + $0x528] sm:$0xff] }
  0x1f   : > { %1511 = vst [vmem:[%s2091_s27 + $0x8] sm:$0xff] %v1895_v9  ;;  %v1915_v29 = vld [vmem:[%s2083_s21 + $0x218] sm:$0xff]  ;;  %v1924_v38 = vld [vmem:[%s2083_s21 + $0x220] sm:$0xff]  ;;  %v1933_v47 = vld [vmem:[%s2083_s21 + $0x228] sm:$0xff] }
  0x20   : > { %1517 = vst [vmem:[%s2091_s27 + $0x308] sm:$0xff] %v1896_v10  ;;  %v1916_v30 = vld [vmem:[%s2083_s21 + $0x718] sm:$0xff]  ;;  %v1925_v39 = vld [vmem:[%s2083_s21 + $0x720] sm:$0xff]  ;;  %v1934_v48 = vld [vmem:[%s2083_s21 + $0x728] sm:$0xff] }
  0x21   : > { %1523 = vst [vmem:[%s2091_s27 + $0x608] sm:$0xff] %v1897_v11  ;;  %v1917_v31 = vld [vmem:[%s2083_s21 + $0x418] sm:$0xff]  ;;  %v1926_v40 = vld [vmem:[%s2083_s21 + $0x420] sm:$0xff]  ;;  %v1935_v49 = vld [vmem:[%s2083_s21 + $0x428] sm:$0xff] }
  0x22   : > { %1529 = vst [vmem:[%s2091_s27 + $0x108] sm:$0xff] %v1898_v12  ;;  %v1918_v32 = vld [vmem:[%s2083_s21 + $0x118] sm:$0xff]  ;;  %v1927_v41 = vld [vmem:[%s2083_s21 + $0x120] sm:$0xff]  ;;  %v1936_v50 = vld [vmem:[%s2083_s21 + $0x128] sm:$0xff] }
  0x23   : > { %1535 = vst [vmem:[%s2091_s27 + $0x408] sm:$0xff] %v1899_v13  ;;  %v1919_v33 = vld [vmem:[%s2083_s21 + $0x618] sm:$0xff]  ;;  %v1928_v42 = vld [vmem:[%s2083_s21 + $0x620] sm:$0xff]  ;;  %v1937_v51 = vld [vmem:[%s2083_s21 + $0x628] sm:$0xff] }
  0x24   : > { %1541 = vst [vmem:[%s2091_s27 + $0x708] sm:$0xff] %v1900_v14  ;;  %v1920_v34 = vld [vmem:[%s2083_s21 + $0x318] sm:$0xff]  ;;  %v1929_v43 = vld [vmem:[%s2083_s21 + $0x320] sm:$0xff]  ;;  %v1938_v52 = vld [vmem:[%s2083_s21 + $0x328] sm:$0xff] }
  0x25   : > { %1547 = vst [vmem:[%s2091_s27 + $0x208] sm:$0xff] %v1901_v15  ;;  %v1921_v35 = vld [vmem:[%s2083_s21 + $0x18] sm:$0xff]  ;;  %v1930_v44 = vld [vmem:[%s2083_s21 + $0x20] sm:$0xff]  ;;  %v1939_v53 = vld [vmem:[%s2083_s21 + $0x28] sm:$0xff] }
  0x26   : > { %1553 = vst [vmem:[%s2091_s27 + $0x508] sm:$0xff] %v1902_v16  ;;  %v1940_v54 = vld [vmem:[%s2083_s21 + $0x830] sm:$0xff]  ;;  %v1949_v63 = vld [vmem:[%s2083_s21 + $0x838] sm:$0xff] }
  0x27   : > { %1559 = vst [vmem:[%s2091_s27 + $0x808] sm:$0xff] %v1903_v17  ;;  %v1941_v55 = vld [vmem:[%s2083_s21 + $0x530] sm:$0xff]  ;;  %v1950_v0 = vld [vmem:[%s2083_s21 + $0x538] sm:$0xff] }
  0x28   : > { %1565 = vst [vmem:[%s2091_s27 + $0x10] sm:$0xff] %v1904_v18  ;;  %v1942_v56 = vld [vmem:[%s2083_s21 + $0x230] sm:$0xff]  ;;  %v1951_v1 = vld [vmem:[%s2083_s21 + $0x238] sm:$0xff] }
  0x29   : > { %1571 = vst [vmem:[%s2091_s27 + $0x310] sm:$0xff] %v1905_v19  ;;  %v1943_v57 = vld [vmem:[%s2083_s21 + $0x730] sm:$0xff]  ;;  %v1952_v2 = vld [vmem:[%s2083_s21 + $0x738] sm:$0xff] }
  0x2a   : > { %1577 = vst [vmem:[%s2091_s27 + $0x610] sm:$0xff] %v1906_v20  ;;  %v1944_v58 = vld [vmem:[%s2083_s21 + $0x430] sm:$0xff]  ;;  %v1953_v3 = vld [vmem:[%s2083_s21 + $0x438] sm:$0xff] }
  0x2b   : > { %1583 = vst [vmem:[%s2091_s27 + $0x110] sm:$0xff] %v1907_v21  ;;  %v1945_v59 = vld [vmem:[%s2083_s21 + $0x130] sm:$0xff]  ;;  %v1954_v4 = vld [vmem:[%s2083_s21 + $0x138] sm:$0xff] }
  0x2c   : > { %1589 = vst [vmem:[%s2091_s27 + $0x410] sm:$0xff] %v1908_v22  ;;  %v1946_v60 = vld [vmem:[%s2083_s21 + $0x630] sm:$0xff]  ;;  %v1955_v5 = vld [vmem:[%s2083_s21 + $0x638] sm:$0xff] }
  0x2d   : > { %1595 = vst [vmem:[%s2091_s27 + $0x710] sm:$0xff] %v1909_v23  ;;  %v1947_v61 = vld [vmem:[%s2083_s21 + $0x330] sm:$0xff]  ;;  %v1956_v6 = vld [vmem:[%s2083_s21 + $0x338] sm:$0xff] }
  0x2e   : > { %1601 = vst [vmem:[%s2091_s27 + $0x210] sm:$0xff] %v1910_v24  ;;  %v1948_v62 = vld [vmem:[%s2083_s21 + $0x30] sm:$0xff]  ;;  %v1957_v7 = vld [vmem:[%s2083_s21 + $0x38] sm:$0xff] }
  0x2f   : > { %1607 = vst [vmem:[%s2091_s27 + $0x510] sm:$0xff] %v1911_v25 }
  0x30   : > { %1613 = vst [vmem:[%s2091_s27 + $0x810] sm:$0xff] %v1912_v26 }
  0x31   : > { %1619 = vst [vmem:[%s2091_s27 + $0x18] sm:$0xff] %v1913_v27 }
  0x32   : > { %1625 = vst [vmem:[%s2091_s27 + $0x318] sm:$0xff] %v1914_v28 }
  0x33   : > { %1631 = vst [vmem:[%s2091_s27 + $0x618] sm:$0xff] %v1915_v29 }
  0x34   : > { %1637 = vst [vmem:[%s2091_s27 + $0x118] sm:$0xff] %v1916_v30 }
  0x35   : > { %1643 = vst [vmem:[%s2091_s27 + $0x418] sm:$0xff] %v1917_v31 }
  0x36   : > { %1649 = vst [vmem:[%s2091_s27 + $0x718] sm:$0xff] %v1918_v32 }
  0x37   : > { %1655 = vst [vmem:[%s2091_s27 + $0x218] sm:$0xff] %v1919_v33 }
  0x38   : > { %1661 = vst [vmem:[%s2091_s27 + $0x518] sm:$0xff] %v1920_v34 }
  0x39   : > { %1667 = vst [vmem:[%s2091_s27 + $0x818] sm:$0xff] %v1921_v35 }
  0x3a   : > { %1673 = vst [vmem:[%s2091_s27 + $0x20] sm:$0xff] %v1922_v36 }
  0x3b   : > { %1679 = vst [vmem:[%s2091_s27 + $0x320] sm:$0xff] %v1923_v37 }
  0x3c   : > { %1685 = vst [vmem:[%s2091_s27 + $0x620] sm:$0xff] %v1924_v38 }
  0x3d   : > { %1691 = vst [vmem:[%s2091_s27 + $0x120] sm:$0xff] %v1925_v39 }
  0x3e   : > { %1697 = vst [vmem:[%s2091_s27 + $0x420] sm:$0xff] %v1926_v40 }
  0x3f   : > { %1703 = vst [vmem:[%s2091_s27 + $0x720] sm:$0xff] %v1927_v41 }
  0x40   : > { %1709 = vst [vmem:[%s2091_s27 + $0x220] sm:$0xff] %v1928_v42 }
  0x41   : > { %1715 = vst [vmem:[%s2091_s27 + $0x520] sm:$0xff] %v1929_v43 }
  0x42   : > { %1721 = vst [vmem:[%s2091_s27 + $0x820] sm:$0xff] %v1930_v44 }
  0x43   : > { %1727 = vst [vmem:[%s2091_s27 + $0x28] sm:$0xff] %v1931_v45 }
  0x44   : > { %1733 = vst [vmem:[%s2091_s27 + $0x328] sm:$0xff] %v1932_v46 }
  0x45   : > { %1739 = vst [vmem:[%s2091_s27 + $0x628] sm:$0xff] %v1933_v47 }
  0x46   : > { %1745 = vst [vmem:[%s2091_s27 + $0x128] sm:$0xff] %v1934_v48 }
  0x47   : > { %1751 = vst [vmem:[%s2091_s27 + $0x428] sm:$0xff] %v1935_v49 }
  0x48   : > { %1757 = vst [vmem:[%s2091_s27 + $0x728] sm:$0xff] %v1936_v50 }
  0x49   : > { %1763 = vst [vmem:[%s2091_s27 + $0x228] sm:$0xff] %v1937_v51 }
  0x4a   : > { %1769 = vst [vmem:[%s2091_s27 + $0x528] sm:$0xff] %v1938_v52 }
  0x4b   : > { %1775 = vst [vmem:[%s2091_s27 + $0x828] sm:$0xff] %v1939_v53 }
  0x4c   : > { %1781 = vst [vmem:[%s2091_s27 + $0x30] sm:$0xff] %v1940_v54 }
  0x4d   : > { %1787 = vst [vmem:[%s2091_s27 + $0x330] sm:$0xff] %v1941_v55 }
  0x4e   : > { %1793 = vst [vmem:[%s2091_s27 + $0x630] sm:$0xff] %v1942_v56 }
  0x4f   : > { %1799 = vst [vmem:[%s2091_s27 + $0x130] sm:$0xff] %v1943_v57 }
  0x50   : > { %1805 = vst [vmem:[%s2091_s27 + $0x430] sm:$0xff] %v1944_v58 }
  0x51   : > { %1811 = vst [vmem:[%s2091_s27 + $0x730] sm:$0xff] %v1945_v59 }
  0x52   : > { %1817 = vst [vmem:[%s2091_s27 + $0x230] sm:$0xff] %v1946_v60 }
  0x53   : > { %1823 = vst [vmem:[%s2091_s27 + $0x530] sm:$0xff] %v1947_v61 }
  0x54   : > { %1829 = vst [vmem:[%s2091_s27 + $0x830] sm:$0xff] %v1948_v62 }
  0x55   : > { %1835 = vst [vmem:[%s2091_s27 + $0x38] sm:$0xff] %v1949_v63 }
  0x56   : > { %1841 = vst [vmem:[%s2091_s27 + $0x338] sm:$0xff] %v1950_v0 }
  0x57   : > { %1847 = vst [vmem:[%s2091_s27 + $0x638] sm:$0xff] %v1951_v1 }
  0x58   : > { %1853 = vst [vmem:[%s2091_s27 + $0x138] sm:$0xff] %v1952_v2 }
  0x59   : > { %1859 = vst [vmem:[%s2091_s27 + $0x438] sm:$0xff] %v1953_v3 }
  0x5a   : > { %1865 = vst [vmem:[%s2091_s27 + $0x738] sm:$0xff] %v1954_v4 }
  0x5b   : > { %1871 = vst [vmem:[%s2091_s27 + $0x238] sm:$0xff] %v1955_v5 }
  0x5c   : > { %1877 = vst [vmem:[%s2091_s27 + $0x538] sm:$0xff] %v1956_v6 }
  0x5d   : > { %1883 = vst [vmem:[%s2091_s27 + $0x838] sm:$0xff] %v1957_v7 }
  0x5e PF: > { %s7_s10 = sadd.s32 1, %s2038_s10   ;;  %s2251_s6 = smov %s2030_s8 }
  0x5f   : > { %p4_p8 = scmp.ge.s32.totalorder %s7_s10, 14   ;;  %s2252_s7 = smov %s2034_s9 }
  0x60   : > { %s2253_s8 = smov %s2256_s11  ;;  %s2254_s9 = smov %s2260_s12 }
  0x61   :  { %6 = sbr.rel (!%p4_p8) target bundleno = 3 (0x3), region = 399 }

// kernel: resnet3d_forward.18
= control target key start
LH: loop header
LB: loop body
LE: loop exit
PB: predicated region body
PF: predicated region fallthrough
CT: control target
= control target key end

     0   :  { %s94_s0 = inlined_call_operand.vmem [shape: f32[16,256], index: 0, kind: input, shape index: {}]   ;;  %s95_s1 = inlined_call_operand.vmem [shape: f32[1,256], index: 1, kind: input, shape index: {}]   ;;  %s96_s2 = inlined_call_operand.vmem [shape: f32[1,256], index: 2, kind: input, shape index: {}]   ;;  %s97_s3 = inlined_call_operand.vmem [shape: bf16[16,256], index: 3, kind: output, shape index: {}]  }
   0x1   :  { %v14_v0 = vld [vmem:[%s94_s0] sm:$0xff]  ;;  %v15_v1 = vld [vmem:[%s94_s0 + $0x8] sm:$0xff]  ;;  %v16_v6 = vld [vmem:[%s94_s0 + $0x10] sm:$0xff] }
   0x2   :  { %v18_v2 = vld [vmem:[%s95_s1] sm:$0x3]  ;;  %v17_v7 = vld [vmem:[%s94_s0 + $0x18] sm:$0xff] }
   0x3   :  { %v20_v3 = vperm.slane %v18_v2, 0  ;;  %v21_v4 = vperm.slane %v18_v2, 1  ;;  %v28_v5 = vld [vmem:[%s96_s2] sm:$0x3] }
   0x4   :  { %v30_v8 = vperm.slane %v28_v5, 0  ;;  %v31_v9 = vperm.slane %v28_v5, 1 }
   0x5   :  { %v24_v10 = vmul.f32 %v20_v3, %v14_v0  ;;  %v25_v11 = vmul.f32 %v21_v4, %v15_v1  ;;  %v26_v12 = vmul.f32 %v20_v3, %v16_v6  ;;  %v27_v13 = vmul.f32 %v21_v4, %v17_v7 }
   0x7   :  { %v34_v14 = vadd.f32 %v30_v8, %v24_v10  ;;  %v35_v15 = vadd.f32 %v31_v9, %v25_v11  ;;  %v36_v16 = vadd.f32 %v30_v8, %v26_v12  ;;  %v37_v17 = vadd.f32 %v31_v9, %v27_v13 }
   0x9   :  { %v38_v18 = vmax.f32 %v34_v14, 0.0  ;;  %v39_v19 = vmax.f32 %v35_v15, 0.0  ;;  %v40_v20 = vmax.f32 %v36_v16, 0.0  ;;  %v41_v21 = vmax.f32 %v37_v17, 0.0 }
   0xb   :  { %v42_v22 = vpack.c.bf16 %v39_v19, %v38_v18  ;;  %v43_v23 = vpack.c.bf16 %v41_v21, %v40_v20 }
   0xd   :  { %44 = vst [vmem:[%s97_s3] sm:$0xff] %v42_v22 }
   0xe   :  { %45 = vst [vmem:[%s97_s3 + $0x8] sm:$0xff] %v43_v23 }

// kernel: resnet3d_forward.19
= control target key start
LH: loop header
LB: loop body
LE: loop exit
PB: predicated region body
PF: predicated region fallthrough
CT: control target
= control target key end

     0   :  { %s790_s15 = smov 0   ;;  %s792_s16 = smov 0   ;;  %s891_s0 = inlined_call_operand.vmem [shape: bf16[16,128], index: 0, kind: input, shape index: {}]   ;;  %s892_s1 = inlined_call_operand.vmem [shape: bf16[128,256], index: 1, kind: input, shape index: {}]   ;;  %s893_s2 = inlined_call_operand.vmem [shape: f32[1,256], index: 2, kind: input, shape index: {}]   ;;  %s894_s3 = inlined_call_operand.vmem [shape: f32[1,256], index: 3, kind: input, shape index: {}]   ;;  %s895_s4 = inlined_call_operand.vmem [shape: bf16[16,256], index: 4, kind: output, shape index: {}]  }
   0x1   :  { %s794_s17 = smov 0   ;;  %s796_s18 = smov 0  }
   0x2   :  { %s798_s19 = smov 0  }
   0x3 LB: > { %s23_s20 = sadd.s32 1, %s759_s18  ;;  %s619_s21 = sadd.s32 4294967295, %s763_s19   ;;  %s763_s19 = sphi %s798_s19, %s14_s19   ;;  %s759_s18 = sphi %s796_s18, %s900_s18   ;;  %s755_s17 = sphi %s794_s17, %s899_s17   ;;  %s751_s16 = sphi %s792_s16, %s898_s16   ;;  %s747_s15 = sphi %s790_s15, %s897_s15  }
   0x4   : > { %p24_p0 = scmp.ge.s32.totalorder %s23_s20, 2  ;;  %p66_p1 = scmp.ne.s32.totalorder %s751_s16, %s747_s15 }
   0x5   : > { %p67_p2 = scmp.eq.s32.totalorder %s763_s19, 0  ;;  %p150_p4 = scmp.eq.s32.totalorder %s619_s21, 1 }
   0x6   : > { %s902_s20 = smov (%p24_p0, %s23_s20), 0  ;;  %s59_s23 = sadd.s32 1, %s751_s16 }
   0x7   : > { %p68_p3 = por %p67_p2, %p66_p1  ;;  %s56_s22 = ssub.s32 %s759_s18, %s902_s20 }
   0x8   : > { %p57_p5 = scmp.eq.s32.totalorder %s56_s22, 0  ;;  %p825_p6 = por %p150_p4, %p66_p1 }
   0x9   : > { %p623_p7 = scmp.ge.s32.totalorder %s763_s19, 2 }
   0xa   : > { %s830_s25 = scalar_select %p57_p5, %s751_s16, %s59_s23  }
   0xb   : > { %181 = sbr.rel (%p623_p7) target bundleno = 36 (0x24), region = 20 }
  0x10   : > { %184 = sbr.rel (!%p68_p3) target bundleno = 36 (0x24), region = 24  ;;  %s186_s26 = sand.u32 (%p68_p3), 1, %s751_s16  }
  0x11   : > { %s625_s27 = sshll.u32 (%p68_p3), %s759_s18, 2  ;;  %s624_s28 = sshll.u32 (%p68_p3), %s186_s26, 6 }
  0x12   : > { %s838_s5 = scalar_lea.vmem (%p68_p3), %s892_s1, %s625_s27  ;;  %s188_s6 = scalar_lea.vmem (%p68_p3), [#allocation2], %s624_s28 }
  0x13   : > { %v207_v0 = vld [vmem:[%s838_s5] sm:$0xf] (%p68_p3)  ;;  %v209_v1 = vld [vmem:[%s838_s5 + $0x8] sm:$0xf] (%p68_p3)  ;;  %v211_v2 = vld [vmem:[%s838_s5 + $0x10] sm:$0xf] (%p68_p3) }
  0x14   : > { %208 = vst [vmem:[%s188_s6] sm:$0xf] (%p68_p3), %v207_v0  ;;  %v213_v3 = vld [vmem:[%s838_s5 + $0x18] sm:$0xf] (%p68_p3)  ;;  %v215_v4 = vld [vmem:[%s838_s5 + $0x20] sm:$0xf] (%p68_p3) }
  0x15   : > { %210 = vst [vmem:[%s188_s6 + $0x4] sm:$0xf] %v209_v1  ;;  %v217_v5 = vld [vmem:[%s838_s5 + $0x28] sm:$0xf]  ;;  %v219_v6 = vld [vmem:[%s838_s5 + $0x30] sm:$0xf] }
  0x16   : > { %212 = vst [vmem:[%s188_s6 + $0x8] sm:$0xf] %v211_v2  ;;  %v221_v7 = vld [vmem:[%s838_s5 + $0x38] sm:$0xf]  ;;  %v223_v8 = vld [vmem:[%s838_s5 + $0x40] sm:$0xf] }
  0x17   : > { %214 = vst [vmem:[%s188_s6 + $0xc] sm:$0xf] %v213_v3  ;;  %v225_v9 = vld [vmem:[%s838_s5 + $0x48] sm:$0xf]  ;;  %v227_v10 = vld [vmem:[%s838_s5 + $0x50] sm:$0xf] }
  0x18   : > { %216 = vst [vmem:[%s188_s6 + $0x10] sm:$0xf] %v215_v4  ;;  %v229_v11 = vld [vmem:[%s838_s5 + $0x58] sm:$0xf]  ;;  %v231_v12 = vld [vmem:[%s838_s5 + $0x60] sm:$0xf] }
  0x19   : > { %218 = vst [vmem:[%s188_s6 + $0x14] sm:$0xf] %v217_v5  ;;  %v233_v13 = vld [vmem:[%s838_s5 + $0x68] sm:$0xf]  ;;  %v235_v14 = vld [vmem:[%s838_s5 + $0x70] sm:$0xf] }
  0x1a   : > { %220 = vst [vmem:[%s188_s6 + $0x18] sm:$0xf] %v219_v6  ;;  %v237_v15 = vld [vmem:[%s838_s5 + $0x78] sm:$0xf] }
  0x1b   : > { %222 = vst [vmem:[%s188_s6 + $0x1c] sm:$0xf] %v221_v7 }
  0x1c   : > { %224 = vst [vmem:[%s188_s6 + $0x20] sm:$0xf] %v223_v8 }
  0x1d   : > { %226 = vst [vmem:[%s188_s6 + $0x24] sm:$0xf] %v225_v9 }
  0x1e   : > { %228 = vst [vmem:[%s188_s6 + $0x28] sm:$0xf] %v227_v10 }
  0x1f   : > { %230 = vst [vmem:[%s188_s6 + $0x2c] sm:$0xf] %v229_v11 }
  0x20   : > { %232 = vst [vmem:[%s188_s6 + $0x30] sm:$0xf] %v231_v12 }
  0x21   : > { %234 = vst [vmem:[%s188_s6 + $0x34] sm:$0xf] %v233_v13 }
  0x22   : > { %236 = vst [vmem:[%s188_s6 + $0x38] sm:$0xf] %v235_v14 }
  0x23   : > { %238 = vst [vmem:[%s188_s6 + $0x3c] sm:$0xf] %v237_v15 }
  0x24 PF: > { %p626_p8 = scmp.ge.s32.totalorder %s763_s19, 1  ;;  %p305_p9 = scmp.lt.s32.totalorder %s763_s19, 3 }
  0x26   : > { %p306_p10 = pnand %p626_p8, %p305_p9 }
  0x27   : > { %s312_s7 = sand.u32 (!%p306_p10), 1, %s747_s15   ;;  %p353_p11 = scmp.lt.s32.totalorder (!%p306_p10), %s755_s17, 1 }
  0x28   : > { %309 = sbr.rel (%p306_p10) target bundleno = 227 (0xe3), region = 73  ;;  %s627_s8 = sshll.u32 (!%p306_p10), %s312_s7, 6 }
  0x29   : > { %s314_s9 = scalar_lea.vmem (!%p306_p10), [#allocation2], %s627_s8  ;;  %s628_s26 = sshll.u32 (!%p306_p10), %s312_s7, 3 }
  0x2a   : > { %s346_s27 = scalar_lea.vmem (!%p306_p10), [#allocation3], %s628_s26 }
  0x2d   : > { %v677_v16 = vld [vmem:[%s314_s9 + $0x38] sm:$0xff]  ;;  %s354_s10 = scalar_select %p353_p11, %s755_s17, 1  ;;  %v676_v17 = vld [vmem:[%s314_s9 + $0x30] sm:$0xff]  ;;  %v675_v18 = vld [vmem:[%s314_s9 + $0x28] sm:$0xff] }
  0x2e   : > { %432 = vmatpush.bf16.msra.mxu0 %v677_v16  ;;  %v674_v19 = vld [vmem:[%s314_s9 + $0x20] sm:$0xff]  ;;  %v673_v20 = vld [vmem:[%s314_s9 + $0x18] sm:$0xff]  ;;  %v672_v21 = vld [vmem:[%s314_s9 + $0x10] sm:$0xff]  ;;  %s666_s28 = sshll.u32 (%p825_p6), %s755_s17, 2 }
  0x2f   : > { %s355_s13 = scalar_lea.vmem %s893_s2, %s354_s10  ;;  %s358_s22 = scalar_lea.vmem %s894_s3, %s354_s10  ;;  %v671_v22 = vld [vmem:[%s314_s9 + $0x8] sm:$0xff]  ;;  %v670_v23 = vld [vmem:[%s314_s9] sm:$0xff] }
  0x30   : > { %v669_v24 = vld [vmem:[%s891_s0] sm:$0xff]  ;;  %s473_s5 = scalar_lea.vmem (%p825_p6), %s895_s4, %s666_s28 }
  0x31   : > { %v723_v26 = vld [vmem:[%s355_s13] ss:$0 sm:$0xff] }
  0x32   : > { %433 = vmatpush.bf16.msra.mxu0 %v676_v17  ;;  %v724_v28 = vld [vmem:[%s358_s22] ss:$0 sm:$0xff] }
  0x36   : > { %434 = vmatpush.bf16.msra.mxu0 %v675_v18 }
  0x3a   : > { %435 = vmatpush.bf16.msra.mxu0 %v674_v19 }
  0x3e   : > { %436 = vmatpush.bf16.msra.mxu0 %v673_v20 }
  0x42   : > { %437 = vmatpush.bf16.msra.mxu0 %v672_v21 }
  0x46   : > { %438 = vmatpush.bf16.msra.mxu0 %v671_v22 }
  0x4a   : > { %439 = vmatpush.bf16.msra.mxu0 %v670_v23 }
  0x4d   : > { %440 = vmatmul.bf16.vlgmr.msra.gmra.mxu0 %v669_v24 }
  0xca   : > { %v441_v25 = vpop.f32.mrf.mxu0 }
  0xcb   : > { %v450_v27 = vmul.f32 %v723_v26, %v441_v25 }
  0xcd   : > { %v456_v31 = vadd.f32 %v724_v28, %v450_v27 }
  0xd2   : > { %v443_v29 = vpop.f32.mrf.mxu0 }
  0xd3   : > { %v451_v30 = vmul.f32 %v723_v26, %v443_v29 }
  0xd5   : > { %v457_v32 = vadd.f32 %v724_v28, %v451_v30  ;;  %468 = sbr.rel (!%p825_p6) target bundleno = 227 (0xe3), region = 81 }
  0xd7   : > { %v681_v33 = vpack.c.bf16 %v457_v32, %v456_v31 }
  0xd9   : > { %682 = vst [vmem:[%s346_s27] sm:$0xff] %v681_v33  }
  0xe0   : > { %v490_v34 = vld [vmem:[%s346_s27] sm:$0xf]  ;;  %v492_v35 = vld [vmem:[%s346_s27 + $0x4] sm:$0xf] }
  0xe1   : > { %491 = vst [vmem:[%s473_s5] sm:$0xf] %v490_v34 }
  0xe2   : > { %493 = vst [vmem:[%s473_s5 + $0x8] sm:$0xf] %v492_v35 }
  0xe3 PF: > { %s14_s19 = sadd.s32 1, %s763_s19   ;;  %s897_s15 = smov %s751_s16 }
  0xe4   : > { %p11_p12 = scmp.ge.s32.totalorder %s14_s19, 4   ;;  %s898_s16 = smov %s830_s25 }
  0xe5   : > { %s899_s17 = smov %s759_s18  ;;  %s900_s18 = smov %s902_s20 }
  0xe6   :  { %13 = sbr.rel (!%p11_p12) target bundleno = 3 (0x3), region = 162 }

// kernel: resnet3d_forward.20
= control target key start
LH: loop header
LB: loop body
LE: loop exit
PB: predicated region body
PF: predicated region fallthrough
CT: control target
= control target key end

     0   :  { %s118_s0 = inlined_call_operand.vmem [shape: f32[16,256], index: 0, kind: input, shape index: {}]   ;;  %s119_s1 = inlined_call_operand.vmem [shape: f32[1,256], index: 1, kind: input, shape index: {}]   ;;  %s120_s2 = inlined_call_operand.vmem [shape: f32[1,256], index: 2, kind: input, shape index: {}]   ;;  %s121_s3 = inlined_call_operand.vmem [shape: bf16[16,256], index: 3, kind: input, shape index: {}]   ;;  %s122_s4 = inlined_call_operand.vmem [shape: bf16[16,256], index: 4, kind: output, shape index: {}]  }
   0x1   :  { %v17_v0 = vld [vmem:[%s118_s0] sm:$0xff]  ;;  %v18_v1 = vld [vmem:[%s118_s0 + $0x8] sm:$0xff]  ;;  %v19_v7 = vld [vmem:[%s118_s0 + $0x10] sm:$0xff] }
   0x2   :  { %v21_v2 = vld [vmem:[%s119_s1] sm:$0x3]  ;;  %v20_v12 = vld [vmem:[%s118_s0 + $0x18] sm:$0xff]  ;;  %v42_v13 = vld [vmem:[%s121_s3 + $0x8] sm:$0xff] }
   0x3   :  { %v23_v3 = vperm.slane %v21_v2, 0  ;;  %v24_v4 = vperm.slane %v21_v2, 1  ;;  %v31_v5 = vld [vmem:[%s120_s2] sm:$0x3]  ;;  %v45_v18 = vunpack.c.l.bf16 %v42_v13  ;;  %v46_v19 = vunpack.c.h.bf16 %v42_v13 }
   0x4   :  { %v41_v6 = vld [vmem:[%s121_s3] sm:$0xff]  ;;  %v33_v8 = vperm.slane %v31_v5, 0  ;;  %v34_v9 = vperm.slane %v31_v5, 1 }
   0x5   :  { %v43_v10 = vunpack.c.l.bf16 %v41_v6  ;;  %v44_v11 = vunpack.c.h.bf16 %v41_v6  ;;  %v27_v14 = vmul.f32 %v23_v3, %v17_v0  ;;  %v28_v15 = vmul.f32 %v24_v4, %v18_v1 }
   0x6   :  { %v29_v16 = vmul.f32 %v23_v3, %v19_v7  ;;  %v30_v17 = vmul.f32 %v24_v4, %v20_v12 }
   0x7   :  { %v37_v20 = vadd.f32 %v33_v8, %v27_v14  ;;  %v38_v21 = vadd.f32 %v34_v9, %v28_v15 }
   0x8   :  { %v39_v22 = vadd.f32 %v33_v8, %v29_v16  ;;  %v40_v23 = vadd.f32 %v34_v9, %v30_v17 }
   0x9   :  { %v47_v24 = vadd.f32 %v43_v10, %v37_v20  ;;  %v48_v25 = vadd.f32 %v44_v11, %v38_v21 }
   0xa   :  { %v49_v26 = vadd.f32 %v45_v18, %v39_v22  ;;  %v50_v27 = vadd.f32 %v46_v19, %v40_v23 }
   0xb   :  { %v51_v28 = vmax.f32 %v47_v24, 0.0  ;;  %v52_v29 = vmax.f32 %v48_v25, 0.0 }
   0xc   :  { %v53_v30 = vmax.f32 %v49_v26, 0.0  ;;  %v54_v31 = vmax.f32 %v50_v27, 0.0 }
   0xd   :  { %v55_v32 = vpack.c.bf16 %v52_v29, %v51_v28 }
   0xe   :  { %v56_v33 = vpack.c.bf16 %v54_v31, %v53_v30 }
   0xf   :  { %57 = vst [vmem:[%s122_s4] sm:$0xff] %v55_v32 }
  0x10   :  { %58 = vst [vmem:[%s122_s4 + $0x8] sm:$0xff] %v56_v33 }

// kernel: reverse.3
= control target key start
LH: loop header
LB: loop body
LE: loop exit
PB: predicated region body
PF: predicated region fallthrough
CT: control target
= control target key end

     0   :  { %s2185_s6 = smov 0   ;;  %s2187_s7 = smov 0   ;;  %s2503_s0 = inlined_call_operand.vmem [shape: bf16[3,3,3,256,512], index: 0, kind: input, shape index: {}]   ;;  %s2504_s1 = inlined_call_operand.vmem [shape: bf16[3,3,3,256,512], index: 1, kind: output, shape index: {}]  }
   0x1   :  { %s2189_s8 = smov 0   ;;  %s2191_s9 = smov 0  }
   0x2   :  { %s2193_s10 = smov 0   ;;  %s2195_s11 = smov 0  }
   0x3   :  { %s2197_s12 = smov 0   ;;  %s2199_s13 = smov 0  }
   0x4   :  { %s2201_s14 = smov 0   ;;  %s2203_s15 = smov 0  }
   0x5   :  { %s2205_s16 = smov 0   ;;  %s2207_s17 = smov 0  }
   0x6   :  { %s2209_s18 = smov 0   ;;  %s2211_s19 = smov 0  }
   0x7   :  { %s2213_s20 = smov 0   ;;  %s2215_s21 = smov 0  }
   0x8   :  { %s2217_s22 = smov 0   ;;  %s2219_s23 = smov 0  }
   0x9   :  { %s2221_s24 = smov 0  }
   0xa LB: > { %s80_s25 = sadd.s32 1, %s2161_s21  ;;  %s84_s26 = sadd.s32 1, %s2165_s22  ;;  %s2173_s24 = sphi %s2221_s24, %s7_s24   ;;  %s2169_s23 = sphi %s2219_s23, %s2523_s23   ;;  %s2165_s22 = sphi %s2217_s22, %s2522_s22   ;;  %s2161_s21 = sphi %s2215_s21, %s2521_s21   ;;  %s2157_s20 = sphi %s2213_s20, %s2520_s20   ;;  %s2153_s19 = sphi %s2211_s19, %s2519_s19   ;;  %s2149_s18 = sphi %s2209_s18, %s2518_s18   ;;  %s2145_s17 = sphi %s2207_s17, %s2517_s17   ;;  %s2141_s16 = sphi %s2205_s16, %s2516_s16   ;;  %s2137_s15 = sphi %s2203_s15, %s2515_s15   ;;  %s2133_s14 = sphi %s2201_s14, %s2514_s14   ;;  %s2129_s13 = sphi %s2199_s13, %s2513_s13   ;;  %s2125_s12 = sphi %s2197_s12, %s2512_s12   ;;  %s2121_s11 = sphi %s2195_s11, %s2511_s11   ;;  %s2117_s10 = sphi %s2193_s10, %s2510_s10   ;;  %s2113_s9 = sphi %s2191_s9, %s2509_s9   ;;  %s2109_s8 = sphi %s2189_s8, %s2508_s8   ;;  %s2105_s7 = sphi %s2187_s7, %s2507_s7   ;;  %s2101_s6 = sphi %s2185_s6, %s2506_s6  }
   0xb   : > { %p82_p0 = scmp.ge.s32.totalorder %s80_s25, 3  ;;  %p1348_p1 = scmp.ge.s32.totalorder %s2173_s24, 5 }
   0xc   : > { %p134_p2 = scmp.lt.s32.totalorder %s2173_s24, 32  ;;  %s88_s27 = sadd.s32 1, %s2169_s23 }
   0xd   : > { %s2525_s25 = smov (%p82_p0, %s80_s25), 0  ;;  %s2527_s26 = smov (!%p82_p0, %s84_s26), %s2165_s22 }
   0xe   : > { %p135_p3 = pnand %p1348_p1, %p134_p2  ;;  %p86_p4 = scmp.ge.s32.totalorder %s2527_s26, 3 }
   0xf   : > { %s189_s28 = ssub.s32 (!%p135_p3), 2, %s2109_s8  ;;  %s190_s29 = ssub.s32 (!%p135_p3), 2, %s2105_s7 }
  0x10   : > { %s2529_s26 = smov (%p86_p4, %s2527_s26), 0  ;;  %s2531_s27 = smov (!%p86_p4, %s88_s27), %s2169_s23 }
  0x11   : > { %p90_p5 = scmp.ge.s32.totalorder %s2531_s27, 3  ;;  %138 = sbr.rel (%p135_p3) target bundleno = 98 (0x62), region = 20 }
  0x12   : > { %s191_s30 = ssub.s32 (!%p135_p3), 2, %s2101_s6  ;;  %p194_p6 = scmp.lt.s32.totalorder (!%p135_p3), %s189_s28, 2 }
  0x13   : > { %s2533_s27 = smov (%p90_p5, %s2531_s27), 0  ;;  %p196_p7 = scmp.lt.s32.totalorder (!%p135_p3), %s190_s29, 2 }
  0x14   : > { %p198_p8 = scmp.lt.s32.totalorder (!%p135_p3), %s191_s30, 2  ;;  %p221_p9 = scmp.lt.s32.totalorder (!%p135_p3), %s2109_s8, 2 }
  0x15   : > { %p223_p10 = scmp.lt.s32.totalorder (!%p135_p3), %s2105_s7, 2  ;;  %p225_p11 = scmp.lt.s32.totalorder (!%p135_p3), %s2101_s6, 2 }
  0x16   : > { %s2535_s28 = smov (!%p194_p6, %s189_s28), 2  ;;  %s2537_s29 = smov (!%p196_p7, %s190_s29), 2 }
  0x17   : > { %s2539_s30 = smov (!%p198_p8, %s191_s30), 2  ;;  %s1867_s2 = smul.u32 384, %s2537_s29 }
  0x18   : > { %s1349_s3 = sshll.u32 %s2539_s30, 7  ;;  %s1868_s4 = smul.u32 1152, %s2535_s28 }
  0x19   : > { %s209_s5 = sadd.s32 %s1867_s2, %s1349_s3  ;;  %s2541_s8 = smov (!%p221_p9, %s2109_s8), 2 }
  0x1a   : > { %s211_s28 = sadd.s32 %s1868_s4, %s209_s5  ;;  %s2543_s7 = smov (!%p223_p10, %s2105_s7), 2 }
  0x1b   : > { %s1350_s29 = sshll.u32 %s211_s28, 2  ;;  %s2545_s6 = smov (!%p225_p11, %s2101_s6), 2 }
  0x1c   : > { %s2302_s3 = scalar_lea.vmem %s2503_s0, %s1350_s29  ;;  %s1869_s7 = smul.u32 384, %s2543_s7 }
  0x1d   : > { %s1351_s6 = sshll.u32 %s2545_s6, 7  ;;  %s1870_s8 = smul.u32 1152, %s2541_s8  ;;  %v1803_v0 = vld [vmem:[%s2302_s3] sm:$0xff]  ;;  %v1804_v1 = vld [vmem:[%s2302_s3 + $0x10] sm:$0xff]  ;;  %v1835_v32 = vld [vmem:[%s2302_s3 + $0x8] sm:$0xff] }
  0x1e   : > { %s236_s4 = sadd.s32 %s1869_s7, %s1351_s6  ;;  %v1805_v2 = vld [vmem:[%s2302_s3 + $0x20] sm:$0xff]  ;;  %v1806_v3 = vld [vmem:[%s2302_s3 + $0x30] sm:$0xff]  ;;  %v1836_v33 = vld [vmem:[%s2302_s3 + $0x18] sm:$0xff] }
  0x1f   : > { %s238_s5 = sadd.s32 %s1870_s8, %s236_s4  ;;  %v1807_v4 = vld [vmem:[%s2302_s3 + $0x40] sm:$0xff]  ;;  %v1808_v5 = vld [vmem:[%s2302_s3 + $0x50] sm:$0xff]  ;;  %v1837_v34 = vld [vmem:[%s2302_s3 + $0x28] sm:$0xff] }
  0x20   : > { %s1352_s28 = sshll.u32 %s238_s5, 2  ;;  %v1809_v6 = vld [vmem:[%s2302_s3 + $0x60] sm:$0xff]  ;;  %v1810_v7 = vld [vmem:[%s2302_s3 + $0x70] sm:$0xff]  ;;  %v1838_v35 = vld [vmem:[%s2302_s3 + $0x38] sm:$0xff] }
  0x21   : > { %s2313_s2 = scalar_lea.vmem %s2504_s1, %s1352_s28  ;;  %v1811_v8 = vld [vmem:[%s2302_s3 + $0x80] sm:$0xff]  ;;  %v1812_v9 = vld [vmem:[%s2302_s3 + $0x90] sm:$0xff]  ;;  %v1839_v36 = vld [vmem:[%s2302_s3 + $0x48] sm:$0xff] }
  0x22   : > { %1390 = vst [vmem:[%s2313_s2] sm:$0xff] %v1803_v0  ;;  %v1813_v10 = vld [vmem:[%s2302_s3 + $0xa0] sm:$0xff]  ;;  %v1814_v11 = vld [vmem:[%s2302_s3 + $0xb0] sm:$0xff]  ;;  %v1840_v37 = vld [vmem:[%s2302_s3 + $0x58] sm:$0xff] }
  0x23   : > { %1396 = vst [vmem:[%s2313_s2 + $0x10] sm:$0xff] %v1804_v1  ;;  %v1815_v12 = vld [vmem:[%s2302_s3 + $0xc0] sm:$0xff]  ;;  %v1816_v13 = vld [vmem:[%s2302_s3 + $0xd0] sm:$0xff]  ;;  %v1841_v38 = vld [vmem:[%s2302_s3 + $0x68] sm:$0xff] }
  0x24   : > { %1402 = vst [vmem:[%s2313_s2 + $0x20] sm:$0xff] %v1805_v2  ;;  %v1817_v14 = vld [vmem:[%s2302_s3 + $0xe0] sm:$0xff]  ;;  %v1818_v15 = vld [vmem:[%s2302_s3 + $0xf0] sm:$0xff]  ;;  %v1842_v39 = vld [vmem:[%s2302_s3 + $0x78] sm:$0xff] }
  0x25   : > { %1408 = vst [vmem:[%s2313_s2 + $0x30] sm:$0xff] %v1806_v3  ;;  %v1819_v16 = vld [vmem:[%s2302_s3 + $0x100] sm:$0xff]  ;;  %v1820_v17 = vld [vmem:[%s2302_s3 + $0x110] sm:$0xff]  ;;  %v1843_v40 = vld [vmem:[%s2302_s3 + $0x88] sm:$0xff] }
  0x26   : > { %1414 = vst [vmem:[%s2313_s2 + $0x40] sm:$0xff] %v1807_v4  ;;  %v1821_v18 = vld [vmem:[%s2302_s3 + $0x120] sm:$0xff]  ;;  %v1822_v19 = vld [vmem:[%s2302_s3 + $0x130] sm:$0xff]  ;;  %v1844_v41 = vld [vmem:[%s2302_s3 + $0x98] sm:$0xff] }
  0x27   : > { %1420 = vst [vmem:[%s2313_s2 + $0x50] sm:$0xff] %v1808_v5  ;;  %v1823_v20 = vld [vmem:[%s2302_s3 + $0x140] sm:$0xff]  ;;  %v1824_v21 = vld [vmem:[%s2302_s3 + $0x150] sm:$0xff]  ;;  %v1845_v42 = vld [vmem:[%s2302_s3 + $0xa8] sm:$0xff] }
  0x28   : > { %1426 = vst [vmem:[%s2313_s2 + $0x60] sm:$0xff] %v1809_v6  ;;  %v1825_v22 = vld [vmem:[%s2302_s3 + $0x160] sm:$0xff]  ;;  %v1826_v23 = vld [vmem:[%s2302_s3 + $0x170] sm:$0xff]  ;;  %v1846_v43 = vld [vmem:[%s2302_s3 + $0xb8] sm:$0xff] }
  0x29   : > { %1432 = vst [vmem:[%s2313_s2 + $0x70] sm:$0xff] %v1810_v7  ;;  %v1827_v24 = vld [vmem:[%s2302_s3 + $0x180] sm:$0xff]  ;;  %v1828_v25 = vld [vmem:[%s2302_s3 + $0x190] sm:$0xff]  ;;  %v1847_v44 = vld [vmem:[%s2302_s3 + $0xc8] sm:$0xff] }
  0x2a   : > { %1438 = vst [vmem:[%s2313_s2 + $0x80] sm:$0xff] %v1811_v8  ;;  %v1829_v26 = vld [vmem:[%s2302_s3 + $0x1a0] sm:$0xff]  ;;  %v1830_v27 = vld [vmem:[%s2302_s3 + $0x1b0] sm:$0xff]  ;;  %v1848_v45 = vld [vmem:[%s2302_s3 + $0xd8] sm:$0xff] }
  0x2b   : > { %1444 = vst [vmem:[%s2313_s2 + $0x90] sm:$0xff] %v1812_v9  ;;  %v1831_v28 = vld [vmem:[%s2302_s3 + $0x1c0] sm:$0xff]  ;;  %v1832_v29 = vld [vmem:[%s2302_s3 + $0x1d0] sm:$0xff]  ;;  %v1849_v46 = vld [vmem:[%s2302_s3 + $0xe8] sm:$0xff] }
  0x2c   : > { %1450 = vst [vmem:[%s2313_s2 + $0xa0] sm:$0xff] %v1813_v10  ;;  %v1833_v30 = vld [vmem:[%s2302_s3 + $0x1e0] sm:$0xff]  ;;  %v1834_v31 = vld [vmem:[%s2302_s3 + $0x1f0] sm:$0xff]  ;;  %v1850_v47 = vld [vmem:[%s2302_s3 + $0xf8] sm:$0xff] }
  0x2d   : > { %1456 = vst [vmem:[%s2313_s2 + $0xb0] sm:$0xff] %v1814_v11  ;;  %v1851_v48 = vld [vmem:[%s2302_s3 + $0x108] sm:$0xff]  ;;  %v1852_v49 = vld [vmem:[%s2302_s3 + $0x118] sm:$0xff] }
  0x2e   : > { %1462 = vst [vmem:[%s2313_s2 + $0xc0] sm:$0xff] %v1815_v12  ;;  %v1853_v50 = vld [vmem:[%s2302_s3 + $0x128] sm:$0xff]  ;;  %v1854_v51 = vld [vmem:[%s2302_s3 + $0x138] sm:$0xff] }
  0x2f   : > { %1468 = vst [vmem:[%s2313_s2 + $0xd0] sm:$0xff] %v1816_v13  ;;  %v1855_v52 = vld [vmem:[%s2302_s3 + $0x148] sm:$0xff]  ;;  %v1856_v53 = vld [vmem:[%s2302_s3 + $0x158] sm:$0xff] }
  0x30   : > { %1474 = vst [vmem:[%s2313_s2 + $0xe0] sm:$0xff] %v1817_v14  ;;  %v1857_v54 = vld [vmem:[%s2302_s3 + $0x168] sm:$0xff]  ;;  %v1858_v55 = vld [vmem:[%s2302_s3 + $0x178] sm:$0xff] }
  0x31   : > { %1480 = vst [vmem:[%s2313_s2 + $0xf0] sm:$0xff] %v1818_v15  ;;  %v1859_v56 = vld [vmem:[%s2302_s3 + $0x188] sm:$0xff]  ;;  %v1860_v57 = vld [vmem:[%s2302_s3 + $0x198] sm:$0xff] }
  0x32   : > { %1486 = vst [vmem:[%s2313_s2 + $0x100] sm:$0xff] %v1819_v16  ;;  %v1861_v58 = vld [vmem:[%s2302_s3 + $0x1a8] sm:$0xff]  ;;  %v1862_v59 = vld [vmem:[%s2302_s3 + $0x1b8] sm:$0xff] }
  0x33   : > { %1492 = vst [vmem:[%s2313_s2 + $0x110] sm:$0xff] %v1820_v17  ;;  %v1863_v60 = vld [vmem:[%s2302_s3 + $0x1c8] sm:$0xff]  ;;  %v1864_v61 = vld [vmem:[%s2302_s3 + $0x1d8] sm:$0xff] }
  0x34   : > { %1498 = vst [vmem:[%s2313_s2 + $0x120] sm:$0xff] %v1821_v18  ;;  %v1865_v62 = vld [vmem:[%s2302_s3 + $0x1e8] sm:$0xff]  ;;  %v1866_v63 = vld [vmem:[%s2302_s3 + $0x1f8] sm:$0xff] }
  0x35   : > { %1504 = vst [vmem:[%s2313_s2 + $0x130] sm:$0xff] %v1822_v19 }
  0x36   : > { %1510 = vst [vmem:[%s2313_s2 + $0x140] sm:$0xff] %v1823_v20 }
  0x37   : > { %1516 = vst [vmem:[%s2313_s2 + $0x150] sm:$0xff] %v1824_v21 }
  0x38   : > { %1522 = vst [vmem:[%s2313_s2 + $0x160] sm:$0xff] %v1825_v22 }
  0x39   : > { %1528 = vst [vmem:[%s2313_s2 + $0x170] sm:$0xff] %v1826_v23 }
  0x3a   : > { %1534 = vst [vmem:[%s2313_s2 + $0x180] sm:$0xff] %v1827_v24 }
  0x3b   : > { %1540 = vst [vmem:[%s2313_s2 + $0x190] sm:$0xff] %v1828_v25 }
  0x3c   : > { %1546 = vst [vmem:[%s2313_s2 + $0x1a0] sm:$0xff] %v1829_v26 }
  0x3d   : > { %1552 = vst [vmem:[%s2313_s2 + $0x1b0] sm:$0xff] %v1830_v27 }
  0x3e   : > { %1558 = vst [vmem:[%s2313_s2 + $0x1c0] sm:$0xff] %v1831_v28 }
  0x3f   : > { %1564 = vst [vmem:[%s2313_s2 + $0x1d0] sm:$0xff] %v1832_v29 }
  0x40   : > { %1570 = vst [vmem:[%s2313_s2 + $0x1e0] sm:$0xff] %v1833_v30 }
  0x41   : > { %1576 = vst [vmem:[%s2313_s2 + $0x1f0] sm:$0xff] %v1834_v31 }
  0x42   : > { %1614 = vst [vmem:[%s2313_s2 + $0x8] sm:$0xff] %v1835_v32 }
  0x43   : > { %1620 = vst [vmem:[%s2313_s2 + $0x18] sm:$0xff] %v1836_v33 }
  0x44   : > { %1626 = vst [vmem:[%s2313_s2 + $0x28] sm:$0xff] %v1837_v34 }
  0x45   : > { %1632 = vst [vmem:[%s2313_s2 + $0x38] sm:$0xff] %v1838_v35 }
  0x46   : > { %1638 = vst [vmem:[%s2313_s2 + $0x48] sm:$0xff] %v1839_v36 }
  0x47   : > { %1644 = vst [vmem:[%s2313_s2 + $0x58] sm:$0xff] %v1840_v37 }
  0x48   : > { %1650 = vst [vmem:[%s2313_s2 + $0x68] sm:$0xff] %v1841_v38 }
  0x49   : > { %1656 = vst [vmem:[%s2313_s2 + $0x78] sm:$0xff] %v1842_v39 }
  0x4a   : > { %1662 = vst [vmem:[%s2313_s2 + $0x88] sm:$0xff] %v1843_v40 }
  0x4b   : > { %1668 = vst [vmem:[%s2313_s2 + $0x98] sm:$0xff] %v1844_v41 }
  0x4c   : > { %1674 = vst [vmem:[%s2313_s2 + $0xa8] sm:$0xff] %v1845_v42 }
  0x4d   : > { %1680 = vst [vmem:[%s2313_s2 + $0xb8] sm:$0xff] %v1846_v43 }
  0x4e   : > { %1686 = vst [vmem:[%s2313_s2 + $0xc8] sm:$0xff] %v1847_v44 }
  0x4f   : > { %1692 = vst [vmem:[%s2313_s2 + $0xd8] sm:$0xff] %v1848_v45 }
  0x50   : > { %1698 = vst [vmem:[%s2313_s2 + $0xe8] sm:$0xff] %v1849_v46 }
  0x51   : > { %1704 = vst [vmem:[%s2313_s2 + $0xf8] sm:$0xff] %v1850_v47 }
  0x52   : > { %1710 = vst [vmem:[%s2313_s2 + $0x108] sm:$0xff] %v1851_v48 }
  0x53   : > { %1716 = vst [vmem:[%s2313_s2 + $0x118] sm:$0xff] %v1852_v49 }
  0x54   : > { %1722 = vst [vmem:[%s2313_s2 + $0x128] sm:$0xff] %v1853_v50 }
  0x55   : > { %1728 = vst [vmem:[%s2313_s2 + $0x138] sm:$0xff] %v1854_v51 }
  0x56   : > { %1734 = vst [vmem:[%s2313_s2 + $0x148] sm:$0xff] %v1855_v52 }
  0x57   : > { %1740 = vst [vmem:[%s2313_s2 + $0x158] sm:$0xff] %v1856_v53 }
  0x58   : > { %1746 = vst [vmem:[%s2313_s2 + $0x168] sm:$0xff] %v1857_v54 }
  0x59   : > { %1752 = vst [vmem:[%s2313_s2 + $0x178] sm:$0xff] %v1858_v55 }
  0x5a   : > { %1758 = vst [vmem:[%s2313_s2 + $0x188] sm:$0xff] %v1859_v56 }
  0x5b   : > { %1764 = vst [vmem:[%s2313_s2 + $0x198] sm:$0xff] %v1860_v57 }
  0x5c   : > { %1770 = vst [vmem:[%s2313_s2 + $0x1a8] sm:$0xff] %v1861_v58 }
  0x5d   : > { %1776 = vst [vmem:[%s2313_s2 + $0x1b8] sm:$0xff] %v1862_v59 }
  0x5e   : > { %1782 = vst [vmem:[%s2313_s2 + $0x1c8] sm:$0xff] %v1863_v60 }
  0x5f   : > { %1788 = vst [vmem:[%s2313_s2 + $0x1d8] sm:$0xff] %v1864_v61 }
  0x60   : > { %1794 = vst [vmem:[%s2313_s2 + $0x1e8] sm:$0xff] %v1865_v62 }
  0x61   : > { %1800 = vst [vmem:[%s2313_s2 + $0x1f8] sm:$0xff] %v1866_v63 }
  0x62 PF: > { %s7_s24 = sadd.s32 1, %s2173_s24   ;;  %s2506_s6 = smov %s2113_s9 }
  0x63   : > { %p2441_p12 = scmp.ge.s32.totalorder %s7_s24, 37   ;;  %s2507_s7 = smov %s2117_s10 }
  0x64   : > { %s2508_s8 = smov %s2121_s11  ;;  %s2509_s9 = smov %s2125_s12 }
  0x65   : > { %s2510_s10 = smov %s2129_s13  ;;  %s2511_s11 = smov %s2133_s14 }
  0x66   : > { %s2512_s12 = smov %s2137_s15  ;;  %s2513_s13 = smov %s2141_s16 }
  0x67   : > { %s2514_s14 = smov %s2145_s17  ;;  %s2515_s15 = smov %s2149_s18 }
  0x68   : > { %s2516_s16 = smov %s2153_s19  ;;  %s2517_s17 = smov %s2157_s20 }
  0x69   : > { %s2518_s18 = smov %s2161_s21  ;;  %s2519_s19 = smov %s2165_s22 }
  0x6a   : > { %s2520_s20 = smov %s2169_s23  ;;  %s2521_s21 = smov %s2525_s25 }
  0x6b   : > { %s2522_s22 = smov %s2529_s26  ;;  %s2523_s23 = smov %s2533_s27 }
  0x6c   :  { %6 = sbr.rel (!%p2441_p12) target bundleno = 10 (0xa), region = 359 }

// kernel: resnet3d_forward.21
= control target key start
LH: loop header
LB: loop body
LE: loop exit
PB: predicated region body
PF: predicated region fallthrough
CT: control target
= control target key end

     0   :  { %s140_s0 = inlined_call_operand.vmem [shape: f32[16,512], index: 0, kind: input, shape index: {}]   ;;  %s141_s1 = inlined_call_operand.vmem [shape: f32[1,512], index: 1, kind: input, shape index: {}]   ;;  %s142_s2 = inlined_call_operand.vmem [shape: f32[1,512], index: 2, kind: input, shape index: {}]   ;;  %s143_s3 = inlined_call_operand.vmem [shape: bf16[16,512], index: 3, kind: output, shape index: {}]  }
   0x1   :  { %v14_v0 = vld [vmem:[%s140_s0] sm:$0xff]  ;;  %v15_v1 = vld [vmem:[%s140_s0 + $0x8] sm:$0xff]  ;;  %v16_v6 = vld [vmem:[%s140_s0 + $0x10] sm:$0xff] }
   0x2   :  { %v22_v2 = vld [vmem:[%s141_s1] sm:$0xf]  ;;  %v17_v7 = vld [vmem:[%s140_s0 + $0x18] sm:$0xff]  ;;  %v19_v13 = vld [vmem:[%s140_s0 + $0x28] sm:$0xff] }
   0x3   :  { %v24_v3 = vperm.slane %v22_v2, 0  ;;  %v25_v4 = vperm.slane %v22_v2, 1  ;;  %v40_v5 = vld [vmem:[%s142_s2] sm:$0xf]  ;;  %v26_v10 = vperm.slane %v22_v2, 2  ;;  %v27_v11 = vperm.slane %v22_v2, 3 }
   0x4   :  { %v42_v8 = vperm.slane %v40_v5, 0  ;;  %v43_v9 = vperm.slane %v40_v5, 1  ;;  %v18_v12 = vld [vmem:[%s140_s0 + $0x20] sm:$0xff]  ;;  %v44_v16 = vperm.slane %v40_v5, 2  ;;  %v45_v17 = vperm.slane %v40_v5, 3  ;;  %v20_v18 = vld [vmem:[%s140_s0 + $0x30] sm:$0xff] }
   0x5   :  { %v32_v14 = vmul.f32 %v24_v3, %v14_v0  ;;  %v33_v15 = vmul.f32 %v25_v4, %v15_v1  ;;  %v21_v19 = vld [vmem:[%s140_s0 + $0x38] sm:$0xff]  ;;  %v34_v20 = vmul.f32 %v26_v10, %v16_v6  ;;  %v35_v21 = vmul.f32 %v27_v11, %v17_v7 }
   0x6   :  { %v36_v22 = vmul.f32 %v24_v3, %v18_v12  ;;  %v37_v23 = vmul.f32 %v25_v4, %v19_v13  ;;  %v38_v26 = vmul.f32 %v26_v10, %v20_v18  ;;  %v39_v27 = vmul.f32 %v27_v11, %v21_v19 }
   0x7   :  { %v50_v24 = vadd.f32 %v42_v8, %v32_v14  ;;  %v51_v25 = vadd.f32 %v43_v9, %v33_v15  ;;  %v52_v28 = vadd.f32 %v44_v16, %v34_v20  ;;  %v53_v29 = vadd.f32 %v45_v17, %v35_v21 }
   0x8   :  { %v54_v30 = vadd.f32 %v42_v8, %v36_v22  ;;  %v55_v31 = vadd.f32 %v43_v9, %v37_v23  ;;  %v56_v34 = vadd.f32 %v44_v16, %v38_v26  ;;  %v57_v35 = vadd.f32 %v45_v17, %v39_v27 }
   0x9   :  { %v58_v32 = vmax.f32 %v50_v24, 0.0  ;;  %v59_v33 = vmax.f32 %v51_v25, 0.0  ;;  %v60_v36 = vmax.f32 %v52_v28, 0.0  ;;  %v61_v37 = vmax.f32 %v53_v29, 0.0 }
   0xa   :  { %v62_v38 = vmax.f32 %v54_v30, 0.0  ;;  %v63_v39 = vmax.f32 %v55_v31, 0.0  ;;  %v64_v41 = vmax.f32 %v56_v34, 0.0  ;;  %v65_v42 = vmax.f32 %v57_v35, 0.0 }
   0xb   :  { %v66_v40 = vpack.c.bf16 %v59_v33, %v58_v32  ;;  %v67_v43 = vpack.c.bf16 %v61_v37, %v60_v36 }
   0xc   :  { %v68_v44 = vpack.c.bf16 %v63_v39, %v62_v38  ;;  %v69_v45 = vpack.c.bf16 %v65_v42, %v64_v41 }
   0xd   :  { %70 = vst [vmem:[%s143_s3] sm:$0xff] %v66_v40 }
   0xe   :  { %71 = vst [vmem:[%s143_s3 + $0x8] sm:$0xff] %v67_v43 }
   0xf   :  { %72 = vst [vmem:[%s143_s3 + $0x10] sm:$0xff] %v68_v44 }
  0x10   :  { %73 = vst [vmem:[%s143_s3 + $0x18] sm:$0xff] %v69_v45 }

// kernel: reverse.4
= control target key start
LH: loop header
LB: loop body
LE: loop exit
PB: predicated region body
PF: predicated region fallthrough
CT: control target
= control target key end

     0   :  { %s2288_s6 = smov 0   ;;  %s2290_s7 = smov 0   ;;  %s2659_s0 = inlined_call_operand.vmem [shape: bf16[3,3,3,512,512], index: 0, kind: input, shape index: {}]   ;;  %s2660_s1 = inlined_call_operand.vmem [shape: bf16[3,3,3,512,512], index: 1, kind: output, shape index: {}]  }
   0x1   :  { %2661 = sst [smem:[#allocation4_spill]] %s2659_s0  ;;  %s2292_s8 = smov 0  }
   0x2   :  { %s2294_s9 = smov 0   ;;  %s2296_s10 = smov 0  }
   0x3   :  { %s2298_s11 = smov 0   ;;  %s2300_s12 = smov 0  }
   0x4   :  { %s2302_s13 = smov 0   ;;  %s2304_s14 = smov 0  }
   0x5   :  { %s2306_s15 = smov 0   ;;  %s2308_s16 = smov 0  }
   0x6   :  { %s2310_s17 = smov 0   ;;  %s2312_s18 = smov 0  }
   0x7   :  { %s2314_s19 = smov 0   ;;  %s2316_s20 = smov 0  }
   0x8   :  { %s2318_s21 = smov 0   ;;  %s2320_s22 = smov 0  }
   0x9   :  { %s2322_s23 = smov 0   ;;  %s2324_s24 = smov 0  }
   0xa   :  { %s2326_s25 = smov 0   ;;  %s2328_s26 = smov 0  }
   0xb   :  { %s2330_s27 = smov 0   ;;  %s2332_s28 = smov 0  }
   0xc   :  { %s2334_s29 = smov 0   ;;  %s2336_s30 = smov 0  }
   0xd LB: > { %s76_s2 = sadd.s32 1, %s2260_s26  ;;  %s80_s3 = sadd.s32 1, %s2264_s27  ;;  %s2276_s30 = sphi %s2336_s30, %s7_s30   ;;  %s2272_s29 = sphi %s2334_s29, %s2693_s29   ;;  %s2268_s28 = sphi %s2332_s28, %s2692_s28   ;;  %s2264_s27 = sphi %s2330_s27, %s2691_s27   ;;  %s2260_s26 = sphi %s2328_s26, %s2690_s26   ;;  %s2256_s25 = sphi %s2326_s25, %s2689_s25   ;;  %s2252_s24 = sphi %s2324_s24, %s2688_s24   ;;  %s2248_s23 = sphi %s2322_s23, %s2687_s23   ;;  %s2244_s22 = sphi %s2320_s22, %s2686_s22   ;;  %s2240_s21 = sphi %s2318_s21, %s2685_s21   ;;  %s2236_s20 = sphi %s2316_s20, %s2684_s20   ;;  %s2232_s19 = sphi %s2314_s19, %s2683_s19   ;;  %s2228_s18 = sphi %s2312_s18, %s2682_s18   ;;  %s2224_s17 = sphi %s2310_s17, %s2681_s17   ;;  %s2220_s16 = sphi %s2308_s16, %s2680_s16   ;;  %s2216_s15 = sphi %s2306_s15, %s2679_s15   ;;  %s2212_s14 = sphi %s2304_s14, %s2678_s14   ;;  %s2208_s13 = sphi %s2302_s13, %s2676_s13   ;;  %s2204_s12 = sphi %s2300_s12, %s2674_s12   ;;  %s2200_s11 = sphi %s2298_s11, %s2672_s11   ;;  %s2196_s10 = sphi %s2296_s10, %s2671_s10   ;;  %s2192_s9 = sphi %s2294_s9, %s2670_s9   ;;  %s2188_s8 = sphi %s2292_s8, %s2669_s8   ;;  %s2184_s7 = sphi %s2290_s7, %s2668_s7   ;;  %s2180_s6 = sphi %s2288_s6, %s2667_s6  }
   0xe   : > { %p78_p0 = scmp.ge.s32.totalorder %s76_s2, 2  ;;  %p1351_p1 = scmp.ge.s32.totalorder %s2276_s30, 5 }
   0xf   : > { %p134_p2 = scmp.lt.s32.totalorder %s2276_s30, 59  ;;  %s84_s4 = sadd.s32 1, %s2268_s28 }
  0x10   : > { %s2695_s2 = smov (%p78_p0, %s76_s2), 0  ;;  %s2697_s3 = smov (!%p78_p0, %s80_s3), %s2264_s27 }
  0x11   : > { %p82_p3 = scmp.ge.s32.totalorder %s2697_s3, 3  ;;  %p135_p4 = pnand %p1351_p1, %p134_p2 }
  0x12   : > { %s88_s5 = sadd.s32 1, %s2272_s29  ;;  %s1352_s6 = sshll.u32 (!%p135_p4), %s2180_s6, 5 }
  0x13   : > { %s2699_s3 = smov (%p82_p3, %s2697_s3), 0  ;;  %s2701_s4 = smov (!%p82_p3, %s84_s4), %s2268_s28 }
  0x14   : > { %2662 = sst [smem:[#allocation1_spill]] %s2699_s3  ;;  %p86_p5 = scmp.ge.s32.totalorder %s2701_s4, 3 }
  0x15   : > { %s191_s3 = ssub.s32 (!%p135_p4), 2, %s2184_s7  ;;  %p200_p10 = scmp.lt.s32.totalorder (!%p135_p4), %s1352_s6, 63 }
  0x16   : > { %s2703_s4 = smov (%p86_p5, %s2701_s4), 0  ;;  %s2705_s5 = smov (!%p86_p5, %s88_s5), %s2272_s29 }
  0x17   : > { %2663 = sst [smem:[#allocation2_spill]] %s2703_s4  ;;  %p90_p6 = scmp.ge.s32.totalorder %s2705_s5, 3 }
  0x18   : > { %138 = sbr.rel (%p135_p4) target bundleno = 109 (0x6d), region = 20  ;;  %s190_s4 = ssub.s32 (!%p135_p4), 2, %s2188_s8 }
  0x19   : > { %s2707_s5 = smov (%p90_p6, %s2705_s5), 0  ;;  %p196_p8 = scmp.lt.s32.totalorder (!%p135_p4), %s190_s4, 2 }
  0x1a   : > { %2664 = sst [smem:[#allocation3_spill]] %s2707_s5  ;;  %s189_s5 = ssub.s32 (!%p135_p4), 2, %s2192_s9 }
  0x1b   : > { %p194_p7 = scmp.lt.s32.totalorder (!%p135_p4), %s189_s5, 2  ;;  %p198_p9 = scmp.lt.s32.totalorder (!%p135_p4), %s191_s3, 2 }
  0x1c   : > { %p221_p11 = scmp.lt.s32.totalorder (!%p135_p4), %s2192_s9, 2  ;;  %p223_p12 = scmp.lt.s32.totalorder (!%p135_p4), %s2188_s8, 2 }
  0x1d   : > { %s2709_s5 = smov (!%p194_p7, %s189_s5), 2  ;;  %s2711_s4 = smov (!%p196_p8, %s190_s4), 2 }
  0x1e   : > { %s2713_s3 = smov (!%p198_p9, %s191_s3), 2  ;;  %s2715_s6 = smov (!%p200_p10, %s1352_s6), 63 }
  0x1f   : > { %s1354_s3 = sshll.u32 %s2713_s3, 8  ;;  %s1874_s4 = smul.u32 768, %s2711_s4 }
  0x20   : > { %s1353_s6 = sshll.u32 %s2715_s6, 2  ;;  %s1875_s5 = smul.u32 2304, %s2709_s5 }
  0x21   : > { %s207_s3 = sadd.s32 %s1354_s3, %s1353_s6  ;;  %p225_p13 = scmp.lt.s32.totalorder %s2184_s7, 2 }
  0x22   : > { %s209_s4 = sadd.s32 %s1874_s4, %s207_s3  ;;  %s2717_s9 = smov (!%p221_p11, %s2192_s9), 2 }
  0x23   : > { %s211_s5 = sadd.s32 %s1875_s5, %s209_s4  ;;  %s2719_s8 = smov (!%p223_p12, %s2188_s8), 2 }
  0x24   : > { %s1355_s3 = sshll.u32 %s211_s5, 2  ;;  %s2721_s7 = smov (!%p225_p13, %s2184_s7), 2 }
  0x25   : > { %s2665_s0 = sld [smem:[#allocation4_spill]]  ;;  %s1876_s8 = smul.u32 768, %s2719_s8 }
  0x26   : > { %s1358_s7 = sshll.u32 %s2721_s7, 8  ;;  %s1877_s9 = smul.u32 2304, %s2717_s9 }
  0x27   : > { %s234_s6 = sadd.s32 %s1358_s7, %s1353_s6 }
  0x28   : > { %s236_s4 = sadd.s32 %s1876_s8, %s234_s6 }
  0x29   : > { %s238_s5 = sadd.s32 %s1877_s9, %s236_s4 }
  0x2a   : > { %s1359_s8 = sshll.u32 %s238_s5, 2 }
  0x2b   : > { %s2443_s3 = scalar_lea.vmem %s2665_s0, %s1355_s3  ;;  %s2451_s6 = scalar_lea.vmem %s2660_s1, %s1359_s8 }
  0x2c   : > { %v1810_v0 = vld [vmem:[%s2443_s3] sm:$0xff]  ;;  %v1811_v1 = vld [vmem:[%s2443_s3 + $0x10] sm:$0xff]  ;;  %v1842_v32 = vld [vmem:[%s2443_s3 + $0x8] sm:$0xff] }
  0x2d   : > { %v1812_v2 = vld [vmem:[%s2443_s3 + $0x20] sm:$0xff]  ;;  %v1813_v3 = vld [vmem:[%s2443_s3 + $0x30] sm:$0xff]  ;;  %1397 = vst [vmem:[%s2451_s6] sm:$0xff] %v1810_v0  ;;  %v1843_v33 = vld [vmem:[%s2443_s3 + $0x18] sm:$0xff] }
  0x2e   : > { %v1814_v4 = vld [vmem:[%s2443_s3 + $0x40] sm:$0xff]  ;;  %1403 = vst [vmem:[%s2451_s6 + $0x10] sm:$0xff] %v1811_v1  ;;  %v1815_v5 = vld [vmem:[%s2443_s3 + $0x50] sm:$0xff]  ;;  %v1844_v34 = vld [vmem:[%s2443_s3 + $0x28] sm:$0xff] }
  0x2f   : > { %1409 = vst [vmem:[%s2451_s6 + $0x20] sm:$0xff] %v1812_v2  ;;  %v1816_v6 = vld [vmem:[%s2443_s3 + $0x60] sm:$0xff]  ;;  %v1817_v7 = vld [vmem:[%s2443_s3 + $0x70] sm:$0xff]  ;;  %v1845_v35 = vld [vmem:[%s2443_s3 + $0x38] sm:$0xff] }
  0x30   : > { %1415 = vst [vmem:[%s2451_s6 + $0x30] sm:$0xff] %v1813_v3  ;;  %v1818_v8 = vld [vmem:[%s2443_s3 + $0x80] sm:$0xff]  ;;  %v1819_v9 = vld [vmem:[%s2443_s3 + $0x90] sm:$0xff]  ;;  %v1846_v36 = vld [vmem:[%s2443_s3 + $0x48] sm:$0xff] }
  0x31   : > { %1421 = vst [vmem:[%s2451_s6 + $0x40] sm:$0xff] %v1814_v4  ;;  %v1820_v10 = vld [vmem:[%s2443_s3 + $0xa0] sm:$0xff]  ;;  %v1821_v11 = vld [vmem:[%s2443_s3 + $0xb0] sm:$0xff]  ;;  %v1847_v37 = vld [vmem:[%s2443_s3 + $0x58] sm:$0xff] }
  0x32   : > { %1427 = vst [vmem:[%s2451_s6 + $0x50] sm:$0xff] %v1815_v5  ;;  %v1822_v12 = vld [vmem:[%s2443_s3 + $0xc0] sm:$0xff]  ;;  %v1823_v13 = vld [vmem:[%s2443_s3 + $0xd0] sm:$0xff]  ;;  %v1848_v38 = vld [vmem:[%s2443_s3 + $0x68] sm:$0xff] }
  0x33   : > { %1433 = vst [vmem:[%s2451_s6 + $0x60] sm:$0xff] %v1816_v6  ;;  %v1824_v14 = vld [vmem:[%s2443_s3 + $0xe0] sm:$0xff]  ;;  %v1825_v15 = vld [vmem:[%s2443_s3 + $0xf0] sm:$0xff]  ;;  %v1849_v39 = vld [vmem:[%s2443_s3 + $0x78] sm:$0xff] }
  0x34   : > { %1439 = vst [vmem:[%s2451_s6 + $0x70] sm:$0xff] %v1817_v7  ;;  %v1826_v16 = vld [vmem:[%s2443_s3 + $0x100] sm:$0xff]  ;;  %v1827_v17 = vld [vmem:[%s2443_s3 + $0x110] sm:$0xff]  ;;  %v1850_v40 = vld [vmem:[%s2443_s3 + $0x88] sm:$0xff] }
  0x35   : > { %1445 = vst [vmem:[%s2451_s6 + $0x80] sm:$0xff] %v1818_v8  ;;  %v1828_v18 = vld [vmem:[%s2443_s3 + $0x120] sm:$0xff]  ;;  %v1829_v19 = vld [vmem:[%s2443_s3 + $0x130] sm:$0xff]  ;;  %v1851_v41 = vld [vmem:[%s2443_s3 + $0x98] sm:$0xff] }
  0x36   : > { %1451 = vst [vmem:[%s2451_s6 + $0x90] sm:$0xff] %v1819_v9  ;;  %v1830_v20 = vld [vmem:[%s2443_s3 + $0x140] sm:$0xff]  ;;  %v1831_v21 = vld [vmem:[%s2443_s3 + $0x150] sm:$0xff]  ;;  %v1852_v42 = vld [vmem:[%s2443_s3 + $0xa8] sm:$0xff] }
  0x37   : > { %1457 = vst [vmem:[%s2451_s6 + $0xa0] sm:$0xff] %v1820_v10  ;;  %v1832_v22 = vld [vmem:[%s2443_s3 + $0x160] sm:$0xff]  ;;  %v1833_v23 = vld [vmem:[%s2443_s3 + $0x170] sm:$0xff]  ;;  %v1853_v43 = vld [vmem:[%s2443_s3 + $0xb8] sm:$0xff] }
  0x38   : > { %1463 = vst [vmem:[%s2451_s6 + $0xb0] sm:$0xff] %v1821_v11  ;;  %v1834_v24 = vld [vmem:[%s2443_s3 + $0x180] sm:$0xff]  ;;  %v1835_v25 = vld [vmem:[%s2443_s3 + $0x190] sm:$0xff]  ;;  %v1854_v44 = vld [vmem:[%s2443_s3 + $0xc8] sm:$0xff] }
  0x39   : > { %1469 = vst [vmem:[%s2451_s6 + $0xc0] sm:$0xff] %v1822_v12  ;;  %v1836_v26 = vld [vmem:[%s2443_s3 + $0x1a0] sm:$0xff]  ;;  %v1837_v27 = vld [vmem:[%s2443_s3 + $0x1b0] sm:$0xff]  ;;  %v1855_v45 = vld [vmem:[%s2443_s3 + $0xd8] sm:$0xff] }
  0x3a   : > { %1475 = vst [vmem:[%s2451_s6 + $0xd0] sm:$0xff] %v1823_v13  ;;  %v1838_v28 = vld [vmem:[%s2443_s3 + $0x1c0] sm:$0xff]  ;;  %v1839_v29 = vld [vmem:[%s2443_s3 + $0x1d0] sm:$0xff]  ;;  %v1856_v46 = vld [vmem:[%s2443_s3 + $0xe8] sm:$0xff] }
  0x3b   : > { %1481 = vst [vmem:[%s2451_s6 + $0xe0] sm:$0xff] %v1824_v14  ;;  %v1840_v30 = vld [vmem:[%s2443_s3 + $0x1e0] sm:$0xff]  ;;  %v1841_v31 = vld [vmem:[%s2443_s3 + $0x1f0] sm:$0xff]  ;;  %v1857_v47 = vld [vmem:[%s2443_s3 + $0xf8] sm:$0xff] }
  0x3c   : > { %1487 = vst [vmem:[%s2451_s6 + $0xf0] sm:$0xff] %v1825_v15  ;;  %v1858_v48 = vld [vmem:[%s2443_s3 + $0x108] sm:$0xff]  ;;  %v1859_v49 = vld [vmem:[%s2443_s3 + $0x118] sm:$0xff] }
  0x3d   : > { %1493 = vst [vmem:[%s2451_s6 + $0x100] sm:$0xff] %v1826_v16  ;;  %v1860_v50 = vld [vmem:[%s2443_s3 + $0x128] sm:$0xff]  ;;  %v1861_v51 = vld [vmem:[%s2443_s3 + $0x138] sm:$0xff] }
  0x3e   : > { %1499 = vst [vmem:[%s2451_s6 + $0x110] sm:$0xff] %v1827_v17  ;;  %v1862_v52 = vld [vmem:[%s2443_s3 + $0x148] sm:$0xff]  ;;  %v1863_v53 = vld [vmem:[%s2443_s3 + $0x158] sm:$0xff] }
  0x3f   : > { %1505 = vst [vmem:[%s2451_s6 + $0x120] sm:$0xff] %v1828_v18  ;;  %v1864_v54 = vld [vmem:[%s2443_s3 + $0x168] sm:$0xff]  ;;  %v1865_v55 = vld [vmem:[%s2443_s3 + $0x178] sm:$0xff] }
  0x40   : > { %1511 = vst [vmem:[%s2451_s6 + $0x130] sm:$0xff] %v1829_v19  ;;  %v1866_v56 = vld [vmem:[%s2443_s3 + $0x188] sm:$0xff]  ;;  %v1867_v57 = vld [vmem:[%s2443_s3 + $0x198] sm:$0xff] }
  0x41   : > { %1517 = vst [vmem:[%s2451_s6 + $0x140] sm:$0xff] %v1830_v20  ;;  %v1868_v58 = vld [vmem:[%s2443_s3 + $0x1a8] sm:$0xff]  ;;  %v1869_v59 = vld [vmem:[%s2443_s3 + $0x1b8] sm:$0xff] }
  0x42   : > { %1523 = vst [vmem:[%s2451_s6 + $0x150] sm:$0xff] %v1831_v21  ;;  %v1870_v60 = vld [vmem:[%s2443_s3 + $0x1c8] sm:$0xff]  ;;  %v1871_v61 = vld [vmem:[%s2443_s3 + $0x1d8] sm:$0xff] }
  0x43   : > { %1529 = vst [vmem:[%s2451_s6 + $0x160] sm:$0xff] %v1832_v22  ;;  %v1872_v62 = vld [vmem:[%s2443_s3 + $0x1e8] sm:$0xff]  ;;  %v1873_v63 = vld [vmem:[%s2443_s3 + $0x1f8] sm:$0xff] }
  0x44   : > { %1535 = vst [vmem:[%s2451_s6 + $0x170] sm:$0xff] %v1833_v23 }
  0x45   : > { %1541 = vst [vmem:[%s2451_s6 + $0x180] sm:$0xff] %v1834_v24 }
  0x46   : > { %1547 = vst [vmem:[%s2451_s6 + $0x190] sm:$0xff] %v1835_v25 }
  0x47   : > { %1553 = vst [vmem:[%s2451_s6 + $0x1a0] sm:$0xff] %v1836_v26 }
  0x48   : > { %1559 = vst [vmem:[%s2451_s6 + $0x1b0] sm:$0xff] %v1837_v27 }
  0x49   : > { %1565 = vst [vmem:[%s2451_s6 + $0x1c0] sm:$0xff] %v1838_v28 }
  0x4a   : > { %1571 = vst [vmem:[%s2451_s6 + $0x1d0] sm:$0xff] %v1839_v29 }
  0x4b   : > { %1577 = vst [vmem:[%s2451_s6 + $0x1e0] sm:$0xff] %v1840_v30 }
  0x4c   : > { %1583 = vst [vmem:[%s2451_s6 + $0x1f0] sm:$0xff] %v1841_v31 }
  0x4d   : > { %1621 = vst [vmem:[%s2451_s6 + $0x8] sm:$0xff] %v1842_v32 }
  0x4e   : > { %1627 = vst [vmem:[%s2451_s6 + $0x18] sm:$0xff] %v1843_v33 }
  0x4f   : > { %1633 = vst [vmem:[%s2451_s6 + $0x28] sm:$0xff] %v1844_v34 }
  0x50   : > { %1639 = vst [vmem:[%s2451_s6 + $0x38] sm:$0xff] %v1845_v35 }
  0x51   : > { %1645 = vst [vmem:[%s2451_s6 + $0x48] sm:$0xff] %v1846_v36 }
  0x52   : > { %1651 = vst [vmem:[%s2451_s6 + $0x58] sm:$0xff] %v1847_v37 }
  0x53   : > { %1657 = vst [vmem:[%s2451_s6 + $0x68] sm:$0xff] %v1848_v38 }
  0x54   : > { %1663 = vst [vmem:[%s2451_s6 + $0x78] sm:$0xff] %v1849_v39 }
  0x55   : > { %1669 = vst [vmem:[%s2451_s6 + $0x88] sm:$0xff] %v1850_v40 }
  0x56   : > { %1675 = vst [vmem:[%s2451_s6 + $0x98] sm:$0xff] %v1851_v41 }
  0x57   : > { %1681 = vst [vmem:[%s2451_s6 + $0xa8] sm:$0xff] %v1852_v42 }
  0x58   : > { %1687 = vst [vmem:[%s2451_s6 + $0xb8] sm:$0xff] %v1853_v43 }
  0x59   : > { %1693 = vst [vmem:[%s2451_s6 + $0xc8] sm:$0xff] %v1854_v44 }
  0x5a   : > { %1699 = vst [vmem:[%s2451_s6 + $0xd8] sm:$0xff] %v1855_v45 }
  0x5b   : > { %1705 = vst [vmem:[%s2451_s6 + $0xe8] sm:$0xff] %v1856_v46 }
  0x5c   : > { %1711 = vst [vmem:[%s2451_s6 + $0xf8] sm:$0xff] %v1857_v47 }
  0x5d   : > { %1717 = vst [vmem:[%s2451_s6 + $0x108] sm:$0xff] %v1858_v48 }
  0x5e   : > { %1723 = vst [vmem:[%s2451_s6 + $0x118] sm:$0xff] %v1859_v49 }
  0x5f   : > { %1729 = vst [vmem:[%s2451_s6 + $0x128] sm:$0xff] %v1860_v50 }
  0x60   : > { %1735 = vst [vmem:[%s2451_s6 + $0x138] sm:$0xff] %v1861_v51 }
  0x61   : > { %1741 = vst [vmem:[%s2451_s6 + $0x148] sm:$0xff] %v1862_v52 }
  0x62   : > { %1747 = vst [vmem:[%s2451_s6 + $0x158] sm:$0xff] %v1863_v53 }
  0x63   : > { %1753 = vst [vmem:[%s2451_s6 + $0x168] sm:$0xff] %v1864_v54 }
  0x64   : > { %1759 = vst [vmem:[%s2451_s6 + $0x178] sm:$0xff] %v1865_v55 }
  0x65   : > { %1765 = vst [vmem:[%s2451_s6 + $0x188] sm:$0xff] %v1866_v56 }
  0x66   : > { %1771 = vst [vmem:[%s2451_s6 + $0x198] sm:$0xff] %v1867_v57 }
  0x67   : > { %1777 = vst [vmem:[%s2451_s6 + $0x1a8] sm:$0xff] %v1868_v58 }
  0x68   : > { %1783 = vst [vmem:[%s2451_s6 + $0x1b8] sm:$0xff] %v1869_v59 }
  0x69   : > { %1789 = vst [vmem:[%s2451_s6 + $0x1c8] sm:$0xff] %v1870_v60 }
  0x6a   : > { %1795 = vst [vmem:[%s2451_s6 + $0x1d8] sm:$0xff] %v1871_v61 }
  0x6b   : > { %1801 = vst [vmem:[%s2451_s6 + $0x1e8] sm:$0xff] %v1872_v62 }
  0x6c   : > { %1807 = vst [vmem:[%s2451_s6 + $0x1f8] sm:$0xff] %v1873_v63 }
  0x6d PF: > { %s7_s30 = sadd.s32 1, %s2276_s30   ;;  %s2667_s6 = smov %s2196_s10 }
  0x6e   : > { %p2579_p0 = scmp.ge.s32.totalorder %s7_s30, 64   ;;  %s2668_s7 = smov %s2200_s11 }
  0x6f   : > { %s2669_s8 = smov %s2204_s12  ;;  %s2670_s9 = smov %s2208_s13 }
  0x70   : > { %s2671_s10 = smov %s2212_s14  ;;  %s2672_s11 = smov %s2216_s15 }
  0x71   : > { %s2673_s4 = sld [smem:[#allocation1_spill]]  ;;  %s2674_s12 = smov %s2220_s16 }
  0x72   : > { %s2675_s5 = sld [smem:[#allocation2_spill]]  ;;  %s2676_s13 = smov %s2224_s17 }
  0x73   : > { %s2677_s0 = sld [smem:[#allocation3_spill]]  ;;  %s2678_s14 = smov %s2228_s18 }
  0x74   : > { %s2679_s15 = smov %s2232_s19  ;;  %s2680_s16 = smov %s2236_s20 }
  0x75   : > { %s2681_s17 = smov %s2240_s21  ;;  %s2682_s18 = smov %s2244_s22 }
  0x76   : > { %s2683_s19 = smov %s2248_s23  ;;  %s2684_s20 = smov %s2252_s24 }
  0x77   : > { %s2685_s21 = smov %s2256_s25  ;;  %s2686_s22 = smov %s2260_s26 }
  0x78   : > { %s2687_s23 = smov %s2264_s27  ;;  %s2688_s24 = smov %s2268_s28 }
  0x79   : > { %s2689_s25 = smov %s2272_s29  ;;  %s2690_s26 = smov %s2695_s2 }
  0x7a   : > { %s2691_s27 = smov %s2673_s4  ;;  %s2692_s28 = smov %s2675_s5 }
  0x7b   : > { %s2693_s29 = smov %s2677_s0  ;;  %6 = sbr.rel (!%p2579_p0) target bundleno = 13 (0xd), region = 359 }

// kernel: resnet3d_forward.22
= control target key start
LH: loop header
LB: loop body
LE: loop exit
PB: predicated region body
PF: predicated region fallthrough
CT: control target
= control target key end

     0   :  { %s984_s15 = smov 0   ;;  %s986_s16 = smov 0   ;;  %s1166_s0 = inlined_call_operand.vmem [shape: bf16[16,256], index: 0, kind: input, shape index: {}]   ;;  %s1167_s1 = inlined_call_operand.vmem [shape: bf16[256,512], index: 1, kind: input, shape index: {}]   ;;  %s1168_s2 = inlined_call_operand.vmem [shape: f32[1,512], index: 2, kind: input, shape index: {}]   ;;  %s1169_s3 = inlined_call_operand.vmem [shape: f32[1,512], index: 3, kind: input, shape index: {}]   ;;  %s1170_s4 = inlined_call_operand.vmem [shape: bf16[16,512], index: 4, kind: output, shape index: {}]  }
   0x1   :  { %s988_s17 = smov 0   ;;  %s990_s18 = smov 0  }
   0x2   :  { %s992_s19 = smov 0  }
   0x3 LB: > { %s23_s20 = sadd.s32 1, %s953_s18  ;;  %s768_s21 = sadd.s32 4294967295, %s957_s19   ;;  %s957_s19 = sphi %s992_s19, %s14_s19   ;;  %s953_s18 = sphi %s990_s18, %s1175_s18   ;;  %s949_s17 = sphi %s988_s17, %s1174_s17   ;;  %s945_s16 = sphi %s986_s16, %s1173_s16   ;;  %s941_s15 = sphi %s984_s15, %s1172_s15  }
   0x4   : > { %p24_p0 = scmp.ge.s32.totalorder %s23_s20, 4  ;;  %p66_p1 = scmp.ne.s32.totalorder %s945_s16, %s941_s15 }
   0x5   : > { %p67_p2 = scmp.eq.s32.totalorder %s957_s19, 0  ;;  %p150_p4 = scmp.eq.s32.totalorder %s768_s21, 3 }
   0x6   : > { %s1177_s20 = smov (%p24_p0, %s23_s20), 0  ;;  %s59_s23 = sadd.s32 1, %s945_s16 }
   0x7   : > { %p68_p3 = por %p67_p2, %p66_p1  ;;  %s56_s22 = ssub.s32 %s953_s18, %s1177_s20 }
   0x8   : > { %p57_p5 = scmp.eq.s32.totalorder %s56_s22, 0  ;;  %p1019_p6 = por %p150_p4, %p66_p1 }
   0x9   : > { %p772_p7 = scmp.ge.s32.totalorder %s957_s19, 4 }
   0xa   : > { %s1024_s25 = scalar_select %p57_p5, %s945_s16, %s59_s23  }
   0xb   : > { %182 = sbr.rel (%p772_p7) target bundleno = 52 (0x34), region = 20 }
  0x10   : > { %185 = sbr.rel (!%p68_p3) target bundleno = 52 (0x34), region = 24  ;;  %s187_s26 = sand.u32 (%p68_p3), 1, %s945_s16  }
  0x11   : > { %s774_s27 = sshll.u32 (%p68_p3), %s953_s18, 2  ;;  %s773_s28 = sshll.u32 (%p68_p3), %s187_s26, 7 }
  0x12   : > { %s1032_s5 = scalar_lea.vmem (%p68_p3), %s1167_s1, %s774_s27  ;;  %s1036_s6 = scalar_lea.vmem (%p68_p3), [#allocation2], %s773_s28 }
  0x13   : > { %v208_v0 = vld [vmem:[%s1032_s5] sm:$0xf] (%p68_p3)  ;;  %v210_v1 = vld [vmem:[%s1032_s5 + $0x10] sm:$0xf] (%p68_p3) }
  0x14   : > { %209 = vst [vmem:[%s1036_s6] sm:$0xf] (%p68_p3), %v208_v0  ;;  %v212_v2 = vld [vmem:[%s1032_s5 + $0x20] sm:$0xf] (%p68_p3)  ;;  %v214_v3 = vld [vmem:[%s1032_s5 + $0x30] sm:$0xf] (%p68_p3) }
  0x15   : > { %211 = vst [vmem:[%s1036_s6 + $0x4] sm:$0xf] %v210_v1  ;;  %v216_v4 = vld [vmem:[%s1032_s5 + $0x40] sm:$0xf]  ;;  %v218_v5 = vld [vmem:[%s1032_s5 + $0x50] sm:$0xf] }
  0x16   : > { %213 = vst [vmem:[%s1036_s6 + $0x8] sm:$0xf] %v212_v2  ;;  %v220_v6 = vld [vmem:[%s1032_s5 + $0x60] sm:$0xf]  ;;  %v222_v7 = vld [vmem:[%s1032_s5 + $0x70] sm:$0xf] }
  0x17   : > { %215 = vst [vmem:[%s1036_s6 + $0xc] sm:$0xf] %v214_v3  ;;  %v224_v8 = vld [vmem:[%s1032_s5 + $0x80] sm:$0xf]  ;;  %v226_v9 = vld [vmem:[%s1032_s5 + $0x90] sm:$0xf] }
  0x18   : > { %217 = vst [vmem:[%s1036_s6 + $0x10] sm:$0xf] %v216_v4  ;;  %v228_v10 = vld [vmem:[%s1032_s5 + $0xa0] sm:$0xf]  ;;  %v230_v11 = vld [vmem:[%s1032_s5 + $0xb0] sm:$0xf] }
  0x19   : > { %219 = vst [vmem:[%s1036_s6 + $0x14] sm:$0xf] %v218_v5  ;;  %v232_v12 = vld [vmem:[%s1032_s5 + $0xc0] sm:$0xf]  ;;  %v234_v13 = vld [vmem:[%s1032_s5 + $0xd0] sm:$0xf] }
  0x1a   : > { %221 = vst [vmem:[%s1036_s6 + $0x18] sm:$0xf] %v220_v6  ;;  %v236_v14 = vld [vmem:[%s1032_s5 + $0xe0] sm:$0xf]  ;;  %v238_v15 = vld [vmem:[%s1032_s5 + $0xf0] sm:$0xf] }
  0x1b   : > { %223 = vst [vmem:[%s1036_s6 + $0x1c] sm:$0xf] %v222_v7  ;;  %v240_v16 = vld [vmem:[%s1032_s5 + $0x100] sm:$0xf]  ;;  %v242_v17 = vld [vmem:[%s1032_s5 + $0x110] sm:$0xf] }
  0x1c   : > { %225 = vst [vmem:[%s1036_s6 + $0x20] sm:$0xf] %v224_v8  ;;  %v244_v18 = vld [vmem:[%s1032_s5 + $0x120] sm:$0xf]  ;;  %v246_v19 = vld [vmem:[%s1032_s5 + $0x130] sm:$0xf] }
  0x1d   : > { %227 = vst [vmem:[%s1036_s6 + $0x24] sm:$0xf] %v226_v9  ;;  %v248_v20 = vld [vmem:[%s1032_s5 + $0x140] sm:$0xf]  ;;  %v250_v21 = vld [vmem:[%s1032_s5 + $0x150] sm:$0xf] }
  0x1e   : > { %229 = vst [vmem:[%s1036_s6 + $0x28] sm:$0xf] %v228_v10  ;;  %v252_v22 = vld [vmem:[%s1032_s5 + $0x160] sm:$0xf]  ;;  %v254_v23 = vld [vmem:[%s1032_s5 + $0x170] sm:$0xf] }
  0x1f   : > { %231 = vst [vmem:[%s1036_s6 + $0x2c] sm:$0xf] %v230_v11  ;;  %v256_v24 = vld [vmem:[%s1032_s5 + $0x180] sm:$0xf]  ;;  %v258_v25 = vld [vmem:[%s1032_s5 + $0x190] sm:$0xf] }
  0x20   : > { %233 = vst [vmem:[%s1036_s6 + $0x30] sm:$0xf] %v232_v12  ;;  %v260_v26 = vld [vmem:[%s1032_s5 + $0x1a0] sm:$0xf]  ;;  %v262_v27 = vld [vmem:[%s1032_s5 + $0x1b0] sm:$0xf] }
  0x21   : > { %235 = vst [vmem:[%s1036_s6 + $0x34] sm:$0xf] %v234_v13  ;;  %v264_v28 = vld [vmem:[%s1032_s5 + $0x1c0] sm:$0xf]  ;;  %v266_v29 = vld [vmem:[%s1032_s5 + $0x1d0] sm:$0xf] }
  0x22   : > { %237 = vst [vmem:[%s1036_s6 + $0x38] sm:$0xf] %v236_v14  ;;  %v268_v30 = vld [vmem:[%s1032_s5 + $0x1e0] sm:$0xf]  ;;  %v270_v31 = vld [vmem:[%s1032_s5 + $0x1f0] sm:$0xf] }
  0x23   : > { %239 = vst [vmem:[%s1036_s6 + $0x3c] sm:$0xf] %v238_v15 }
  0x24   : > { %241 = vst [vmem:[%s1036_s6 + $0x40] sm:$0xf] %v240_v16 }
  0x25   : > { %243 = vst [vmem:[%s1036_s6 + $0x44] sm:$0xf] %v242_v17 }
  0x26   : > { %245 = vst [vmem:[%s1036_s6 + $0x48] sm:$0xf] %v244_v18 }
  0x27   : > { %247 = vst [vmem:[%s1036_s6 + $0x4c] sm:$0xf] %v246_v19 }
  0x28   : > { %249 = vst [vmem:[%s1036_s6 + $0x50] sm:$0xf] %v248_v20 }
  0x29   : > { %251 = vst [vmem:[%s1036_s6 + $0x54] sm:$0xf] %v250_v21 }
  0x2a   : > { %253 = vst [vmem:[%s1036_s6 + $0x58] sm:$0xf] %v252_v22 }
  0x2b   : > { %255 = vst [vmem:[%s1036_s6 + $0x5c] sm:$0xf] %v254_v23 }
  0x2c   : > { %257 = vst [vmem:[%s1036_s6 + $0x60] sm:$0xf] %v256_v24 }
  0x2d   : > { %259 = vst [vmem:[%s1036_s6 + $0x64] sm:$0xf] %v258_v25 }
  0x2e   : > { %261 = vst [vmem:[%s1036_s6 + $0x68] sm:$0xf] %v260_v26 }
  0x2f   : > { %263 = vst [vmem:[%s1036_s6 + $0x6c] sm:$0xf] %v262_v27 }
  0x30   : > { %265 = vst [vmem:[%s1036_s6 + $0x70] sm:$0xf] %v264_v28 }
  0x31   : > { %267 = vst [vmem:[%s1036_s6 + $0x74] sm:$0xf] %v266_v29 }
  0x32   : > { %269 = vst [vmem:[%s1036_s6 + $0x78] sm:$0xf] %v268_v30 }
  0x33   : > { %271 = vst [vmem:[%s1036_s6 + $0x7c] sm:$0xf] %v270_v31 }
  0x34 PF: > { %p775_p8 = scmp.ge.s32.totalorder %s957_s19, 1  ;;  %p370_p9 = scmp.lt.s32.totalorder %s957_s19, 5 }
  0x36   : > { %p371_p10 = pnand %p775_p8, %p370_p9 }
  0x37   : > { %s377_s7 = sand.u32 (!%p371_p10), 1, %s941_s15   ;;  %p420_p11 = scmp.lt.s32.totalorder (!%p371_p10), %s949_s17, 3 }
  0x38   : > { %374 = sbr.rel (%p371_p10) target bundleno = 246 (0xf6), region = 73  ;;  %s776_s8 = sshll.u32 (!%p371_p10), %s377_s7, 7 }
  0x39   : > { %s1105_s9 = scalar_lea.vmem (!%p371_p10), [#allocation2], %s776_s8  ;;  %s777_s8 = sshll.u32 (!%p371_p10), %s377_s7, 3 }
  0x3d   : > { %v863_v32 = vld [vmem:[%s1105_s9 + $0x38] sm:$0xff]  ;;  %v862_v34 = vld [vmem:[%s1105_s9 + $0x30] sm:$0xff]  ;;  %v861_v36 = vld [vmem:[%s1105_s9 + $0x28] sm:$0xff]  ;;  %s421_s26 = scalar_select %p420_p11, %s949_s17, 3 }
  0x3e   : > { %v871_v33 = vld [vmem:[%s1105_s9 + $0x78] sm:$0xff]  ;;  %567 = vmatpush.bf16.msra.mxu0 %v863_v32  ;;  %v870_v35 = vld [vmem:[%s1105_s9 + $0x70] sm:$0xff]  ;;  %v869_v37 = vld [vmem:[%s1105_s9 + $0x68] sm:$0xff]  ;;  %s851_s10 = sshll.u32 (%p1019_p6), %s949_s17, 2 }
  0x3f   : > { %581 = vmatpush.bf16.msra.mxu1 %v871_v33  ;;  %v860_v38 = vld [vmem:[%s1105_s9 + $0x20] sm:$0xff]  ;;  %v859_v40 = vld [vmem:[%s1105_s9 + $0x18] sm:$0xff]  ;;  %v858_v42 = vld [vmem:[%s1105_s9 + $0x10] sm:$0xff]  ;;  %s422_s29 = scalar_lea.vmem %s1168_s2, %s421_s26  ;;  %s425_s6 = scalar_lea.vmem %s1169_s3, %s421_s26 }
  0x40   : > { %v868_v39 = vld [vmem:[%s1105_s9 + $0x60] sm:$0xff]  ;;  %v867_v41 = vld [vmem:[%s1105_s9 + $0x58] sm:$0xff]  ;;  %v866_v43 = vld [vmem:[%s1105_s9 + $0x50] sm:$0xff]  ;;  %s622_s13 = scalar_lea.vmem (%p1019_p6), %s1170_s4, %s851_s10 }
  0x41   : > { %v857_v44 = vld [vmem:[%s1105_s9 + $0x8] sm:$0xff]  ;;  %v780_v46 = vld [vmem:[%s1166_s0] sm:$0xf]  ;;  %v854_v48 = vld [vmem:[%s1166_s0 + $0x4] sm:$0xf] }
  0x42   : > { %568 = vmatpush.bf16.msra.mxu0 %v862_v34  ;;  %v865_v45 = vld [vmem:[%s1105_s9 + $0x48] sm:$0xff]  ;;  %v856_v49 = vld [vmem:[%s1105_s9] sm:$0xff] }
  0x43   : > { %582 = vmatpush.bf16.msra.mxu1 %v870_v35  ;;  %v855_v47 = vld [vmem:[%s1166_s0 + $0x4] sm:$0xf0]  ;;  %v864_v50 = vld [vmem:[%s1105_s9 + $0x40] sm:$0xff]  ;;  %v782_v51 = vld [vmem:[%s1166_s0 + $0x8] sm:$0xf0]  ;;  %s412_s9 = scalar_lea.vmem [#allocation3], %s777_s8 }
  0x44   : > { %v781_v52 = vor.u32 %v855_v47, %v780_v46  ;;  %v785_v53 = vor.u32 %v854_v48, %v782_v51  ;;  %v917_v57 = vld [vmem:[%s422_s29] ss:$0 sm:$0xff] }
  0x45   : > { %v918_v61 = vld [vmem:[%s425_s6] ss:$0 sm:$0xff] }
  0x46   : > { %569 = vmatpush.bf16.msra.mxu0 %v861_v36 }
  0x47   : > { %583 = vmatpush.bf16.msra.mxu1 %v869_v37 }
  0x4a   : > { %570 = vmatpush.bf16.msra.mxu0 %v860_v38 }
  0x4b   : > { %584 = vmatpush.bf16.msra.mxu1 %v868_v39 }
  0x4e   : > { %571 = vmatpush.bf16.msra.mxu0 %v859_v40 }
  0x4f   : > { %585 = vmatpush.bf16.msra.mxu1 %v867_v41 }
  0x52   : > { %572 = vmatpush.bf16.msra.mxu0 %v858_v42 }
  0x53   : > { %586 = vmatpush.bf16.msra.mxu1 %v866_v43 }
  0x56   : > { %573 = vmatpush.bf16.msra.mxu0 %v857_v44 }
  0x57   : > { %587 = vmatpush.bf16.msra.mxu1 %v865_v45 }
  0x5a   : > { %574 = vmatpush.bf16.msra.mxu0 %v856_v49 }
  0x5b   : > { %588 = vmatpush.bf16.msra.mxu1 %v864_v50 }
  0x5d   : > { %575 = vmatmul.bf16.vlgmr.msra.gmra.mxu0 %v781_v52 }
  0x5e   : > { %589 = vmatmul.bf16.vlgmr.msra.gmra.mxu1 %v785_v53 }
  0xda   : > { %v576_v54 = vpop.f32.mrf.mxu0 }
  0xdb   : > { %v590_v55 = vpop.f32.mrf.mxu1 }
  0xdc   : > { %v591_v56 = vadd.f32 %v590_v55, %v576_v54 }
  0xde   : > { %v599_v60 = vmul.f32 %v917_v57, %v591_v56 }
  0xe0   : > { %v605_v0 = vadd.f32 %v918_v61, %v599_v60 }
  0xe2   : > { %v578_v58 = vpop.f32.mrf.mxu0 }
  0xe3   : > { %v592_v59 = vpop.f32.mrf.mxu1 }
  0xe4   : > { %v593_v62 = vadd.f32 %v592_v59, %v578_v58 }
  0xe6   : > { %v600_v63 = vmul.f32 %v917_v57, %v593_v62 }
  0xe8   : > { %v606_v1 = vadd.f32 %v918_v61, %v600_v63  ;;  %617 = sbr.rel (!%p1019_p6) target bundleno = 246 (0xf6), region = 81 }
  0xea   : > { %v875_v2 = vpack.c.bf16 %v606_v1, %v605_v0 }
  0xec   : > { %876 = vst [vmem:[%s412_s9] sm:$0xff] %v875_v2  }
  0xf3   : > { %v639_v3 = vld [vmem:[%s412_s9] sm:$0xf]  ;;  %v641_v4 = vld [vmem:[%s412_s9 + $0x4] sm:$0xf] }
  0xf4   : > { %640 = vst [vmem:[%s622_s13] sm:$0xf] %v639_v3 }
  0xf5   : > { %642 = vst [vmem:[%s622_s13 + $0x10] sm:$0xf] %v641_v4 }
  0xf6 PF: > { %s14_s19 = sadd.s32 1, %s957_s19   ;;  %s1172_s15 = smov %s945_s16 }
  0xf7   : > { %p11_p12 = scmp.ge.s32.totalorder %s14_s19, 6   ;;  %s1173_s16 = smov %s1024_s25 }
  0xf8   : > { %s1174_s17 = smov %s953_s18  ;;  %s1175_s18 = smov %s1177_s20 }
  0xf9   :  { %13 = sbr.rel (!%p11_p12) target bundleno = 3 (0x3), region = 162 }

// kernel: resnet3d_forward.23
= control target key start
LH: loop header
LB: loop body
LE: loop exit
PB: predicated region body
PF: predicated region fallthrough
CT: control target
= control target key end

     0   :  { %s180_s0 = inlined_call_operand.vmem [shape: f32[16,512], index: 0, kind: input, shape index: {}]   ;;  %s181_s1 = inlined_call_operand.vmem [shape: f32[1,512], index: 1, kind: input, shape index: {}]   ;;  %s182_s2 = inlined_call_operand.vmem [shape: f32[1,512], index: 2, kind: input, shape index: {}]   ;;  %s183_s3 = inlined_call_operand.vmem [shape: bf16[16,512], index: 3, kind: input, shape index: {}]   ;;  %s184_s4 = inlined_call_operand.vmem [shape: bf16[16,512], index: 4, kind: output, shape index: {}]  }
   0x1   :  { %v17_v0 = vld [vmem:[%s180_s0] sm:$0xff]  ;;  %v18_v1 = vld [vmem:[%s180_s0 + $0x8] sm:$0xff]  ;;  %v19_v11 = vld [vmem:[%s180_s0 + $0x10] sm:$0xff] }
   0x2   :  { %v25_v2 = vld [vmem:[%s181_s1] sm:$0xf]  ;;  %v20_v12 = vld [vmem:[%s180_s0 + $0x18] sm:$0xff]  ;;  %v62_v13 = vld [vmem:[%s183_s3 + $0x8] sm:$0xff] }
   0x3   :  { %v27_v3 = vperm.slane %v25_v2, 0  ;;  %v28_v4 = vperm.slane %v25_v2, 1  ;;  %v43_v5 = vld [vmem:[%s182_s2] sm:$0xf]  ;;  %v29_v16 = vperm.slane %v25_v2, 2  ;;  %v30_v17 = vperm.slane %v25_v2, 3 }
   0x4   :  { %v61_v6 = vld [vmem:[%s183_s3] sm:$0xff]  ;;  %v45_v7 = vperm.slane %v43_v5, 0  ;;  %v46_v8 = vperm.slane %v43_v5, 1  ;;  %v22_v19 = vld [vmem:[%s180_s0 + $0x28] sm:$0xff]  ;;  %v63_v20 = vld [vmem:[%s183_s3 + $0x10] sm:$0xff]  ;;  %v47_v21 = vperm.slane %v43_v5, 2  ;;  %v67_v23 = vunpack.c.l.bf16 %v62_v13 }
   0x5   :  { %v65_v9 = vunpack.c.l.bf16 %v61_v6  ;;  %v66_v10 = vunpack.c.h.bf16 %v61_v6  ;;  %v35_v14 = vmul.f32 %v27_v3, %v17_v0  ;;  %v36_v15 = vmul.f32 %v28_v4, %v18_v1  ;;  %v21_v18 = vld [vmem:[%s180_s0 + $0x20] sm:$0xff]  ;;  %v23_v29 = vld [vmem:[%s180_s0 + $0x30] sm:$0xff]  ;;  %v24_v30 = vld [vmem:[%s180_s0 + $0x38] sm:$0xff] }
   0x6   :  { %v48_v22 = vperm.slane %v43_v5, 3  ;;  %v68_v24 = vunpack.c.h.bf16 %v62_v13  ;;  %v37_v27 = vmul.f32 %v29_v16, %v19_v11  ;;  %v38_v28 = vmul.f32 %v30_v17, %v20_v12  ;;  %v64_v43 = vld [vmem:[%s183_s3 + $0x18] sm:$0xff] }
   0x7   :  { %v53_v25 = vadd.f32 %v45_v7, %v35_v14  ;;  %v54_v26 = vadd.f32 %v46_v8, %v36_v15  ;;  %v39_v31 = vmul.f32 %v27_v3, %v21_v18  ;;  %v40_v32 = vmul.f32 %v28_v4, %v22_v19 }
   0x8   :  { %v69_v33 = vunpack.c.l.bf16 %v63_v20  ;;  %v70_v34 = vunpack.c.h.bf16 %v63_v20  ;;  %v55_v37 = vadd.f32 %v47_v21, %v37_v27  ;;  %v56_v38 = vadd.f32 %v48_v22, %v38_v28 }
   0x9   :  { %v73_v35 = vadd.f32 %v65_v9, %v53_v25  ;;  %v74_v36 = vadd.f32 %v66_v10, %v54_v26  ;;  %v57_v39 = vadd.f32 %v45_v7, %v39_v31  ;;  %v58_v40 = vadd.f32 %v46_v8, %v40_v32 }
   0xa   :  { %v41_v41 = vmul.f32 %v29_v16, %v23_v29  ;;  %v42_v42 = vmul.f32 %v30_v17, %v24_v30  ;;  %v75_v46 = vadd.f32 %v67_v23, %v55_v37  ;;  %v76_v47 = vadd.f32 %v68_v24, %v56_v38 }
   0xb   :  { %v81_v44 = vmax.f32 %v73_v35, 0.0  ;;  %v82_v45 = vmax.f32 %v74_v36, 0.0  ;;  %v77_v48 = vadd.f32 %v69_v33, %v57_v39  ;;  %v78_v49 = vadd.f32 %v70_v34, %v58_v40 }
   0xc   :  { %v59_v50 = vadd.f32 %v47_v21, %v41_v41  ;;  %v60_v51 = vadd.f32 %v48_v22, %v42_v42  ;;  %v83_v53 = vmax.f32 %v75_v46, 0.0  ;;  %v84_v54 = vmax.f32 %v76_v47, 0.0 }
   0xd   :  { %v89_v52 = vpack.c.bf16 %v82_v45, %v81_v44  ;;  %v71_v55 = vunpack.c.l.bf16 %v64_v43  ;;  %v85_v56 = vmax.f32 %v77_v48, 0.0  ;;  %v86_v57 = vmax.f32 %v78_v49, 0.0 }
   0xe   :  { %v72_v58 = vunpack.c.h.bf16 %v64_v43  ;;  %v90_v59 = vpack.c.bf16 %v84_v54, %v83_v53 }
   0xf   :  { %93 = vst [vmem:[%s184_s4] sm:$0xff] %v89_v52  ;;  %v79_v60 = vadd.f32 %v71_v55, %v59_v50  ;;  %v91_v61 = vpack.c.bf16 %v86_v57, %v85_v56 }
  0x10   :  { %v80_v62 = vadd.f32 %v72_v58, %v60_v51  ;;  %94 = vst [vmem:[%s184_s4 + $0x8] sm:$0xff] %v90_v59 }
  0x11   :  { %v87_v63 = vmax.f32 %v79_v60, 0.0  ;;  %95 = vst [vmem:[%s184_s4 + $0x10] sm:$0xff] %v91_v61 }
  0x12   :  { %v88_v0 = vmax.f32 %v80_v62, 0.0 }
  0x14   :  { %v92_v1 = vpack.c.bf16 %v88_v0, %v87_v63 }
  0x16   :  { %96 = vst [vmem:[%s184_s4 + $0x18] sm:$0xff] %v92_v1 }

</bundles_post_ra>
